<compile_context>
chip_gen: v5e
topology: v5e:2x2
jax: 0.10.0
libtpu: 0.0.40
codegen_flags: <defaults>
</compile_context>

<pallas_src>
import jax
import jax.numpy as jnp
from jax.experimental import pallas as pl
from jax.experimental.pallas import tpu as pltpu


# ----------------------------------------------------------------------------
# Kernels
# ----------------------------------------------------------------------------
def _ecr_mlp_resident_kernel(x_ref, p_ref, we_ref, be_ref, w1_ref, b1_ref,
                             w2_ref, b2_ref, o_ref):
    """Whole MLP per batch tile; all (padded) weights resident in VMEM."""
    mxu = we_ref.dtype                                    # bf16 (f32 debug path)
    x_f32 = x_ref[...].astype(jnp.float32)                # residual path in f32

    # Parameter embedding: Linear P -> E. MXU operands, f32 accumulation.
    emb = jnp.dot(p_ref[...], we_ref[...],
                  preferred_element_type=jnp.float32) + be_ref[...]

    # Layer 1 on concat([x, emb]) as ONE K=(Dp+Ep) contraction.  The lane
    # concat is cheap VPU/vst work that hides under the MXU and fills the
    # 2x256x256 MXUs of v6e/v7x better than two K=128 dots.
    comb = jnp.concatenate([x_f32.astype(mxu), emb.astype(mxu)], axis=-1)
    h = jnp.dot(comb, w1_ref[...],
                preferred_element_type=jnp.float32) + b1_ref[...]
    h = jnp.maximum(h, 0.0)                               # ReLU in f32

    # Layer 2: H -> D, residual add in f32, single lane-dense store.
    r = jnp.dot(h.astype(mxu), w2_ref[...],
                preferred_element_type=jnp.float32) + b2_ref[...]
    o_ref[...] = (x_f32 + r).astype(o_ref.dtype)


def _ecr_mlp_htile_kernel(x_ref, p_ref, we_ref, be_ref, w1_ref, b1_ref,
                          w2_ref, b2_ref, o_ref, comb_ref):
    """H-tiled fallback for weights too large to keep resident (v7x 64 MiB).

    grid = (batch tiles, H tiles).  The output block is revisited across the
    H ("arbitrary") axis and used directly as the f32 accumulator; the
    combined [x | emb] activation is built once per batch tile at h == 0.
    ReLU is column-wise elementwise, so applying it per H-tile is exact.
    """
    h_idx = pl.program_id(1)
    mxu = we_ref.dtype

    @pl.when(h_idx == 0)
    def _():
        x_f32 = x_ref[...].astype(jnp.float32)
        emb = jnp.dot(p_ref[...], we_ref[...],
                      preferred_element_type=jnp.float32) + be_ref[...]
        comb_ref[...] = jnp.concatenate(
            [x_f32.astype(mxu), emb.astype(mxu)], axis=-1)
        o_ref[...] = x_f32 + b2_ref[...]          # residual + bias, added once

    h = jnp.dot(comb_ref[...], w1_ref[...],
                preferred_element_type=jnp.float32) + b1_ref[...]
    h = jnp.maximum(h, 0.0)
    o_ref[...] += jnp.dot(h.astype(mxu), w2_ref[...],
                          preferred_element_type=jnp.float32)


# ----------------------------------------------------------------------------
# Small helpers
# ----------------------------------------------------------------------------
def _cdiv(a, b):
    return -(-a // b)


def _round_up(n, m):
    return _cdiv(n, m) * m


def _pad2d(a, rows, cols):
    pr, pc = rows - a.shape[0], cols - a.shape[1]
    if pr == 0 and pc == 0:
        return a
    return jnp.pad(a, ((0, pr), (0, pc)))


def _vmem_capacity_bytes(default=64 * 1024 * 1024):
    """Per-core VMEM capacity; conservative (v7x) fallback if the query fails."""
    try:
        return int(getattr(pltpu.get_tpu_info(), "vmem_capacity_bytes", default))
    except Exception:
        return default


def _vmem_limit(need_bytes, cap):
    """Scoped VMEM limit: actual footprint + slack, capped below physical VMEM
    so Mosaic internal scratch / semaphores always have headroom."""
    return int(min(cap * 3 // 4, max(32 << 20, int(need_bytes * 1.5) + (4 << 20))))


_UNSET = object()
_WEIGHT_MODE_CACHE = _UNSET


def _weight_buffering_mode():
    """pl.Buffered(1) for grid-invariant weight specs if BlockSpec.pipeline_mode
    is supported by the installed JAX; otherwise None (default double-buffer).
    Probed once with a tiny kernel so an unsupported feature can never break
    the real forward pass."""
    global _WEIGHT_MODE_CACHE
    if _WEIGHT_MODE_CACHE is not _UNSET:
        return _WEIGHT_MODE_CACHE
    mode = None
    try:
        def _probe(x_ref, w_ref, o_ref):
            o_ref[...] = x_ref[...] + w_ref[...]

        fn = pl.pallas_call(
            _probe,
            out_shape=jax.ShapeDtypeStruct((16, 128), jnp.float32),
            grid=(2,),
            in_specs=[
                pl.BlockSpec((8, 128), lambda i: (i, 0)),
                pl.BlockSpec((8, 128), lambda i: (0, 0),
                             pipeline_mode=pl.Buffered(1)),
            ],
            out_specs=pl.BlockSpec((8, 128), lambda i: (i, 0)),
        )
        jax.block_until_ready(fn(jnp.zeros((16, 128), jnp.float32),
                                 jnp.ones((8, 128), jnp.float32)))
        mode = pl.Buffered(1)
    except Exception:
        mode = None
    _WEIGHT_MODE_CACHE = mode
    return mode


def _wspec(shape, index_map, mode):
    if mode is None:
        return pl.BlockSpec(shape, index_map)
    return pl.BlockSpec(shape, index_map, pipeline_mode=mode)


# ----------------------------------------------------------------------------
# One-time weight preparation (hoisted out of the per-call hot path)
# ----------------------------------------------------------------------------
def prepare_weights(weights, input_dim, *, mxu_dtype=jnp.bfloat16, lane=128):
    """Pad / cast / stack the module weights once.

    weights = (We [P,E], be, W1 [D+E,H], b1, W2 [H,D], b2).
    Returns the padded tuple consumed by ecr_mlp_forward.
    """
    We, be, W1, b1, W2, b2 = weights
    P, E = We.shape
    D = input_dim
    H = W1.shape[1]
    assert W1.shape[0] == D + E, "W1 must have input_dim + embed_dim rows"
    assert W2.shape[1] == D, "residual add requires output_dim == input_dim"

    Dp, Pp, Ep, Hp = (_round_up(v, lane) for v in (D, P, E, H))
    be = jnp.reshape(be, (1, E))
    b1 = jnp.reshape(b1, (1, H))
    b2 = jnp.reshape(b2, (1, D))

    # concat([x, emb]) @ W1  ==  [x_pad | emb_pad] @ [W1x_pad ; W1e_pad]
    W1_p = jnp.concatenate([_pad2d(W1[:D], Dp, Hp), _pad2d(W1[D:], Ep, Hp)], 0)

    return (
        _pad2d(We, Pp, Ep).astype(mxu_dtype),      # (Pp, Ep)
        _pad2d(be, 1, Ep).astype(jnp.float32),     # (1, Ep)
        W1_p.astype(mxu_dtype),                    # (Dp+Ep, Hp) stacked
        _pad2d(b1, 1, Hp).astype(jnp.float32),     # (1, Hp)
        _pad2d(W2, Hp, Dp).astype(jnp.float32).astype(mxu_dtype),  # (Hp, Dp)
        _pad2d(b2, 1, Dp).astype(jnp.float32),     # (1, Dp)
    )


# ----------------------------------------------------------------------------
# Forward wrapper
# ----------------------------------------------------------------------------
def ecr_mlp_forward(x, params, prepared_weights, *, block_b=512, block_h=None,
                    force_weight_tiling=False, unpad_output=True, lane=128):
    """out = x + MLP(concat([x, emb(params)])) with pre-padded weights.

    x: [B, D], params: [B, P].  Returns [B, D] in x.dtype, or the padded
    (Bp, Dp) f32 buffer when unpad_output=False (for fused downstream use).
    """
    We_p, be_p, W1_p, b1_p, W2_p, b2_p = prepared_weights
    B, D = x.shape
    P = params.shape[1]
    Pp, Ep = We_p.shape
    DpEp, Hp = W1_p.shape
    Dp = W2_p.shape[1]
    assert DpEp == Dp + Ep
    assert _round_up(D, lane) == Dp and _round_up(P, lane) == Pp
    mxu = We_p.dtype
    wbytes = jnp.dtype(mxu).itemsize

    # Batch tile: big enough to amortize the ~0.35us/step pipeline overhead and
    # reach the HBM roofline (128-row tiles ~29%, 512 ~85%), clamped so the
    # "parallel" batch axis keeps >= 4 steps for v7x's two TensorCores.
    block_b = max(8, min(block_b, _round_up(_cdiv(B, 4), 8)))
    Bp = _round_up(B, block_b)
    n_b = Bp // block_b

    # Per-call activation prep only (weights were prepared once, elsewhere).
    # Note: for P << 128 an unpadded (block_b, P) params spec would cut params
    # DMA ~16x; kept padded here for guaranteed-clean MXU lowering.
    x_p = _pad2d(x.astype(jnp.float32), Bp, Dp)
    p_p = _pad2d(params, Bp, Pp).astype(mxu)

    cap = _vmem_capacity_bytes()
    budget = int(cap * 0.7)
    wmode = _weight_buffering_mode()
    wcount = 1 if wmode is not None else 2

    # Estimated VMEM footprints (double-buffered activations, weight buffers).
    act_bytes = 2 * block_b * (2 * Dp * 4 + Pp * wbytes)          # x, out, params
    resident_w = wcount * ((Pp * Ep + DpEp * Hp + Hp * Dp) * wbytes
                           + (Ep + Hp + Dp) * 4)
    use_tiled = force_weight_tiling or (act_bytes + resident_w > budget)

    out_shape = jax.ShapeDtypeStruct((Bp, Dp), jnp.float32)

    if not use_tiled:
        # ------------------------- resident-weights path ---------------------
        inv1 = lambda i: (0, 0)
        out_p = pl.pallas_call(
            _ecr_mlp_resident_kernel,
            out_shape=out_shape,
            grid_spec=pltpu.PrefetchScalarGridSpec(
                num_scalar_prefetch=0,
                grid=(n_b,),
                in_specs=[
                    pl.BlockSpec((block_b, Dp), lambda i: (i, 0)),   # x
                    pl.BlockSpec((block_b, Pp), lambda i: (i, 0)),   # params
                    _wspec((Pp, Ep), inv1, wmode),                   # We
                    _wspec((1, Ep), inv1, wmode),                    # be
                    _wspec((DpEp, Hp), inv1, wmode),                 # W1 (stacked)
                    _wspec((1, Hp), inv1, wmode),                    # b1
                    _wspec((Hp, Dp), inv1, wmode),                   # W2
                    _wspec((1, Dp), inv1, wmode),                    # b2
                ],
                out_specs=pl.BlockSpec((block_b, Dp), lambda i: (i, 0)),
            ),
            compiler_params=pltpu.CompilerParams(
                dimension_semantics=("parallel",),
                vmem_limit_bytes=_vmem_limit(act_bytes + resident_w, cap),
            ),
            # out reuses x_p's HBM buffer; x_p is an internal padded intermediate.
            input_output_aliases={0: 0},
        )(x_p, p_p, We_p, be_p, W1_p, b1_p, W2_p, b2_p)
    else:
        # ----------------------- weight-tiled (H) fallback --------------------
        inv_bytes = wcount * (Pp * Ep * wbytes + (Ep + Dp) * 4)
        comb_bytes = block_b * DpEp * wbytes
        if block_h is None:
            block_h = lane
            for cand in range(Hp, 0, -lane):
                if Hp % cand:
                    continue
                stream = 2 * ((DpEp + Dp) * cand * wbytes + cand * 4)
                if act_bytes + inv_bytes + comb_bytes + stream <= budget:
                    block_h = cand
                    break
        assert Hp % block_h == 0 and block_h % lane == 0
        n_h = Hp // block_h
        stream = 2 * ((DpEp + Dp) * block_h * wbytes + block_h * 4)
        need = act_bytes + inv_bytes + comb_bytes + stream

        inv2 = lambda i, h: (0, 0)
        out_p = pl.pallas_call(
            _ecr_mlp_htile_kernel,
            out_shape=out_shape,
            grid_spec=pltpu.PrefetchScalarGridSpec(
                num_scalar_prefetch=0,
                grid=(n_b, n_h),
                in_specs=[
                    pl.BlockSpec((block_b, Dp), lambda i, h: (i, 0)),    # x
                    pl.BlockSpec((block_b, Pp), lambda i, h: (i, 0)),    # params
                    _wspec((Pp, Ep), inv2, wmode),                       # We
                    _wspec((1, Ep), inv2, wmode),                        # be
                    pl.BlockSpec((DpEp, block_h), lambda i, h: (0, h)),  # W1 tile
                    pl.BlockSpec((1, block_h), lambda i, h: (0, h)),     # b1 tile
                    pl.BlockSpec((block_h, Dp), lambda i, h: (h, 0)),    # W2 tile
                    _wspec((1, Dp), inv2, wmode),                        # b2
                ],
                out_specs=pl.BlockSpec((block_b, Dp), lambda i, h: (i, 0)),
                scratch_shapes=[pltpu.VMEM((block_b, DpEp), mxu)],       # [x | emb]
            ),
            compiler_params=pltpu.CompilerParams(
                dimension_semantics=("parallel", "arbitrary"),
                vmem_limit_bytes=_vmem_limit(need, cap),
            ),
            input_output_aliases={0: 0},
        )(x_p, p_p, We_p, be_p, W1_p, b1_p, W2_p, b2_p)

    if unpad_output:
        # Callers chaining padded consumers should pass unpad_output=False to
        # skip this extra HBM pass; unpadded here to match the torch module.
        return out_p[:B, :D].astype(x.dtype)
    return out_p


# ----------------------------------------------------------------------------
# Reference (mirrors the PyTorch module) and synthetic init
# ----------------------------------------------------------------------------
def init_weights(key, input_dim, parameter_dim, output_dim, hidden_dim, embed_dim):
    """Deterministic synthetic init (uniform, torch-Linear-like fan-in scaling)."""
    ks = jax.random.split(key, 6)

    def lin(kw, kb, fan_in, fan_out):
        bound = 1.0 / jnp.sqrt(fan_in)
        W = jax.random.uniform(kw, (fan_in, fan_out), jnp.float32, -bound, bound)
        b = jax.random.uniform(kb, (1, fan_out), jnp.float32, -bound, bound)
        return W, b

    We, be = lin(ks[0], ks[1], parameter_dim, embed_dim)
    W1, b1 = lin(ks[2], ks[3], input_dim + embed_dim, hidden_dim)
    W2, b2 = lin(ks[4], ks[5], hidden_dim, output_dim)
    return We, be, W1, b1, W2, b2


def reference_forward(x, params, weights):
    We, be, W1, b1, W2, b2 = weights
    hp = jax.lax.Precision.HIGHEST
    emb = jnp.dot(params, We, precision=hp) + be
    combined = jnp.concatenate([x, emb], axis=-1)
    h = jnp.maximum(jnp.dot(combined, W1, precision=hp) + b1, 0.0)
    return x + jnp.dot(h, W2, precision=hp) + b2


# ----------------------------------------------------------------------------
# Self-test
# ----------------------------------------------------------------------------
if __name__ == "__main__":
    # Small feature dims (padded to the 128-lane width inside prepare/forward);
    # batch chosen so the default 512-row tile gives a 4-step "parallel" grid.
    B, D, P = 2048, 16, 8
    HIDDEN, EMBED = 320, 32

    key = jax.random.PRNGKey(0)
    kx, kp, kw = jax.random.split(key, 3)
    x = jax.random.normal(kx, (B, D), jnp.float32)
    parameters = jax.random.normal(kp, (B, P), jnp.float32)
    weights = init_weights(kw, D, P, D, HIDDEN, EMBED)

    ref = jax.block_until_ready(reference_forward(x, parameters, weights))

    # One-time weight preparation (pad + cast) -- hoisted out of the hot path.
    w_bf16 = prepare_weights(weights, D)                          # fast path
    w_f32 = prepare_weights(weights, D, mxu_dtype=jnp.float32)    # debug path

    fwd = jax.jit(ecr_mlp_forward,
                  static_argnames=("block_b", "block_h", "force_weight_tiling",
                                   "unpad_output", "lane"))

    # 1) Plumbing check: f32 MXU path must match the f32 reference tightly.
    out_f32 = jax.block_until_ready(fwd(x, parameters, w_f32))
    assert out_f32.shape == (B, D)
    assert jnp.allclose(out_f32, ref, atol=1e-3, rtol=1e-3)

    # 2) Default fast path: resident weights, bf16 MXU operands, f32 accumulation.
    out = jax.block_until_ready(fwd(x, parameters, w_bf16))
    assert out.shape == (B, D)
    assert jnp.allclose(out, ref, atol=5e-2, rtol=5e-2)

    # 3) Weight-tiled fallback (auto-selected when weights exceed the VMEM
    #    budget, e.g. H=D=4096 on v7x); forced here with a small H tile so the
    #    multi-step accumulation path is exercised.
    out_t = jax.block_until_ready(
        fwd(x, parameters, w_bf16, force_weight_tiling=True, block_h=128))
    assert out_t.shape == (B, D)
    assert jnp.allclose(out_t, ref, atol=5e-2, rtol=5e-2)

    print("KERNEL_OK")
</pallas_src>

<mosaic_0001>
module attributes {stable_mosaic.version = 11 : i64} {
  func.func @_ecr_mlp_resident_kernel(%arg0: i32, %arg1: memref<512x128xf32, #tpu.memory_space<vmem>>, %arg2: memref<512x128xf32, #tpu.memory_space<vmem>>, %arg3: memref<128x128xf32, #tpu.memory_space<vmem>>, %arg4: memref<1x128xf32, #tpu.memory_space<vmem>>, %arg5: memref<256x384xf32, #tpu.memory_space<vmem>>, %arg6: memref<1x384xf32, #tpu.memory_space<vmem>>, %arg7: memref<384x128xf32, #tpu.memory_space<vmem>>, %arg8: memref<1x128xf32, #tpu.memory_space<vmem>>, %arg9: memref<512x128xf32, #tpu.memory_space<vmem>>) attributes {dimension_semantics = [#tpu.dimension_semantics<parallel>], iteration_bounds = array<i64: 4>, scalar_prefetch = 0 : i64, scratch_operands = 0 : i64, tpu.core_type = #tpu.core_type<tc>, window_params = [{transform_indices = @transform_0, window_bounds = array<i64: 512, 128>}, {transform_indices = @transform_1, window_bounds = array<i64: 512, 128>}, {pipeline_mode = #tpu.pipeline_mode<synchronous>, transform_indices = @transform_2, window_bounds = array<i64: 128, 128>}, {pipeline_mode = #tpu.pipeline_mode<synchronous>, transform_indices = @transform_3, window_bounds = array<i64: 1, 128>}, {pipeline_mode = #tpu.pipeline_mode<synchronous>, transform_indices = @transform_4, window_bounds = array<i64: 256, 384>}, {pipeline_mode = #tpu.pipeline_mode<synchronous>, transform_indices = @transform_5, window_bounds = array<i64: 1, 384>}, {pipeline_mode = #tpu.pipeline_mode<synchronous>, transform_indices = @transform_6, window_bounds = array<i64: 384, 128>}, {pipeline_mode = #tpu.pipeline_mode<synchronous>, transform_indices = @transform_7, window_bounds = array<i64: 1, 128>}, {transform_indices = @transform_8, window_bounds = array<i64: 512, 128>}]} {
    %c0 = arith.constant 0 : index
    %c0_0 = arith.constant 0 : index
    %0 = vector.load %arg1[%c0, %c0_0] : memref<512x128xf32, #tpu.memory_space<vmem>>, vector<512x128xf32>
    %c0_1 = arith.constant 0 : index
    %c0_2 = arith.constant 0 : index
    %1 = vector.load %arg2[%c0_1, %c0_2] : memref<512x128xf32, #tpu.memory_space<vmem>>, vector<512x128xf32>
    %c0_3 = arith.constant 0 : index
    %c0_4 = arith.constant 0 : index
    %2 = vector.load %arg3[%c0_3, %c0_4] : memref<128x128xf32, #tpu.memory_space<vmem>>, vector<128x128xf32>
    %cst = arith.constant dense<0.000000e+00> : vector<512x128xf32>
    %3 = tpu.matmul %1, %2, %cst {dimension_numbers = #tpu.dot_dimension_numbers<[1], [0], [0], [1], [0, 0, 1, 1], [], []>} : vector<512x128xf32>, vector<128x128xf32>, vector<512x128xf32> -> vector<512x128xf32>
    %c0_5 = arith.constant 0 : index
    %c0_6 = arith.constant 0 : index
    %4 = vector.load %arg4[%c0_5, %c0_6] : memref<1x128xf32, #tpu.memory_space<vmem>>, vector<1x128xf32>
    %5 = vector.broadcast %4 : vector<1x128xf32> to vector<512x128xf32>
    %6 = arith.addf %3, %5 : vector<512x128xf32>
    %7 = tpu.concatenate %0, %6 in 1 : vector<512x128xf32>, vector<512x128xf32> -> vector<512x256xf32>
    %c0_7 = arith.constant 0 : index
    %c0_8 = arith.constant 0 : index
    %8 = vector.load %arg5[%c0_7, %c0_8] : memref<256x384xf32, #tpu.memory_space<vmem>>, vector<256x384xf32>
    %cst_9 = arith.constant dense<0.000000e+00> : vector<512x384xf32>
    %9 = tpu.matmul %7, %8, %cst_9 {dimension_numbers = #tpu.dot_dimension_numbers<[1], [0], [0], [1], [0, 0, 1, 1], [], []>} : vector<512x256xf32>, vector<256x384xf32>, vector<512x384xf32> -> vector<512x384xf32>
    %c0_10 = arith.constant 0 : index
    %c0_11 = arith.constant 0 : index
    %10 = vector.load %arg6[%c0_10, %c0_11] : memref<1x384xf32, #tpu.memory_space<vmem>>, vector<1x384xf32>
    %11 = vector.broadcast %10 : vector<1x384xf32> to vector<512x384xf32>
    %12 = arith.addf %9, %11 : vector<512x384xf32>
    %cst_12 = arith.constant 0.000000e+00 : f32
    %13 = vector.broadcast %cst_12 : f32 to vector<512x384xf32>
    %14 = arith.maximumf %12, %13 : vector<512x384xf32>
    %c0_13 = arith.constant 0 : index
    %c0_14 = arith.constant 0 : index
    %15 = vector.load %arg7[%c0_13, %c0_14] : memref<384x128xf32, #tpu.memory_space<vmem>>, vector<384x128xf32>
    %cst_15 = arith.constant dense<0.000000e+00> : vector<512x128xf32>
    %16 = tpu.matmul %14, %15, %cst_15 {dimension_numbers = #tpu.dot_dimension_numbers<[1], [0], [0], [1], [0, 0, 1, 1], [], []>} : vector<512x384xf32>, vector<384x128xf32>, vector<512x128xf32> -> vector<512x128xf32>
    %c0_16 = arith.constant 0 : index
    %c0_17 = arith.constant 0 : index
    %17 = vector.load %arg8[%c0_16, %c0_17] : memref<1x128xf32, #tpu.memory_space<vmem>>, vector<1x128xf32>
    %18 = vector.broadcast %17 : vector<1x128xf32> to vector<512x128xf32>
    %19 = arith.addf %16, %18 : vector<512x128xf32>
    %20 = arith.addf %0, %19 : vector<512x128xf32>
    %c0_18 = arith.constant 0 : index
    %c0_19 = arith.constant 0 : index
    %21 = vector.load %arg9[%c0_18, %c0_19] : memref<512x128xf32, #tpu.memory_space<vmem>>, vector<512x128xf32>
    tpu.vector_store %arg9[%c0_18, %c0_19], %20 {strides = array<i32>} : memref<512x128xf32, #tpu.memory_space<vmem>>, vector<512x128xf32>,
    return
  }
  func.func @transform_0(%arg0: i32) -> (i32, i32) {
    %c0_i32 = arith.constant 0 : i32
    %c0_i32_0 = arith.constant 0 : i32
    return %arg0, %c0_i32 : i32, i32
  }
  func.func @transform_1(%arg0: i32) -> (i32, i32) {
    %c0_i32 = arith.constant 0 : i32
    %c0_i32_0 = arith.constant 0 : i32
    return %arg0, %c0_i32 : i32, i32
  }
  func.func @transform_2(%arg0: i32) -> (i32, i32) {
    %c0_i32 = arith.constant 0 : i32
    %c0_i32_0 = arith.constant 0 : i32
    %c0_i32_1 = arith.constant 0 : i32
    return %c0_i32, %c0_i32_0 : i32, i32
  }
  func.func @transform_3(%arg0: i32) -> (i32, i32) {
    %c0_i32 = arith.constant 0 : i32
    %c0_i32_0 = arith.constant 0 : i32
    %c0_i32_1 = arith.constant 0 : i32
    return %c0_i32, %c0_i32_0 : i32, i32
  }
  func.func @transform_4(%arg0: i32) -> (i32, i32) {
    %c0_i32 = arith.constant 0 : i32
    %c0_i32_0 = arith.constant 0 : i32
    %c0_i32_1 = arith.constant 0 : i32
    return %c0_i32, %c0_i32_0 : i32, i32
  }
  func.func @transform_5(%arg0: i32) -> (i32, i32) {
    %c0_i32 = arith.constant 0 : i32
    %c0_i32_0 = arith.constant 0 : i32
    %c0_i32_1 = arith.constant 0 : i32
    return %c0_i32, %c0_i32_0 : i32, i32
  }
  func.func @transform_6(%arg0: i32) -> (i32, i32) {
    %c0_i32 = arith.constant 0 : i32
    %c0_i32_0 = arith.constant 0 : i32
    %c0_i32_1 = arith.constant 0 : i32
    return %c0_i32, %c0_i32_0 : i32, i32
  }
  func.func @transform_7(%arg0: i32) -> (i32, i32) {
    %c0_i32 = arith.constant 0 : i32
    %c0_i32_0 = arith.constant 0 : i32
    %c0_i32_1 = arith.constant 0 : i32
    return %c0_i32, %c0_i32_0 : i32, i32
  }
  func.func @transform_8(%arg0: i32) -> (i32, i32) {
    %c0_i32 = arith.constant 0 : i32
    %c0_i32_0 = arith.constant 0 : i32
    return %arg0, %c0_i32 : i32, i32
  }
}

</mosaic_0001>

<bundles_post_ra>
// kernel: ecr_mlp_forward.1
= control target key start
LH: loop header
LB: loop body
LE: loop exit
PB: predicated region body
PF: predicated region fallthrough
CT: control target
= control target key end

     0   :  { %s3258_s27 = smov 0   ;;  %s6112_s0 = inlined_call_operand.vmem [shape: f32[2048,128], index: 0, kind: input, shape index: {}, may-alias: {0,8}]   ;;  %s6113_s1 = inlined_call_operand.vmem [shape: f32[2048,128], index: 1, kind: input, shape index: {}]   ;;  %s6114_s2 = inlined_call_operand.vmem [shape: f32[128,128], index: 2, kind: input, shape index: {}]   ;;  %s6115_s3 = inlined_call_operand.vmem [shape: f32[1,128], index: 3, kind: input, shape index: {}]   ;;  %s6116_s4 = inlined_call_operand.vmem [shape: f32[256,384], index: 4, kind: input, shape index: {}]   ;;  %s6117_s5 = inlined_call_operand.vmem [shape: f32[1,384], index: 5, kind: input, shape index: {}]   ;;  %s6118_s6 = inlined_call_operand.vmem [shape: f32[384,128], index: 6, kind: input, shape index: {}]   ;;  %s6119_s7 = inlined_call_operand.vmem [shape: f32[1,128], index: 7, kind: input, shape index: {}]   ;;  %s6120_s8 = inlined_call_operand.vmem [shape: f32[2048,128], index: 8, kind: output, shape index: {}, may-alias: {0,8}]  }
   0x1 LB: > { %s3113_s28 = sadd.s32 4294967295, %s3211_s27   ;;  %p3117_p0 = scmp.ge.s32.totalorder %s3211_s27, 1  ;;  %s3211_s27 = sphi %s3258_s27, %s18_s27  }
   0x2   : > { %p274_p1 = scmp.lt.s32.totalorder %s3211_s27, 5 }
   0x4   : > { %p275_p2 = pnand %p3117_p0, %p274_p1 }
   0x6   : > { %278 = sbr.rel (%p275_p2) target bundleno = 1584 (0x630), region = 52 }
   0xb   : > { %v474_v0 = vld [vmem:[%s6114_s2 + $0x78] sm:$0xff]  ;;  %v733_v1 = vld [vmem:[%s6116_s4 + $0x168] sm:$0xff]  ;;  %v473_v2 = vld [vmem:[%s6114_s2 + $0x70] sm:$0xff]  ;;  %s3118_s17 = sshll.u32 %s3113_s28, 6 }
   0xc   : > { %479 = vmatpush.msra.mxu0 %v474_v0  ;;  %3126 = vmatpush.msra.mxu2 %v474_v0  ;;  %v730_v3 = vld [vmem:[%s6116_s4 + $0x150] sm:$0xff]  ;;  %v472_v4 = vld [vmem:[%s6114_s2 + $0x68] sm:$0xff]  ;;  %v727_v5 = vld [vmem:[%s6116_s4 + $0x138] sm:$0xff]  ;;  %p314_p3 = scmp.lt.s32.totalorder %s3118_s17, 255 }
   0xd   : > { %3142 = vmatpush.msra.mxu3 %v733_v1  ;;  %792 = vmatpush.msra.mxu1 %v733_v1  ;;  %v471_v6 = vld [vmem:[%s6114_s2 + $0x60] sm:$0xff]  ;;  %v470_v8 = vld [vmem:[%s6114_s2 + $0x58] sm:$0xff]  ;;  %v721_v9 = vld [vmem:[%s6116_s4 + $0x108] sm:$0xff] }
   0xe   : > { %480 = vmatpush.msra.mxu0 %v473_v2  ;;  %3127 = vmatpush.msra.mxu2 %v473_v2  ;;  %v724_v7 = vld [vmem:[%s6116_s4 + $0x120] sm:$0xff]  ;;  %v469_v10 = vld [vmem:[%s6114_s2 + $0x50] sm:$0xff]  ;;  %v468_v12 = vld [vmem:[%s6114_s2 + $0x48] sm:$0xff]  ;;  %s6943_s17 = smov (!%p314_p3, %s3118_s17), 255 }
   0xf   : > { %3143 = vmatpush.msra.mxu3 %v730_v3  ;;  %793 = vmatpush.msra.mxu1 %v730_v3  ;;  %v718_v11 = vld [vmem:[%s6116_s4 + $0xf0] sm:$0xff]  ;;  %v715_v13 = vld [vmem:[%s6116_s4 + $0xd8] sm:$0xff]  ;;  %v467_v14 = vld [vmem:[%s6114_s2 + $0x40] sm:$0xff]  ;;  %s3346_s20 = sshll.u32 %s6943_s17, 3 }
  0x10   : > { %481 = vmatpush.msra.mxu0 %v472_v4  ;;  %3128 = vmatpush.msra.mxu2 %v472_v4  ;;  %v712_v15 = vld [vmem:[%s6116_s4 + $0xc0] sm:$0xff]  ;;  %v466_v16 = vld [vmem:[%s6114_s2 + $0x38] sm:$0xff]  ;;  %v709_v17 = vld [vmem:[%s6116_s4 + $0xa8] sm:$0xff]  ;;  %s3361_s29 = scalar_lea.vmem %s6113_s1, %s3346_s20  ;;  %s3370_s12 = scalar_lea.vmem %s6112_s0, %s3346_s20 }
  0x11   : > { %3144 = vmatpush.msra.mxu3 %v727_v5  ;;  %794 = vmatpush.msra.mxu1 %v727_v5  ;;  %v465_v18 = vld [vmem:[%s6114_s2 + $0x30] sm:$0xff]  ;;  %v464_v20 = vld [vmem:[%s6114_s2 + $0x28] sm:$0xff]  ;;  %v703_v21 = vld [vmem:[%s6116_s4 + $0x78] sm:$0xff]  ;;  %s5648_s17 = scalar_lea.vmem %s6120_s8, %s3346_s20 }
  0x12   : > { %482 = vmatpush.msra.mxu0 %v471_v6  ;;  %3129 = vmatpush.msra.mxu2 %v471_v6  ;;  %v706_v19 = vld [vmem:[%s6116_s4 + $0x90] sm:$0xff]  ;;  %v463_v22 = vld [vmem:[%s6114_s2 + $0x20] sm:$0xff]  ;;  %v462_v24 = vld [vmem:[%s6114_s2 + $0x18] sm:$0xff] }
  0x13   : > { %3145 = vmatpush.msra.mxu3 %v724_v7  ;;  %795 = vmatpush.msra.mxu1 %v724_v7  ;;  %v700_v23 = vld [vmem:[%s6116_s4 + $0x60] sm:$0xff]  ;;  %v697_v25 = vld [vmem:[%s6116_s4 + $0x48] sm:$0xff]  ;;  %v461_v26 = vld [vmem:[%s6114_s2 + $0x10] sm:$0xff] }
  0x14   : > { %483 = vmatpush.msra.mxu0 %v470_v8  ;;  %3130 = vmatpush.msra.mxu2 %v470_v8  ;;  %v694_v27 = vld [vmem:[%s6116_s4 + $0x30] sm:$0xff]  ;;  %v460_v28 = vld [vmem:[%s6114_s2 + $0x8] sm:$0xff]  ;;  %v691_v29 = vld [vmem:[%s6116_s4 + $0x18] sm:$0xff] }
  0x15   : > { %3146 = vmatpush.msra.mxu3 %v721_v9  ;;  %796 = vmatpush.msra.mxu1 %v721_v9  ;;  %v459_v30 = vld [vmem:[%s6114_s2] sm:$0xff]  ;;  %v781_v35 = vld [vmem:[%s6116_s4 + $0x2e8] sm:$0xff]  ;;  %v778_v36 = vld [vmem:[%s6116_s4 + $0x2d0] sm:$0xff] }
  0x16   : > { %484 = vmatpush.msra.mxu0 %v469_v10  ;;  %3131 = vmatpush.msra.mxu2 %v469_v10  ;;  %v688_v31 = vld [vmem:[%s6116_s4] sm:$0xff]  ;;  %v775_v37 = vld [vmem:[%s6116_s4 + $0x2b8] sm:$0xff]  ;;  %v396_v38 = vld [vmem:[%s3361_s29 + $0x8] sm:$0xff] }
  0x17   : > { %3147 = vmatpush.msra.mxu3 %v718_v11  ;;  %797 = vmatpush.msra.mxu1 %v718_v11  ;;  %v395_v32 = vld [vmem:[%s3361_s29] sm:$0xff]  ;;  %v428_v39 = vld [vmem:[%s3361_s29 + $0x108] sm:$0xff]  ;;  %v397_v41 = vld [vmem:[%s3361_s29 + $0x10] sm:$0xff] }
  0x18   : > { %485 = vmatpush.msra.mxu0 %v468_v12  ;;  %3132 = vmatpush.msra.mxu2 %v468_v12  ;;  %v427_v33 = vld [vmem:[%s3361_s29 + $0x100] sm:$0xff]  ;;  %v364_v40 = vld [vmem:[%s3370_s12 + $0x108] sm:$0xff]  ;;  %v429_v42 = vld [vmem:[%s3361_s29 + $0x110] sm:$0xff] }
  0x19   : > { %3148 = vmatpush.msra.mxu3 %v715_v13  ;;  %798 = vmatpush.msra.mxu1 %v715_v13  ;;  %v363_v34 = vld [vmem:[%s3370_s12 + $0x100] sm:$0xff]  ;;  %v365_v43 = vld [vmem:[%s3370_s12 + $0x110] sm:$0xff]  ;;  %v398_v45 = vld [vmem:[%s3361_s29 + $0x18] sm:$0xff] }
  0x1a   : > { %486 = vmatpush.msra.mxu0 %v467_v14  ;;  %3133 = vmatpush.msra.mxu2 %v467_v14  ;;  %v772_v44 = vld [vmem:[%s6116_s4 + $0x2a0] sm:$0xff]  ;;  %v430_v46 = vld [vmem:[%s3361_s29 + $0x118] sm:$0xff]  ;;  %v769_v51 = vld [vmem:[%s6116_s4 + $0x288] sm:$0xff] }
  0x1b   : > { %3149 = vmatpush.msra.mxu3 %v712_v15  ;;  %799 = vmatpush.msra.mxu1 %v712_v15  ;;  %v366_v47 = vld [vmem:[%s3370_s12 + $0x118] sm:$0xff]  ;;  %v399_v48 = vld [vmem:[%s3361_s29 + $0x20] sm:$0xff]  ;;  %v400_v52 = vld [vmem:[%s3361_s29 + $0x28] sm:$0xff] }
  0x1c   : > { %487 = vmatpush.msra.mxu0 %v466_v16  ;;  %3134 = vmatpush.msra.mxu2 %v466_v16  ;;  %v431_v49 = vld [vmem:[%s3361_s29 + $0x120] sm:$0xff]  ;;  %v432_v53 = vld [vmem:[%s3361_s29 + $0x128] sm:$0xff]  ;;  %v401_v55 = vld [vmem:[%s3361_s29 + $0x30] sm:$0xff] }
  0x1d   : > { %3150 = vmatpush.msra.mxu3 %v709_v17  ;;  %800 = vmatpush.msra.mxu1 %v709_v17  ;;  %v367_v50 = vld [vmem:[%s3370_s12 + $0x120] sm:$0xff]  ;;  %v368_v54 = vld [vmem:[%s3370_s12 + $0x128] sm:$0xff]  ;;  %v433_v56 = vld [vmem:[%s3361_s29 + $0x130] sm:$0xff] }
  0x1e   : > { %488 = vmatpush.msra.mxu0 %v465_v18  ;;  %3135 = vmatpush.msra.mxu2 %v465_v18  ;;  %v369_v57 = vld [vmem:[%s3370_s12 + $0x130] sm:$0xff]  ;;  %v402_v59 = vld [vmem:[%s3361_s29 + $0x38] sm:$0xff]  ;;  %v403_v62 = vld [vmem:[%s3361_s29 + $0x40] sm:$0xff] }
  0x1f   : > { %3151 = vmatpush.msra.mxu3 %v706_v19  ;;  %801 = vmatpush.msra.mxu1 %v706_v19  ;;  %v766_v58 = vld [vmem:[%s6116_s4 + $0x270] sm:$0xff]  ;;  %v434_v60 = vld [vmem:[%s3361_s29 + $0x138] sm:$0xff]  ;;  %v435_v63 = vld [vmem:[%s3361_s29 + $0x140] sm:$0xff] }
  0x20   : > { %489 = vmatpush.msra.mxu0 %v464_v20  ;;  %3136 = vmatpush.msra.mxu2 %v464_v20  ;;  %v370_v61 = vld [vmem:[%s3370_s12 + $0x138] sm:$0xff]  ;;  %v371_v0 = vld [vmem:[%s3370_s12 + $0x140] sm:$0xff]  ;;  %v404_v2 = vld [vmem:[%s3361_s29 + $0x48] sm:$0xff] }
  0x21   : > { %3152 = vmatpush.msra.mxu3 %v703_v21  ;;  %802 = vmatpush.msra.mxu1 %v703_v21  ;;  %v763_v1 = vld [vmem:[%s6116_s4 + $0x258] sm:$0xff]  ;;  %v436_v3 = vld [vmem:[%s3361_s29 + $0x148] sm:$0xff]  ;;  %v405_v5 = vld [vmem:[%s3361_s29 + $0x50] sm:$0xff] }
  0x22   : > { %490 = vmatpush.msra.mxu0 %v463_v22  ;;  %3137 = vmatpush.msra.mxu2 %v463_v22  ;;  %v372_v4 = vld [vmem:[%s3370_s12 + $0x148] sm:$0xff]  ;;  %v437_v6 = vld [vmem:[%s3361_s29 + $0x150] sm:$0xff]  ;;  %v760_v8 = vld [vmem:[%s6116_s4 + $0x240] sm:$0xff] }
  0x23   : > { %3153 = vmatpush.msra.mxu3 %v700_v23  ;;  %803 = vmatpush.msra.mxu1 %v700_v23  ;;  %v373_v7 = vld [vmem:[%s3370_s12 + $0x150] sm:$0xff]  ;;  %v406_v9 = vld [vmem:[%s3361_s29 + $0x58] sm:$0xff]  ;;  %v407_v12 = vld [vmem:[%s3361_s29 + $0x60] sm:$0xff] }
  0x24   : > { %491 = vmatpush.msra.mxu0 %v462_v24  ;;  %3138 = vmatpush.msra.mxu2 %v462_v24  ;;  %v438_v10 = vld [vmem:[%s3361_s29 + $0x158] sm:$0xff]  ;;  %v439_v13 = vld [vmem:[%s3361_s29 + $0x160] sm:$0xff]  ;;  %v734_v15 = vld [vmem:[%s6116_s4 + $0x170] sm:$0xff] }
  0x25   : > { %3154 = vmatpush.msra.mxu3 %v697_v25  ;;  %804 = vmatpush.msra.mxu1 %v697_v25  ;;  %v374_v11 = vld [vmem:[%s3370_s12 + $0x158] sm:$0xff]  ;;  %v375_v14 = vld [vmem:[%s3370_s12 + $0x160] sm:$0xff]  ;;  %v757_v16 = vld [vmem:[%s6116_s4 + $0x228] sm:$0xff] }
  0x26   : > { %492 = vmatpush.msra.mxu0 %v461_v26  ;;  %3139 = vmatpush.msra.mxu2 %v461_v26  ;;  %v408_v17 = vld [vmem:[%s3361_s29 + $0x68] sm:$0xff]  ;;  %v782_v20 = vld [vmem:[%s6116_s4 + $0x2f0] sm:$0xff]  ;;  %v3454_v21 = vld [vmem:[%s3370_s12] sm:$0xff] }
  0x27   : > { %3155 = vmatpush.msra.mxu3 %v694_v27  ;;  %805 = vmatpush.msra.mxu1 %v694_v27  ;;  %v440_v18 = vld [vmem:[%s3361_s29 + $0x168] sm:$0xff]  ;;  %v735_v22 = vld [vmem:[%s6116_s4 + $0x178] sm:$0xff]  ;;  %v409_v23 = vld [vmem:[%s3361_s29 + $0x70] sm:$0xff] }
  0x28   : > { %493 = vmatpush.msra.mxu0 %v460_v28  ;;  %3140 = vmatpush.msra.mxu2 %v460_v28  ;;  %v376_v19 = vld [vmem:[%s3370_s12 + $0x168] sm:$0xff]  ;;  %v441_v24 = vld [vmem:[%s3361_s29 + $0x170] sm:$0xff]  ;;  %v731_v26 = vld [vmem:[%s6116_s4 + $0x158] sm:$0xff] }
  0x29   : > { %3156 = vmatpush.msra.mxu3 %v691_v29  ;;  %806 = vmatpush.msra.mxu1 %v691_v29  ;;  %v377_v25 = vld [vmem:[%s3370_s12 + $0x170] sm:$0xff]  ;;  %v3467_v27 = vld [vmem:[%s3370_s12 + $0x8] sm:$0xff]  ;;  %v410_v29 = vld [vmem:[%s3361_s29 + $0x78] sm:$0xff] }
  0x2a   : > { %494 = vmatpush.msra.mxu0 %v459_v30  ;;  %3141 = vmatpush.msra.mxu2 %v459_v30  ;;  %6248 = vst [vmem:[#allocation2_spill] sm:$0xff] %v3467_v27  ;;  %v754_v28 = vld [vmem:[%s6116_s4 + $0x210] sm:$0xff]  ;;  %v442_v30 = vld [vmem:[%s3361_s29 + $0x178] sm:$0xff] }
  0x2b   : > { %3157 = vmatpush.msra.mxu3 %v688_v31  ;;  %495 = vmatmul.f32.vlgmr.msra.gmra.mxu0 %v395_v32  ;;  %v779_v32 = vld [vmem:[%s6116_s4 + $0x2d8] sm:$0xff] }
  0x2c   : > { %591 = vmatmul.f32.vlgmr.msra.gmra.mxu2 %v427_v33  ;;  %904 = vmatmul.f32.vlgmr.msra.gmra.mxu3 %v363_v34  ;;  %v3480_v33 = vld [vmem:[%s3370_s12 + $0x10] sm:$0xff]  ;;  %v732_v34 = vld [vmem:[%s6116_s4 + $0x160] sm:$0xff] }
  0x2d   : > { %1001 = vmatpush.msrb.mxu2 %v781_v35  ;;  %807 = vmatpush.msra.mxu1 %v688_v31  ;;  %v378_v31 = vld [vmem:[%s3370_s12 + $0x178] sm:$0xff]  ;;  %6249 = vst [vmem:[#allocation3_spill] sm:$0xff] %v3480_v33 }
  0x2e   : > { %1210 = vmatpush.msrb.mxu3 %v734_v15  ;;  %1419 = vmatpush.msrb.mxu0 %v782_v20  ;;  %v770_v20 = vld [vmem:[%s6116_s4 + $0x290] sm:$0xff] }
  0x2f   : > { %1002 = vmatpush.msrb.mxu2 %v778_v36  ;;  %808 = vmatmul.f32.vlgmr.msra.gmra.mxu1 %v3454_v21  ;;  %v411_v36 = vld [vmem:[%s3361_s29 + $0x80] sm:$0xff] }
  0x30   : > { %1628 = vmatpush.msrb.mxu1 %v735_v22  ;;  %1211 = vmatpush.msrb.mxu3 %v731_v26  ;;  %v3590_v22 = vld [vmem:[%s3370_s12 + $0x40] sm:$0xff] }
  0x31   : > { %1003 = vmatpush.msrb.mxu2 %v775_v37  ;;  %1420 = vmatpush.msrb.mxu0 %v779_v32  ;;  %v443_v37 = vld [vmem:[%s3361_s29 + $0x180] sm:$0xff]  ;;  %6260 = vst [vmem:[#allocation14_spill] sm:$0xff] %v3590_v22  ;;  %v3609_v32 = vld [vmem:[%s3370_s12 + $0x48] sm:$0xff] }
  0x32   : > { %1629 = vmatpush.msrb.mxu1 %v732_v34  ;;  %6262 = vst [vmem:[#allocation16_spill] sm:$0xff] %v3609_v32  ;;  %v742_v34 = vld [vmem:[%s6116_s4 + $0x1b0] sm:$0xff] }
  0x33   : > { %498 = vmatmul.f32.gmra.mxu0 %v396_v38  ;;  %1004 = vmatpush.msrb.mxu2 %v772_v44  ;;  %v379_v38 = vld [vmem:[%s3370_s12 + $0x180] sm:$0xff] }
  0x34   : > { %594 = vmatmul.f32.gmra.mxu2 %v428_v39  ;;  %907 = vmatmul.f32.gmra.mxu3 %v364_v40  ;;  %v728_v39 = vld [vmem:[%s6116_s4 + $0x140] sm:$0xff]  ;;  %v3495_v40 = vld [vmem:[%s3370_s12 + $0x18] sm:$0xff] }
  0x35   : > { %1005 = vmatpush.msrb.mxu2 %v769_v51  ;;  %1212 = vmatpush.msrb.mxu3 %v728_v39  ;;  %6250 = vst [vmem:[#allocation4_spill] sm:$0xff] %v3495_v40  ;;  %v418_v39 = vld [vmem:[%s3361_s29 + $0xb8] sm:$0xff] }
  0x37   : > { %1006 = vmatpush.msrb.mxu2 %v766_v58  ;;  %811 = vmatmul.f32.gmra.mxu1 %v3467_v27  ;;  %v3533_v58 = vld [vmem:[%s3370_s12 + $0x28] sm:$0xff] }
  0x38   : > { %6254 = vst [vmem:[#allocation8_spill] sm:$0xff] %v3533_v58 }
  0x39   : > { %1007 = vmatpush.msrb.mxu2 %v763_v1  ;;  %v382_v1 = vld [vmem:[%s3370_s12 + $0x198] sm:$0xff] }
  0x3b   : > { %501 = vmatmul.f32.gmra.mxu0 %v397_v41  ;;  %1008 = vmatpush.msrb.mxu2 %v760_v8  ;;  %v751_v41 = vld [vmem:[%s6116_s4 + $0x1f8] sm:$0xff]  ;;  %v415_v8 = vld [vmem:[%s3361_s29 + $0xa0] sm:$0xff] }
  0x3c   : > { %597 = vmatmul.f32.gmra.mxu2 %v429_v42  ;;  %910 = vmatmul.f32.gmra.mxu3 %v365_v43 }
  0x3d   : > { %1009 = vmatpush.msrb.mxu2 %v757_v16 }
  0x3f   : > { %1010 = vmatpush.msrb.mxu2 %v754_v28  ;;  %814 = vmatmul.f32.gmra.mxu1 %v3480_v33  ;;  %v417_v28 = vld [vmem:[%s3361_s29 + $0xb0] sm:$0xff] }
  0x41   : > { %1011 = vmatpush.msrb.mxu2 %v751_v41  ;;  %v450_v41 = vld [vmem:[%s3361_s29 + $0x1b8] sm:$0xff] }
  0x43   : > { %504 = vmatmul.f32.gmra.mxu0 %v398_v45  ;;  %v412_v45 = vld [vmem:[%s3361_s29 + $0x88] sm:$0xff] }
  0x44   : > { %600 = vmatmul.f32.gmra.mxu2 %v430_v46  ;;  %913 = vmatmul.f32.gmra.mxu3 %v366_v47  ;;  %v444_v46 = vld [vmem:[%s3361_s29 + $0x188] sm:$0xff] }
  0x45   : > { %v380_v47 = vld [vmem:[%s3370_s12 + $0x188] sm:$0xff] }
  0x47   : > { %817 = vmatmul.f32.gmra.mxu1 %v3495_v40 }
  0x4b   : > { %507 = vmatmul.f32.gmra.mxu0 %v399_v48  ;;  %v776_v48 = vld [vmem:[%s6116_s4 + $0x2c0] sm:$0xff] }
  0x4c   : > { %603 = vmatmul.f32.gmra.mxu2 %v431_v49  ;;  %916 = vmatmul.f32.gmra.mxu3 %v367_v50  ;;  %v3514_v49 = vld [vmem:[%s3370_s12 + $0x20] sm:$0xff]  ;;  %v729_v50 = vld [vmem:[%s6116_s4 + $0x148] sm:$0xff] }
  0x4d   : > { %1421 = vmatpush.msrb.mxu0 %v776_v48  ;;  %6252 = vst [vmem:[#allocation6_spill] sm:$0xff] %v3514_v49  ;;  %1630 = vmatpush.msrb.mxu1 %v729_v50  ;;  %v720_v48 = vld [vmem:[%s6116_s4 + $0x100] sm:$0xff] }
  0x4f   : > { %820 = vmatmul.f32.gmra.mxu1 %v3514_v49 }
  0x53   : > { %510 = vmatmul.f32.gmra.mxu0 %v400_v52 }
  0x54   : > { %606 = vmatmul.f32.gmra.mxu2 %v432_v53  ;;  %919 = vmatmul.f32.gmra.mxu3 %v368_v54  ;;  %v413_v54 = vld [vmem:[%s3361_s29 + $0x90] sm:$0xff] }
  0x57   : > { %823 = vmatmul.f32.gmra.mxu1 %v3533_v58 }
  0x5b   : > { %513 = vmatmul.f32.gmra.mxu0 %v401_v55  ;;  %v445_v55 = vld [vmem:[%s3361_s29 + $0x190] sm:$0xff] }
  0x5c   : > { %609 = vmatmul.f32.gmra.mxu2 %v433_v56  ;;  %922 = vmatmul.f32.gmra.mxu3 %v369_v57  ;;  %v381_v56 = vld [vmem:[%s3370_s12 + $0x190] sm:$0xff]  ;;  %v725_v57 = vld [vmem:[%s6116_s4 + $0x128] sm:$0xff] }
  0x5d   : > { %1213 = vmatpush.msrb.mxu3 %v725_v57  ;;  %v451_v57 = vld [vmem:[%s3361_s29 + $0x1c0] sm:$0xff] }
  0x63   : > { %516 = vmatmul.f32.gmra.mxu0 %v402_v59  ;;  %v748_v59 = vld [vmem:[%s6116_s4 + $0x1e0] sm:$0xff] }
  0x64   : > { %612 = vmatmul.f32.gmra.mxu2 %v434_v60  ;;  %925 = vmatmul.f32.gmra.mxu3 %v370_v61 }
  0x65   : > { %1012 = vmatpush.msrb.mxu2 %v748_v59  ;;  %v387_v59 = vld [vmem:[%s3370_s12 + $0x1c0] sm:$0xff] }
  0x6b   : > { %519 = vmatmul.f32.gmra.mxu0 %v403_v62 }
  0x6c   : > { %615 = vmatmul.f32.gmra.mxu2 %v435_v63  ;;  %928 = vmatmul.f32.gmra.mxu3 %v371_v0  ;;  %v414_v63 = vld [vmem:[%s3361_s29 + $0x98] sm:$0xff] }
  0x6d   : > { %v446_v0 = vld [vmem:[%s3361_s29 + $0x198] sm:$0xff] }
  0x73   : > { %522 = vmatmul.f32.gmra.mxu0 %v404_v2  ;;  %v773_v2 = vld [vmem:[%s6116_s4 + $0x2a8] sm:$0xff] }
  0x74   : > { %618 = vmatmul.f32.gmra.mxu2 %v436_v3  ;;  %931 = vmatmul.f32.gmra.mxu3 %v372_v4  ;;  %v3552_v3 = vld [vmem:[%s3370_s12 + $0x30] sm:$0xff] }
  0x75   : > { %1422 = vmatpush.msrb.mxu0 %v773_v2  ;;  %6256 = vst [vmem:[#allocation10_spill] sm:$0xff] %v3552_v3  ;;  %v726_v4 = vld [vmem:[%s6116_s4 + $0x130] sm:$0xff]  ;;  %826 = vmatmul.f32.gmra.mxu1 %v3552_v3 }
  0x76   : > { %1631 = vmatpush.msrb.mxu1 %v726_v4 }
  0x77   : > { %1423 = vmatpush.msrb.mxu0 %v770_v20 }
  0x7b   : > { %525 = vmatmul.f32.gmra.mxu0 %v405_v5 }
  0x7c   : > { %621 = vmatmul.f32.gmra.mxu2 %v437_v6  ;;  %934 = vmatmul.f32.gmra.mxu3 %v373_v7 }
  0x83   : > { %528 = vmatmul.f32.gmra.mxu0 %v406_v9  ;;  %v447_v9 = vld [vmem:[%s3361_s29 + $0x1a0] sm:$0xff] }
  0x84   : > { %624 = vmatmul.f32.gmra.mxu2 %v438_v10  ;;  %937 = vmatmul.f32.gmra.mxu3 %v374_v11  ;;  %v383_v10 = vld [vmem:[%s3370_s12 + $0x1a0] sm:$0xff]  ;;  %v722_v11 = vld [vmem:[%s6116_s4 + $0x110] sm:$0xff] }
  0x85   : > { %1214 = vmatpush.msrb.mxu3 %v722_v11  ;;  %v388_v11 = vld [vmem:[%s3370_s12 + $0x1c8] sm:$0xff] }
  0x8b   : > { %531 = vmatmul.f32.gmra.mxu0 %v407_v12  ;;  %v3571_v12 = vld [vmem:[%s3370_s12 + $0x38] sm:$0xff] }
  0x8c   : > { %627 = vmatmul.f32.gmra.mxu2 %v439_v13  ;;  %940 = vmatmul.f32.gmra.mxu3 %v375_v14  ;;  %6258 = vst [vmem:[#allocation12_spill] sm:$0xff] %v3571_v12  ;;  %v745_v13 = vld [vmem:[%s6116_s4 + $0x1c8] sm:$0xff] }
  0x8d   : > { %829 = vmatmul.f32.gmra.mxu1 %v3571_v12  ;;  %1013 = vmatpush.msrb.mxu2 %v745_v13  ;;  %v764_v13 = vld [vmem:[%s6116_s4 + $0x260] sm:$0xff] }
  0x8f   : > { %1014 = vmatpush.msrb.mxu2 %v742_v34  ;;  %v761_v34 = vld [vmem:[%s6116_s4 + $0x248] sm:$0xff] }
  0x93   : > { %534 = vmatmul.f32.gmra.mxu0 %v408_v17  ;;  %v416_v17 = vld [vmem:[%s3361_s29 + $0xa8] sm:$0xff] }
  0x94   : > { %630 = vmatmul.f32.gmra.mxu2 %v440_v18  ;;  %943 = vmatmul.f32.gmra.mxu3 %v376_v19  ;;  %v448_v18 = vld [vmem:[%s3361_s29 + $0x1a8] sm:$0xff] }
  0x95   : > { %v384_v19 = vld [vmem:[%s3370_s12 + $0x1a8] sm:$0xff]  ;;  %832 = vmatmul.f32.gmra.mxu1 %v3590_v22 }
  0x9b   : > { %537 = vmatmul.f32.gmra.mxu0 %v409_v23  ;;  %v723_v23 = vld [vmem:[%s6116_s4 + $0x118] sm:$0xff] }
  0x9c   : > { %633 = vmatmul.f32.gmra.mxu2 %v441_v24  ;;  %946 = vmatmul.f32.gmra.mxu3 %v377_v25 }
  0x9d   : > { %1632 = vmatpush.msrb.mxu1 %v723_v23 }
  0x9e   : > { %835 = vmatmul.f32.gmra.mxu1 %v3609_v32 }
  0x9f   : > { %1633 = vmatpush.msrb.mxu1 %v720_v48  ;;  %v707_v48 = vld [vmem:[%s6116_s4 + $0x98] sm:$0xff] }
  0xa3   : > { %540 = vmatmul.f32.gmra.mxu0 %v410_v29  ;;  %v449_v29 = vld [vmem:[%s3361_s29 + $0x1b0] sm:$0xff] }
  0xa4   : > { %636 = vmatmul.f32.gmra.mxu2 %v442_v30  ;;  %949 = vmatmul.f32.gmra.mxu3 %v378_v31  ;;  %v385_v30 = vld [vmem:[%s3370_s12 + $0x1b0] sm:$0xff]  ;;  %v719_v31 = vld [vmem:[%s6116_s4 + $0xf8] sm:$0xff] }
  0xa5   : > { %1215 = vmatpush.msrb.mxu3 %v719_v31  ;;  %v713_v31 = vld [vmem:[%s6116_s4 + $0xc8] sm:$0xff] }
  0xa8   : > { %v3486_v35 = vpop.f32.mrf.mxu0 }
  0xab   : > { %543 = vmatmul.f32.gmra.mxu0 %v411_v36 }
  0xac   : > { %639 = vmatmul.f32.gmra.mxu2 %v443_v37  ;;  %952 = vmatmul.f32.gmra.mxu3 %v379_v38 }
  0xaf   : > { %v3501_v42 = vpop.f32.mrf.mxu2  ;;  %v3503_v43 = vpop.f32.mrf.mxu3 }
  0xb0   : > { %6251 = vst [vmem:[#allocation5_spill] sm:$0xff] %v3503_v43  ;;  %v3505_v44 = vpop.f32.mrf.mxu0  ;;  %v3929_v43 = vld [vmem:[%s3370_s12 + $0xb8] sm:$0xff] }
  0xb1   : > { %6315 = vst [vmem:[#allocation69_spill] sm:$0xff] %v3929_v43 }
  0xb3   : > { %546 = vmatmul.f32.gmra.mxu0 %v412_v45  ;;  %v386_v45 = vld [vmem:[%s3370_s12 + $0x1b8] sm:$0xff] }
  0xb4   : > { %642 = vmatmul.f32.gmra.mxu2 %v444_v46  ;;  %955 = vmatmul.f32.gmra.mxu3 %v380_v47  ;;  %v767_v46 = vld [vmem:[%s6116_s4 + $0x278] sm:$0xff]  ;;  %v3628_v47 = vld [vmem:[%s3370_s12 + $0x50] sm:$0xff] }
  0xb5   : > { %1424 = vmatpush.msrb.mxu0 %v767_v46  ;;  %6264 = vst [vmem:[#allocation18_spill] sm:$0xff] %v3628_v47  ;;  %838 = vmatmul.f32.gmra.mxu1 %v3628_v47  ;;  %v758_v46 = vld [vmem:[%s6116_s4 + $0x230] sm:$0xff] }
  0xb7   : > { %v3520_v51 = vpop.f32.mrf.mxu2  ;;  %v3522_v52 = vpop.f32.mrf.mxu3  ;;  %1425 = vmatpush.msrb.mxu0 %v764_v13  ;;  %v390_v13 = vld [vmem:[%s3370_s12 + $0x1d8] sm:$0xff] }
  0xb8   : > { %6253 = vst [vmem:[#allocation7_spill] sm:$0xff] %v3522_v52  ;;  %v3524_v53 = vpop.f32.mrf.mxu0 }
  0xb9   : > { %1426 = vmatpush.msrb.mxu0 %v761_v34  ;;  %v746_v34 = vld [vmem:[%s6116_s4 + $0x1d0] sm:$0xff] }
  0xbb   : > { %549 = vmatmul.f32.gmra.mxu0 %v413_v54 }
  0xbc   : > { %645 = vmatmul.f32.gmra.mxu2 %v445_v55  ;;  %958 = vmatmul.f32.gmra.mxu3 %v381_v56  ;;  %v419_v56 = vld [vmem:[%s3361_s29 + $0xc0] sm:$0xff] }
  0xbd   : > { %1427 = vmatpush.msrb.mxu0 %v758_v46 }
  0xbf   : > { %v3539_v60 = vpop.f32.mrf.mxu2  ;;  %v3541_v61 = vpop.f32.mrf.mxu3 }
  0xc0   : > { %6255 = vst [vmem:[#allocation9_spill] sm:$0xff] %v3541_v61  ;;  %v3543_v62 = vpop.f32.mrf.mxu0  ;;  %v3888_v61 = vld [vmem:[%s3370_s12 + $0xa8] sm:$0xff] }
  0xc1   : > { %6305 = vst [vmem:[#allocation59_spill] sm:$0xff] %v3888_v61 }
  0xc3   : > { %552 = vmatmul.f32.gmra.mxu0 %v414_v63  ;;  %v716_v63 = vld [vmem:[%s6116_s4 + $0xe0] sm:$0xff] }
  0xc4   : > { %648 = vmatmul.f32.gmra.mxu2 %v446_v0  ;;  %961 = vmatmul.f32.gmra.mxu3 %v382_v1  ;;  %v3647_v0 = vld [vmem:[%s3370_s12 + $0x58] sm:$0xff] }
  0xc5   : > { %1216 = vmatpush.msrb.mxu3 %v716_v63  ;;  %6266 = vst [vmem:[#allocation20_spill] sm:$0xff] %v3647_v0  ;;  %v739_v1 = vld [vmem:[%s6116_s4 + $0x198] sm:$0xff]  ;;  %841 = vmatmul.f32.gmra.mxu1 %v3647_v0 }
  0xc6   : > { %1015 = vmatpush.msrb.mxu2 %v739_v1  ;;  %v422_v1 = vld [vmem:[%s3361_s29 + $0xd8] sm:$0xff] }
  0xc7   : > { %v3558_v5 = vpop.f32.mrf.mxu2  ;;  %v3560_v6 = vpop.f32.mrf.mxu3  ;;  %1217 = vmatpush.msrb.mxu3 %v713_v31  ;;  %v698_v31 = vld [vmem:[%s6116_s4 + $0x50] sm:$0xff] }
  0xc8   : > { %6257 = vst [vmem:[#allocation11_spill] sm:$0xff] %v3560_v6  ;;  %v3562_v7 = vpop.f32.mrf.mxu0 }
  0xcb   : > { %555 = vmatmul.f32.gmra.mxu0 %v415_v8 }
  0xcc   : > { %651 = vmatmul.f32.gmra.mxu2 %v447_v9  ;;  %964 = vmatmul.f32.gmra.mxu3 %v383_v10  ;;  %v420_v9 = vld [vmem:[%s3361_s29 + $0xc8] sm:$0xff] }
  0xcd   : > { %v452_v10 = vld [vmem:[%s3361_s29 + $0x1c8] sm:$0xff] }
  0xcf   : > { %v3577_v14 = vpop.f32.mrf.mxu2  ;;  %v3579_v15 = vpop.f32.mrf.mxu3 }
  0xd0   : > { %6259 = vst [vmem:[#allocation13_spill] sm:$0xff] %v3579_v15  ;;  %v3581_v16 = vpop.f32.mrf.mxu0  ;;  %v3866_v15 = vld [vmem:[%s3370_s12 + $0xa0] sm:$0xff] }
  0xd1   : > { %6300 = vst [vmem:[#allocation54_spill] sm:$0xff] %v3866_v15 }
  0xd3   : > { %558 = vmatmul.f32.gmra.mxu0 %v416_v17  ;;  %v3666_v17 = vld [vmem:[%s3370_s12 + $0x60] sm:$0xff] }
  0xd4   : > { %654 = vmatmul.f32.gmra.mxu2 %v448_v18  ;;  %967 = vmatmul.f32.gmra.mxu3 %v384_v19  ;;  %6269 = vst [vmem:[#allocation23_spill] sm:$0xff] %v3666_v17  ;;  %v717_v18 = vld [vmem:[%s6116_s4 + $0xe8] sm:$0xff] }
  0xd5   : > { %844 = vmatmul.f32.gmra.mxu1 %v3666_v17 }
  0xd6   : > { %1634 = vmatpush.msrb.mxu1 %v717_v18  ;;  %v701_v18 = vld [vmem:[%s6116_s4 + $0x68] sm:$0xff] }
  0xd7   : > { %v3596_v24 = vpop.f32.mrf.mxu2  ;;  %v3598_v25 = vpop.f32.mrf.mxu3 }
  0xd8   : > { %6261 = vst [vmem:[#allocation15_spill] sm:$0xff] %v3598_v25  ;;  %v3600_v26 = vpop.f32.mrf.mxu0 }
  0xdb   : > { %561 = vmatmul.f32.gmra.mxu0 %v417_v28  ;;  %v421_v28 = vld [vmem:[%s3361_s29 + $0xd0] sm:$0xff] }
  0xdc   : > { %657 = vmatmul.f32.gmra.mxu2 %v449_v29  ;;  %970 = vmatmul.f32.gmra.mxu3 %v385_v30  ;;  %v453_v29 = vld [vmem:[%s3361_s29 + $0x1d0] sm:$0xff] }
  0xdd   : > { %v389_v30 = vld [vmem:[%s3370_s12 + $0x1d0] sm:$0xff] }
  0xdf   : > { %v3615_v36 = vpop.f32.mrf.mxu2  ;;  %v3617_v37 = vpop.f32.mrf.mxu3 }
  0xe0   : > { %6263 = vst [vmem:[#allocation17_spill] sm:$0xff] %v3617_v37  ;;  %v3619_v38 = vpop.f32.mrf.mxu0 }
  0xe3   : > { %564 = vmatmul.f32.gmra.mxu0 %v418_v39  ;;  %v3688_v39 = vld [vmem:[%s3370_s12 + $0x68] sm:$0xff] }
  0xe4   : > { %660 = vmatmul.f32.gmra.mxu2 %v450_v41  ;;  %973 = vmatmul.f32.gmra.mxu3 %v386_v45  ;;  %6272 = vst [vmem:[#allocation26_spill] sm:$0xff] %v3688_v39  ;;  %v736_v41 = vld [vmem:[%s6116_s4 + $0x180] sm:$0xff]  ;;  %v710_v45 = vld [vmem:[%s6116_s4 + $0xb0] sm:$0xff] }
  0xe5   : > { %847 = vmatmul.f32.gmra.mxu1 %v3688_v39  ;;  %1016 = vmatpush.msrb.mxu2 %v736_v41  ;;  %v695_v41 = vld [vmem:[%s6116_s4 + $0x38] sm:$0xff] }
  0xe6   : > { %1218 = vmatpush.msrb.mxu3 %v710_v45 }
  0xe7   : > { %v3634_v50 = vpop.f32.mrf.mxu2  ;;  %v3636_v54 = vpop.f32.mrf.mxu3 }
  0xe8   : > { %6265 = vst [vmem:[#allocation19_spill] sm:$0xff] %v3636_v54  ;;  %v3638_v55 = vpop.f32.mrf.mxu0  ;;  %1219 = vmatpush.msrb.mxu3 %v707_v48  ;;  %v743_v48 = vld [vmem:[%s6116_s4 + $0x1b8] sm:$0xff] }
  0xe9   : > { %v394_v54 = vld [vmem:[%s3370_s12 + $0x1f8] sm:$0xff] }
  0xeb   : > { %567 = vmatmul.f32.gmra.mxu0 %v419_v56  ;;  %v755_v56 = vld [vmem:[%s6116_s4 + $0x218] sm:$0xff] }
  0xec   : > { %663 = vmatmul.f32.gmra.mxu2 %v451_v57  ;;  %976 = vmatmul.f32.gmra.mxu3 %v387_v59 }
  0xed   : > { %1428 = vmatpush.msrb.mxu0 %v755_v56 }
  0xef   : > { %v3653_v2 = vpop.f32.mrf.mxu2  ;;  %v3655_v4 = vpop.f32.mrf.mxu3 }
  0xf0   : > { %6267 = vst [vmem:[#allocation21_spill] sm:$0xff] %v3653_v2  ;;  %v3657_v8 = vpop.f32.mrf.mxu0 }
  0xf1   : > { %6268 = vst [vmem:[#allocation22_spill] sm:$0xff] %v3655_v4  ;;  %v458_v4 = vld [vmem:[%s3361_s29 + $0x1f8] sm:$0xff] }
  0xf3   : > { %570 = vmatmul.f32.gmra.mxu0 %v420_v9  ;;  %v704_v9 = vld [vmem:[%s6116_s4 + $0x80] sm:$0xff] }
  0xf4   : > { %666 = vmatmul.f32.gmra.mxu2 %v452_v10  ;;  %979 = vmatmul.f32.gmra.mxu3 %v388_v11  ;;  %v752_v10 = vld [vmem:[%s6116_s4 + $0x200] sm:$0xff]  ;;  %v454_v11 = vld [vmem:[%s3361_s29 + $0x1d8] sm:$0xff] }
  0xf5   : > { %1220 = vmatpush.msrb.mxu3 %v704_v9  ;;  %1429 = vmatpush.msrb.mxu0 %v752_v10  ;;  %v692_v9 = vld [vmem:[%s6116_s4 + $0x20] sm:$0xff] }
  0xf6   : > { %v455_v10 = vld [vmem:[%s3361_s29 + $0x1e0] sm:$0xff] }
  0xf7   : > { %v3672_v19 = vpop.f32.mrf.mxu2  ;;  %v3674_v20 = vpop.f32.mrf.mxu3  ;;  %1221 = vmatpush.msrb.mxu3 %v701_v18  ;;  %v689_v18 = vld [vmem:[%s6116_s4 + $0x8] sm:$0xff] }
  0xf8   : > { %6270 = vst [vmem:[#allocation24_spill] sm:$0xff] %v3672_v19  ;;  %v3676_v23 = vpop.f32.mrf.mxu0  ;;  %v4102_v19 = vld [vmem:[%s3370_s12 + $0xf8] sm:$0xff] }
  0xf9   : > { %6271 = vst [vmem:[#allocation25_spill] sm:$0xff] %v3674_v20  ;;  %1222 = vmatpush.msrb.mxu3 %v698_v31  ;;  %v783_v31 = vld [vmem:[%s6116_s4 + $0x2f8] sm:$0xff] }
  0xfa   : > { %1837 = vmatpush.msra.mxu2 %v783_v31  ;;  %v426_v20 = vld [vmem:[%s3361_s29 + $0xf8] sm:$0xff]  ;;  %6355 = vst [vmem:[#allocation109_spill] sm:$0xff] %v4102_v19 }
  0xfb   : > { %573 = vmatmul.f32.gmra.mxu0 %v421_v28  ;;  %v749_v28 = vld [vmem:[%s6116_s4 + $0x1e8] sm:$0xff]  ;;  %1223 = vmatpush.msrb.mxu3 %v695_v41 }
  0xfc   : > { %669 = vmatmul.f32.gmra.mxu2 %v453_v29  ;;  %982 = vmatmul.f32.gmra.mxu3 %v389_v30  ;;  %v3728_v29 = vld [vmem:[%s3370_s12 + $0x70] sm:$0xff] }
  0xfd   : > { %6275 = vst [vmem:[#allocation29_spill] sm:$0xff] %v3728_v29  ;;  %v714_v30 = vld [vmem:[%s6116_s4 + $0xd0] sm:$0xff]  ;;  %1430 = vmatpush.msrb.mxu0 %v749_v28  ;;  %850 = vmatmul.f32.gmra.mxu1 %v3728_v29  ;;  %v3765_v28 = vld [vmem:[%s3370_s12 + $0x78] sm:$0xff] }
  0xfe   : > { %1635 = vmatpush.msrb.mxu1 %v714_v30  ;;  %1224 = vmatpush.msrb.mxu3 %v692_v9  ;;  %6278 = vst [vmem:[#allocation32_spill] sm:$0xff] %v3765_v28  ;;  %v737_v30 = vld [vmem:[%s6116_s4 + $0x188] sm:$0xff] }
  0xff   : > { %v3706_v57 = vpop.f32.mrf.mxu2  ;;  %v3708_v59 = vpop.f32.mrf.mxu3  ;;  %1431 = vmatpush.msrb.mxu0 %v746_v34  ;;  %v456_v9 = vld [vmem:[%s3361_s29 + $0x1e8] sm:$0xff] }
 0x100   : > { %6273 = vst [vmem:[#allocation27_spill] sm:$0xff] %v3706_v57  ;;  %v3710_v63 = vpop.f32.mrf.mxu0  ;;  %1225 = vmatpush.msrb.mxu3 %v689_v18  ;;  %v711_v18 = vld [vmem:[%s6116_s4 + $0xb8] sm:$0xff] }
 0x101   : > { %6274 = vst [vmem:[#allocation28_spill] sm:$0xff] %v3708_v59  ;;  %1432 = vmatpush.msrb.mxu0 %v743_v48  ;;  %1636 = vmatpush.msrb.mxu1 %v711_v18 }
 0x103   : > { %576 = vmatmul.f32.gmra.mxu0 %v422_v1  ;;  %v423_v1 = vld [vmem:[%s3361_s29 + $0xe0] sm:$0xff] }
 0x104   : > { %672 = vmatmul.f32.gmra.mxu2 %v454_v11  ;;  %985 = vmatmul.f32.gmra.mxu3 %v390_v13  ;;  %v391_v11 = vld [vmem:[%s3370_s12 + $0x1e0] sm:$0xff] }
 0x105   : > { %v740_v13 = vld [vmem:[%s6116_s4 + $0x1a0] sm:$0xff]  ;;  %853 = vmatmul.f32.gmra.mxu1 %v3765_v28 }
 0x106   : > { %1433 = vmatpush.msrb.mxu0 %v740_v13  ;;  %v3786_v13 = vld [vmem:[%s3370_s12 + $0x80] sm:$0xff] }
 0x107   : > { %v3743_v45 = vpop.f32.mrf.mxu2  ;;  %v3745_v46 = vpop.f32.mrf.mxu3  ;;  %6282 = vst [vmem:[#allocation36_spill] sm:$0xff] %v3786_v13 }
 0x108   : > { %6276 = vst [vmem:[#allocation30_spill] sm:$0xff] %v3743_v45  ;;  %v3750_v56 = vpop.f32.mrf.mxu0  ;;  %1434 = vmatpush.msrb.mxu0 %v737_v30  ;;  %v4058_v45 = vld [vmem:[%s3370_s12 + $0xe8] sm:$0xff] }
 0x109   : > { %6277 = vst [vmem:[#allocation31_spill] sm:$0xff] %v3745_v46  ;;  %v3804_v46 = vld [vmem:[%s3370_s12 + $0x88] sm:$0xff] }
 0x10a   : > { %6286 = vst [vmem:[#allocation40_spill] sm:$0xff] %v3804_v46 }
 0x10b   : > { %579 = vmatmul.f32.gmra.mxu0 %v423_v1  ;;  %v424_v1 = vld [vmem:[%s3361_s29 + $0xe8] sm:$0xff]  ;;  %6345 = vst [vmem:[#allocation99_spill] sm:$0xff] %v4058_v45 }
 0x10c   : > { %675 = vmatmul.f32.gmra.mxu2 %v455_v10  ;;  %988 = vmatmul.f32.gmra.mxu3 %v391_v11  ;;  %v392_v10 = vld [vmem:[%s3370_s12 + $0x1e8] sm:$0xff]  ;;  %v3783_v11 = vpop.f32.mrf.mxu1 }
 0x10d   : > { %6281 = vst [vmem:[#allocation35_spill] sm:$0xff] %v3783_v11  ;;  %856 = vmatmul.f32.gmra.mxu1 %v3786_v13 }
 0x10f   : > { %v3774_v34 = vpop.f32.mrf.mxu2  ;;  %v3776_v41 = vpop.f32.mrf.mxu3 }
 0x110   : > { %6279 = vst [vmem:[#allocation33_spill] sm:$0xff] %v3774_v34  ;;  %v3778_v48 = vpop.f32.mrf.mxu0  ;;  %v4036_v34 = vld [vmem:[%s3370_s12 + $0xe0] sm:$0xff] }
 0x111   : > { %6280 = vst [vmem:[#allocation34_spill] sm:$0xff] %v3776_v41  ;;  %v457_v41 = vld [vmem:[%s3361_s29 + $0x1f0] sm:$0xff] }
 0x112   : > { %6340 = vst [vmem:[#allocation94_spill] sm:$0xff] %v4036_v34 }
 0x113   : > { %582 = vmatmul.f32.gmra.mxu0 %v424_v1  ;;  %v425_v1 = vld [vmem:[%s3361_s29 + $0xf0] sm:$0xff] }
 0x114   : > { %678 = vmatmul.f32.gmra.mxu2 %v456_v9  ;;  %991 = vmatmul.f32.gmra.mxu3 %v392_v10  ;;  %v393_v9 = vld [vmem:[%s3370_s12 + $0x1f0] sm:$0xff]  ;;  %v3801_v10 = vpop.f32.mrf.mxu1 }
 0x115   : > { %6285 = vst [vmem:[#allocation39_spill] sm:$0xff] %v3801_v10  ;;  %859 = vmatmul.f32.gmra.mxu1 %v3804_v46 }
 0x117   : > { %v3792_v30 = vpop.f32.mrf.mxu2  ;;  %v3794_v31 = vpop.f32.mrf.mxu3 }
 0x118   : > { %6283 = vst [vmem:[#allocation37_spill] sm:$0xff] %v3792_v30  ;;  %v3796_v11 = vpop.f32.mrf.mxu0  ;;  %v4014_v30 = vld [vmem:[%s3370_s12 + $0xd8] sm:$0xff] }
 0x119   : > { %6284 = vst [vmem:[#allocation38_spill] sm:$0xff] %v3794_v31 }
 0x11a   : > { %6335 = vst [vmem:[#allocation89_spill] sm:$0xff] %v4014_v30 }
 0x11b   : > { %585 = vmatmul.f32.gmra.mxu0 %v425_v1  ;;  %v3819_v1 = vld [vmem:[%s3370_s12 + $0x90] sm:$0xff] }
 0x11c   : > { %681 = vmatmul.f32.gmra.mxu2 %v457_v41  ;;  %994 = vmatmul.f32.gmra.mxu3 %v393_v9  ;;  %v3816_v37 = vpop.f32.mrf.mxu1  ;;  %6290 = vst [vmem:[#allocation44_spill] sm:$0xff] %v3819_v1  ;;  %v708_v41 = vld [vmem:[%s6116_s4 + $0xa0] sm:$0xff] }
 0x11d   : > { %6289 = vst [vmem:[#allocation43_spill] sm:$0xff] %v3816_v37  ;;  %v3827_v9 = vld [vmem:[%s6115_s3] ss:$0 sm:$0xff]  ;;  %1637 = vmatpush.msrb.mxu1 %v708_v41 }
 0x11e   : > { %862 = vmatmul.f32.gmra.mxu1 %v3819_v1  ;;  %v3832_v37 = vadd.f32 %v3827_v9, %v3486_v35  ;;  %v780_v35 = vld [vmem:[%s6116_s4 + $0x2e0] sm:$0xff]  ;;  %v3854_v41 = vadd.f32 %v3827_v9, %v3505_v44  ;;  %v705_v44 = vld [vmem:[%s6116_s4 + $0x88] sm:$0xff] }
 0x11f   : > { %v3807_v18 = vpop.f32.mrf.mxu2  ;;  %v3809_v59 = vpop.f32.mrf.mxu3  ;;  %1838 = vmatpush.msra.mxu2 %v780_v35  ;;  %1638 = vmatpush.msrb.mxu1 %v705_v44  ;;  %v3876_v35 = vadd.f32 %v3827_v9, %v3524_v53  ;;  %v3895_v53 = vadd.f32 %v3827_v9, %v3543_v62  ;;  %v702_v62 = vld [vmem:[%s6116_s4 + $0x70] sm:$0xff] }
 0x120   : > { %6287 = vst [vmem:[#allocation41_spill] sm:$0xff] %v3807_v18  ;;  %v3811_v31 = vpop.f32.mrf.mxu0 }
 0x121   : > { %6288 = vst [vmem:[#allocation42_spill] sm:$0xff] %v3809_v59  ;;  %v3844_v59 = vld [vmem:[%s3370_s12 + $0x98] sm:$0xff]  ;;  %1639 = vmatpush.msrb.mxu1 %v702_v62  ;;  %v3939_v62 = vadd.f32 %v3827_v9, %v3581_v16 }
 0x122   : > { %6291 = vst [vmem:[#allocation45_spill] sm:$0xff] %v3832_v37  ;;  %v699_v16 = vld [vmem:[%s6116_s4 + $0x58] sm:$0xff] }
 0x123   : > { %588 = vmatmul.f32.gmra.mxu0 %v426_v20  ;;  %6295 = vst [vmem:[#allocation49_spill] sm:$0xff] %v3844_v59  ;;  %1640 = vmatpush.msrb.mxu1 %v699_v16 }
 0x124   : > { %684 = vmatmul.f32.gmra.mxu2 %v458_v4  ;;  %997 = vmatmul.f32.gmra.mxu3 %v394_v54  ;;  %v3840_v10 = vpop.f32.mrf.mxu1  ;;  %6296 = vst [vmem:[#allocation50_spill] sm:$0xff] %v3854_v41 }
 0x125   : > { %6294 = vst [vmem:[#allocation48_spill] sm:$0xff] %v3840_v10 }
 0x126   : > { %865 = vmatmul.f32.gmra.mxu1 %v3844_v59  ;;  %6301 = vst [vmem:[#allocation55_spill] sm:$0xff] %v3876_v35 }
 0x127   : > { %v3834_v20 = vpop.f32.mrf.mxu2  ;;  %v3836_v4 = vpop.f32.mrf.mxu3  ;;  %6306 = vst [vmem:[#allocation60_spill] sm:$0xff] %v3895_v53 }
 0x128   : > { %6292 = vst [vmem:[#allocation46_spill] sm:$0xff] %v3834_v20  ;;  %v3838_v54 = vpop.f32.mrf.mxu0  ;;  %v3973_v20 = vld [vmem:[%s3370_s12 + $0xc8] sm:$0xff] }
 0x129   : > { %6293 = vst [vmem:[#allocation47_spill] sm:$0xff] %v3836_v4 }
 0x12a   : > { %6316 = vst [vmem:[#allocation70_spill] sm:$0xff] %v3939_v62 }
 0x12b   : > { %1435 = vmatmul.f32.vlgmr.msrb.gmra.mxu0 %v3832_v37  ;;  %6325 = vst [vmem:[#allocation79_spill] sm:$0xff] %v3973_v20 }
 0x12c   : > { %1017 = vmatmul.f32.vlgmr.msrb.gmra.mxu2 %v3832_v37  ;;  %1226 = vmatmul.f32.vlgmr.msrb.gmra.mxu3 %v3454_v21  ;;  %v3862_v37 = vpop.f32.mrf.mxu1 }
 0x12d   : > { %6299 = vst [vmem:[#allocation53_spill] sm:$0xff] %v3862_v37 }
 0x12e   : > { %868 = vmatmul.f32.gmra.mxu1 %v3866_v15 }
 0x12f   : > { %v3856_v10 = vpop.f32.mrf.mxu2  ;;  %v3858_v4 = vpop.f32.mrf.mxu3 }
 0x130   : > { %6297 = vst [vmem:[#allocation51_spill] sm:$0xff] %v3856_v10  ;;  %v3860_v25 = vpop.f32.mrf.mxu0  ;;  %v3951_v10 = vld [vmem:[%s3370_s12 + $0xc0] sm:$0xff] }
 0x131   : > { %6298 = vst [vmem:[#allocation52_spill] sm:$0xff] %v3858_v4 }
 0x132   : > { %6320 = vst [vmem:[#allocation74_spill] sm:$0xff] %v3951_v10 }
 0x133   : > { %1438 = vmatmul.f32.gmra.mxu0 %v3854_v41 }
 0x134   : > { %1020 = vmatmul.f32.gmra.mxu2 %v3854_v41  ;;  %1229 = vmatmul.f32.gmra.mxu3 %v3467_v27  ;;  %v3884_v41 = vpop.f32.mrf.mxu1 }
 0x135   : > { %6304 = vst [vmem:[#allocation58_spill] sm:$0xff] %v3884_v41 }
 0x136   : > { %871 = vmatmul.f32.gmra.mxu1 %v3888_v61 }
 0x137   : > { %v3878_v37 = vpop.f32.mrf.mxu2  ;;  %v3880_v4 = vpop.f32.mrf.mxu3 }
 0x138   : > { %6302 = vst [vmem:[#allocation56_spill] sm:$0xff] %v3878_v37  ;;  %v3882_v6 = vpop.f32.mrf.mxu0 }
 0x139   : > { %6303 = vst [vmem:[#allocation57_spill] sm:$0xff] %v3880_v4 }
 0x13b   : > { %1441 = vmatmul.f32.gmra.mxu0 %v3876_v35 }
 0x13c   : > { %1023 = vmatmul.f32.gmra.mxu2 %v3876_v35  ;;  %1232 = vmatmul.f32.gmra.mxu3 %v3480_v33  ;;  %v3903_v52 = vpop.f32.mrf.mxu1  ;;  %v3907_v35 = vld [vmem:[%s3370_s12 + $0xb0] sm:$0xff] }
 0x13d   : > { %6309 = vst [vmem:[#allocation63_spill] sm:$0xff] %v3903_v52 }
 0x13e   : > { %6310 = vst [vmem:[#allocation64_spill] sm:$0xff] %v3907_v35  ;;  %874 = vmatmul.f32.gmra.mxu1 %v3907_v35 }
 0x13f   : > { %v3897_v44 = vpop.f32.mrf.mxu2  ;;  %v3899_v4 = vpop.f32.mrf.mxu3 }
 0x140   : > { %6307 = vst [vmem:[#allocation61_spill] sm:$0xff] %v3897_v44  ;;  %v3901_v41 = vpop.f32.mrf.mxu0 }
 0x141   : > { %6308 = vst [vmem:[#allocation62_spill] sm:$0xff] %v3899_v4  ;;  %v3917_v4 = vadd.f32 %v3827_v9, %v3562_v7  ;;  %v777_v7 = vld [vmem:[%s6116_s4 + $0x2c8] sm:$0xff] }
 0x142   : > { %1839 = vmatpush.msra.mxu2 %v777_v7  ;;  %v3961_v7 = vadd.f32 %v3827_v9, %v3600_v26  ;;  %v3980_v26 = vadd.f32 %v3827_v9, %v3619_v38  ;;  %v696_v38 = vld [vmem:[%s6116_s4 + $0x40] sm:$0xff] }
 0x143   : > { %1444 = vmatmul.f32.gmra.mxu0 %v3895_v53  ;;  %6311 = vst [vmem:[#allocation65_spill] sm:$0xff] %v3917_v4  ;;  %1641 = vmatpush.msrb.mxu1 %v696_v38  ;;  %v4024_v38 = vadd.f32 %v3827_v9, %v3657_v8  ;;  %v693_v8 = vld [vmem:[%s6116_s4 + $0x28] sm:$0xff] }
 0x144   : > { %1026 = vmatmul.f32.gmra.mxu2 %v3895_v53  ;;  %1235 = vmatmul.f32.gmra.mxu3 %v3495_v40  ;;  %v3925_v53 = vpop.f32.mrf.mxu1  ;;  %6321 = vst [vmem:[#allocation75_spill] sm:$0xff] %v3961_v7 }
 0x145   : > { %6314 = vst [vmem:[#allocation68_spill] sm:$0xff] %v3925_v53  ;;  %1642 = vmatpush.msrb.mxu1 %v693_v8 }
 0x146   : > { %877 = vmatmul.f32.gmra.mxu1 %v3929_v43  ;;  %6326 = vst [vmem:[#allocation80_spill] sm:$0xff] %v3980_v26 }
 0x147   : > { %v3919_v52 = vpop.f32.mrf.mxu2  ;;  %v3921_v44 = vpop.f32.mrf.mxu3  ;;  %6336 = vst [vmem:[#allocation90_spill] sm:$0xff] %v4024_v38 }
 0x148   : > { %6312 = vst [vmem:[#allocation66_spill] sm:$0xff] %v3919_v52  ;;  %v3923_v37 = vpop.f32.mrf.mxu0 }
 0x149   : > { %6313 = vst [vmem:[#allocation67_spill] sm:$0xff] %v3921_v44 }
 0x14b   : > { %1447 = vmatmul.f32.gmra.mxu0 %v3917_v4 }
 0x14c   : > { %1029 = vmatmul.f32.gmra.mxu2 %v3917_v4  ;;  %1238 = vmatmul.f32.gmra.mxu3 %v3514_v49  ;;  %v3947_v4 = vpop.f32.mrf.mxu1 }
 0x14d   : > { %6319 = vst [vmem:[#allocation73_spill] sm:$0xff] %v3947_v4 }
 0x14e   : > { %880 = vmatmul.f32.gmra.mxu1 %v3951_v10 }
 0x14f   : > { %v3941_v53 = vpop.f32.mrf.mxu2  ;;  %v3943_v44 = vpop.f32.mrf.mxu3 }
 0x150   : > { %6317 = vst [vmem:[#allocation71_spill] sm:$0xff] %v3941_v53  ;;  %v3945_v52 = vpop.f32.mrf.mxu0 }
 0x151   : > { %6318 = vst [vmem:[#allocation72_spill] sm:$0xff] %v3943_v44 }
 0x153   : > { %1450 = vmatmul.f32.gmra.mxu0 %v3939_v62 }
 0x154   : > { %1032 = vmatmul.f32.gmra.mxu2 %v3939_v62  ;;  %1241 = vmatmul.f32.gmra.mxu3 %v3533_v58  ;;  %v3969_v62 = vpop.f32.mrf.mxu1 }
 0x155   : > { %6324 = vst [vmem:[#allocation78_spill] sm:$0xff] %v3969_v62 }
 0x156   : > { %883 = vmatmul.f32.gmra.mxu1 %v3973_v20 }
 0x157   : > { %v3963_v4 = vpop.f32.mrf.mxu2  ;;  %v3965_v44 = vpop.f32.mrf.mxu3 }
 0x158   : > { %6322 = vst [vmem:[#allocation76_spill] sm:$0xff] %v3963_v4  ;;  %v3967_v53 = vpop.f32.mrf.mxu0 }
 0x159   : > { %6323 = vst [vmem:[#allocation77_spill] sm:$0xff] %v3965_v44 }
 0x15b   : > { %1453 = vmatmul.f32.gmra.mxu0 %v3961_v7 }
 0x15c   : > { %1035 = vmatmul.f32.gmra.mxu2 %v3961_v7  ;;  %1244 = vmatmul.f32.gmra.mxu3 %v3552_v3  ;;  %v3988_v4 = vpop.f32.mrf.mxu1  ;;  %v3992_v7 = vld [vmem:[%s3370_s12 + $0xd0] sm:$0xff] }
 0x15d   : > { %6329 = vst [vmem:[#allocation83_spill] sm:$0xff] %v3988_v4 }
 0x15e   : > { %6330 = vst [vmem:[#allocation84_spill] sm:$0xff] %v3992_v7  ;;  %886 = vmatmul.f32.gmra.mxu1 %v3992_v7 }
 0x15f   : > { %v3982_v16 = vpop.f32.mrf.mxu2  ;;  %v3984_v44 = vpop.f32.mrf.mxu3 }
 0x160   : > { %6327 = vst [vmem:[#allocation81_spill] sm:$0xff] %v3982_v16  ;;  %v3986_v62 = vpop.f32.mrf.mxu0 }
 0x161   : > { %6328 = vst [vmem:[#allocation82_spill] sm:$0xff] %v3984_v44  ;;  %v4002_v44 = vadd.f32 %v3827_v9, %v3638_v55  ;;  %v774_v55 = vld [vmem:[%s6116_s4 + $0x2b0] sm:$0xff] }
 0x162   : > { %1840 = vmatpush.msra.mxu2 %v774_v55  ;;  %v4046_v55 = vadd.f32 %v3827_v9, %v3676_v23  ;;  %v4065_v23 = vadd.f32 %v3827_v9, %v3710_v63  ;;  %v690_v63 = vld [vmem:[%s6116_s4 + $0x10] sm:$0xff] }
 0x163   : > { %1456 = vmatmul.f32.gmra.mxu0 %v3980_v26  ;;  %6331 = vst [vmem:[#allocation85_spill] sm:$0xff] %v4002_v44  ;;  %1643 = vmatpush.msrb.mxu1 %v690_v63 }
 0x164   : > { %1038 = vmatmul.f32.gmra.mxu2 %v3980_v26  ;;  %1247 = vmatmul.f32.gmra.mxu3 %v3571_v12  ;;  %v4010_v26 = vpop.f32.mrf.mxu1  ;;  %6341 = vst [vmem:[#allocation95_spill] sm:$0xff] %v4046_v55 }
 0x165   : > { %6334 = vst [vmem:[#allocation88_spill] sm:$0xff] %v4010_v26 }
 0x166   : > { %889 = vmatmul.f32.gmra.mxu1 %v4014_v30  ;;  %6346 = vst [vmem:[#allocation100_spill] sm:$0xff] %v4065_v23 }
 0x167   : > { %v4004_v4 = vpop.f32.mrf.mxu2  ;;  %v4006_v16 = vpop.f32.mrf.mxu3 }
 0x168   : > { %6332 = vst [vmem:[#allocation86_spill] sm:$0xff] %v4004_v4  ;;  %v4008_v18 = vpop.f32.mrf.mxu0 }
 0x169   : > { %6333 = vst [vmem:[#allocation87_spill] sm:$0xff] %v4006_v16 }
 0x16b   : > { %1459 = vmatmul.f32.gmra.mxu0 %v4002_v44 }
 0x16c   : > { %1041 = vmatmul.f32.gmra.mxu2 %v4002_v44  ;;  %1250 = vmatmul.f32.gmra.mxu3 %v3590_v22  ;;  %v4032_v44 = vpop.f32.mrf.mxu1 }
 0x16d   : > { %6339 = vst [vmem:[#allocation93_spill] sm:$0xff] %v4032_v44 }
 0x16e   : > { %892 = vmatmul.f32.gmra.mxu1 %v4036_v34 }
 0x16f   : > { %v4026_v26 = vpop.f32.mrf.mxu2  ;;  %v4028_v16 = vpop.f32.mrf.mxu3 }
 0x170   : > { %6337 = vst [vmem:[#allocation91_spill] sm:$0xff] %v4026_v26  ;;  %v4030_v4 = vpop.f32.mrf.mxu0 }
 0x171   : > { %6338 = vst [vmem:[#allocation92_spill] sm:$0xff] %v4028_v16 }
 0x173   : > { %1462 = vmatmul.f32.gmra.mxu0 %v4024_v38 }
 0x174   : > { %1044 = vmatmul.f32.gmra.mxu2 %v4024_v38  ;;  %1253 = vmatmul.f32.gmra.mxu3 %v3609_v32  ;;  %v4054_v38 = vpop.f32.mrf.mxu1 }
 0x175   : > { %6344 = vst [vmem:[#allocation98_spill] sm:$0xff] %v4054_v38 }
 0x176   : > { %895 = vmatmul.f32.gmra.mxu1 %v4058_v45 }
 0x177   : > { %v4048_v44 = vpop.f32.mrf.mxu2  ;;  %v4050_v16 = vpop.f32.mrf.mxu3 }
 0x178   : > { %6342 = vst [vmem:[#allocation96_spill] sm:$0xff] %v4048_v44  ;;  %v4052_v26 = vpop.f32.mrf.mxu0 }
 0x179   : > { %6343 = vst [vmem:[#allocation97_spill] sm:$0xff] %v4050_v16 }
 0x17b   : > { %1465 = vmatmul.f32.gmra.mxu0 %v4046_v55 }
 0x17c   : > { %1047 = vmatmul.f32.gmra.mxu2 %v4046_v55  ;;  %1256 = vmatmul.f32.gmra.mxu3 %v3628_v47  ;;  %v4074_v38 = vpop.f32.mrf.mxu1  ;;  %v4077_v55 = vld [vmem:[%s3370_s12 + $0xf0] sm:$0xff] }
 0x17d   : > { %6349 = vst [vmem:[#allocation103_spill] sm:$0xff] %v4074_v38 }
 0x17e   : > { %6350 = vst [vmem:[#allocation104_spill] sm:$0xff] %v4077_v55  ;;  %898 = vmatmul.f32.gmra.mxu1 %v4077_v55 }
 0x17f   : > { %v4067_v8 = vpop.f32.mrf.mxu2  ;;  %v4069_v16 = vpop.f32.mrf.mxu3 }
 0x180   : > { %6347 = vst [vmem:[#allocation101_spill] sm:$0xff] %v4067_v8  ;;  %v4071_v44 = vpop.f32.mrf.mxu0 }
 0x181   : > { %6348 = vst [vmem:[#allocation102_spill] sm:$0xff] %v4069_v16  ;;  %v4087_v16 = vadd.f32 %v3827_v9, %v3750_v56  ;;  %v771_v56 = vld [vmem:[%s6116_s4 + $0x298] sm:$0xff] }
 0x182   : > { %1841 = vmatpush.msra.mxu2 %v771_v56  ;;  %v2269_v56 = vld [vmem:[%s6118_s6 + $0xf8] sm:$0xff] }
 0x183   : > { %1468 = vmatmul.f32.gmra.mxu0 %v4065_v23  ;;  %6351 = vst [vmem:[#allocation105_spill] sm:$0xff] %v4087_v16 }
 0x184   : > { %1050 = vmatmul.f32.gmra.mxu2 %v4065_v23  ;;  %1259 = vmatmul.f32.gmra.mxu3 %v3647_v0  ;;  %v2253_v23 = vld [vmem:[%s6118_s6 + $0x78] sm:$0xff]  ;;  %v4099_v63 = vpop.f32.mrf.mxu1 }
 0x185   : > { %2290 = vmatpush.msra.mxu3 %v2253_v23  ;;  %6354 = vst [vmem:[#allocation108_spill] sm:$0xff] %v4099_v63  ;;  %v4112_v23 = vadd.f32 %v3827_v9, %v3778_v48  ;;  %v2285_v48 = vld [vmem:[%s6118_s6 + $0x178] sm:$0xff]  ;;  %2499 = vmatpush.msra.mxu0 %v2269_v56 }
 0x186   : > { %901 = vmatmul.f32.gmra.mxu1 %v4102_v19 }
 0x187   : > { %v4089_v8 = vpop.f32.mrf.mxu2  ;;  %v4091_v38 = vpop.f32.mrf.mxu3  ;;  %6356 = vst [vmem:[#allocation110_spill] sm:$0xff] %v4112_v23  ;;  %2708 = vmatpush.msra.mxu1 %v2285_v48 }
 0x188   : > { %6352 = vst [vmem:[#allocation106_spill] sm:$0xff] %v4089_v8  ;;  %v4093_v57 = vpop.f32.mrf.mxu0 }
 0x189   : > { %6353 = vst [vmem:[#allocation107_spill] sm:$0xff] %v4091_v38 }
 0x18b   : > { %1471 = vmatmul.f32.gmra.mxu0 %v4087_v16 }
 0x18c   : > { %1053 = vmatmul.f32.gmra.mxu2 %v4087_v16  ;;  %1262 = vmatmul.f32.gmra.mxu3 %v3666_v17  ;;  %v4121_v16 = vpop.f32.mrf.mxu1 }
 0x18d   : > { %6359 = vst [vmem:[#allocation113_spill] sm:$0xff] %v4121_v16 }
 0x18e   : > { %1644 = vmatmul.f32.vlgmr.msrb.gmra.mxu1 %v3454_v21  ;;  %v4150_v21 = vadd.f32 %v3827_v9, %v3811_v31  ;;  %v4166_v31 = vadd.f32 %v3827_v9, %v3838_v54 }
 0x18f   : > { %v4114_v38 = vpop.f32.mrf.mxu2  ;;  %v4116_v63 = vpop.f32.mrf.mxu3 }
 0x190   : > { %6357 = vst [vmem:[#allocation111_spill] sm:$0xff] %v4114_v38  ;;  %v4118_v8 = vpop.f32.mrf.mxu0 }
 0x191   : > { %6358 = vst [vmem:[#allocation112_spill] sm:$0xff] %v4116_v63  ;;  %v4134_v63 = vadd.f32 %v3827_v9, %v3796_v11 }
 0x192   : > { %6364 = vst [vmem:[#allocation118_spill] sm:$0xff] %v4150_v21 }
 0x193   : > { %1474 = vmatmul.f32.gmra.mxu0 %v4112_v23  ;;  %6360 = vst [vmem:[#allocation114_spill] sm:$0xff] %v4134_v63 }
 0x194   : > { %1056 = vmatmul.f32.gmra.mxu2 %v4112_v23  ;;  %1265 = vmatmul.f32.gmra.mxu3 %v3688_v39  ;;  %v4143_v2 = vpop.f32.mrf.mxu1  ;;  %6368 = vst [vmem:[#allocation122_spill] sm:$0xff] %v4166_v31 }
 0x195   : > { %6363 = vst [vmem:[#allocation117_spill] sm:$0xff] %v4143_v2 }
 0x196   : > { %1647 = vmatmul.f32.gmra.mxu1 %v3467_v27 }
 0x197   : > { %v4136_v16 = vpop.f32.mrf.mxu2  ;;  %v4138_v23 = vpop.f32.mrf.mxu3 }
 0x198   : > { %6361 = vst [vmem:[#allocation115_spill] sm:$0xff] %v4136_v16  ;;  %v4140_v38 = vpop.f32.mrf.mxu0  ;;  %v2268_v16 = vld [vmem:[%s6118_s6 + $0xf0] sm:$0xff] }
 0x199   : > { %6362 = vst [vmem:[#allocation116_spill] sm:$0xff] %v4138_v23  ;;  %2500 = vmatpush.msra.mxu0 %v2268_v16 }
 0x19b   : > { %1477 = vmatmul.f32.gmra.mxu0 %v4134_v63 }
 0x19c   : > { %1059 = vmatmul.f32.gmra.mxu2 %v4134_v63  ;;  %1268 = vmatmul.f32.gmra.mxu3 %v3728_v29  ;;  %v4159_v23 = vpop.f32.mrf.mxu1  ;;  %v2252_v63 = vld [vmem:[%s6118_s6 + $0x70] sm:$0xff] }
 0x19d   : > { %6367 = vst [vmem:[#allocation121_spill] sm:$0xff] %v4159_v23  ;;  %v4178_v23 = vld [vmem:[%s6117_s5] sm:$0x7]  ;;  %2291 = vmatpush.msra.mxu3 %v2252_v63 }
 0x19e   : > { %1650 = vmatmul.f32.gmra.mxu1 %v3480_v33  ;;  %v4186_v54 = vperm.slane %v4178_v23, 1 }
 0x19f   : > { %v4152_v11 = vpop.f32.mrf.mxu2  ;;  %v4154_v56 = vpop.f32.mrf.mxu3 }
 0x1a0   : > { %6365 = vst [vmem:[#allocation119_spill] sm:$0xff] %v4152_v11  ;;  %v4156_v48 = vpop.f32.mrf.mxu0 }
 0x1a1   : > { %6366 = vst [vmem:[#allocation120_spill] sm:$0xff] %v4154_v56 }
 0x1a3   : > { %1480 = vmatmul.f32.gmra.mxu0 %v4150_v21 }
 0x1a4   : > { %1062 = vmatmul.f32.gmra.mxu2 %v4150_v21  ;;  %1271 = vmatmul.f32.gmra.mxu3 %v3765_v28  ;;  %v4181_v33 = vpop.f32.mrf.mxu1  ;;  %v4194_v21 = vadd.f32 %v3827_v9, %v3860_v25  ;;  %v2284_v25 = vld [vmem:[%s6118_s6 + $0x170] sm:$0xff] }
 0x1a5   : > { %6371 = vst [vmem:[#allocation125_spill] sm:$0xff] %v4181_v33  ;;  %2709 = vmatpush.msra.mxu1 %v2284_v25 }
 0x1a6   : > { %1653 = vmatmul.f32.gmra.mxu1 %v3495_v40  ;;  %6372 = vst [vmem:[#allocation126_spill] sm:$0xff] %v4194_v21 }
 0x1a7   : > { %v4168_v27 = vpop.f32.mrf.mxu2  ;;  %v4170_v2 = vpop.f32.mrf.mxu3 }
 0x1a8   : > { %6369 = vst [vmem:[#allocation123_spill] sm:$0xff] %v4168_v27  ;;  %v1436_v56 = vpop.f32.mrf.mxu0 }
 0x1a9   : > { %6370 = vst [vmem:[#allocation124_spill] sm:$0xff] %v4170_v2  ;;  %v768_v2 = vld [vmem:[%s6116_s4 + $0x280] sm:$0xff] }
 0x1aa   : > { %1842 = vmatpush.msra.mxu2 %v768_v2 }
 0x1ab   : > { %1483 = vmatmul.f32.gmra.mxu0 %v4166_v31 }
 0x1ac   : > { %1065 = vmatmul.f32.gmra.mxu2 %v4166_v31  ;;  %1274 = vmatmul.f32.gmra.mxu3 %v3786_v13  ;;  %v4205_v2 = vpop.f32.mrf.mxu1 }
 0x1ad   : > { %6374 = vst [vmem:[#allocation128_spill] sm:$0xff] %v4205_v2 }
 0x1ae   : > { %1656 = vmatmul.f32.gmra.mxu1 %v3514_v49 }
 0x1af   : > { %v4196_v33 = vpop.f32.mrf.mxu2  ;;  %v1227_v63 = vpop.f32.mrf.mxu3 }
 0x1b0   : > { %v1228_v31 = vadd.f32 %v1227_v63, %v4186_v54  ;;  %v1439_v27 = vpop.f32.mrf.mxu0 }
 0x1b2   : > { %v4199_v11 = vadd.f32 %v1436_v56, %v1228_v31  ;;  %v4215_v56 = vadd.f32 %v3827_v9, %v3882_v6  ;;  %v4230_v6 = vadd.f32 %v3827_v9, %v3901_v41  ;;  %v4245_v41 = vadd.f32 %v3827_v9, %v3923_v37  ;;  %v765_v37 = vld [vmem:[%s6116_s4 + $0x268] sm:$0xff] }
 0x1b3   : > { %1486 = vmatmul.f32.gmra.mxu0 %v4194_v21  ;;  %1843 = vmatpush.msra.mxu2 %v765_v37 }
 0x1b4   : > { %6373 = vst [vmem:[#allocation127_spill] sm:$0xff] %v4199_v11  ;;  %1068 = vmatmul.f32.gmra.mxu2 %v4194_v21  ;;  %1277 = vmatmul.f32.gmra.mxu3 %v3804_v46  ;;  %v4223_v11 = vpop.f32.mrf.mxu1 }
 0x1b5   : > { %6375 = vst [vmem:[#allocation129_spill] sm:$0xff] %v4215_v56 }
 0x1b6   : > { %6376 = vst [vmem:[#allocation130_spill] sm:$0xff] %v4223_v11  ;;  %1659 = vmatmul.f32.gmra.mxu1 %v3533_v58 }
 0x1b7   : > { %v4217_v31 = vpop.f32.mrf.mxu2  ;;  %v1230_v63 = vpop.f32.mrf.mxu3  ;;  %6377 = vst [vmem:[#allocation131_spill] sm:$0xff] %v4230_v6 }
 0x1b8   : > { %v1231_v40 = vadd.f32 %v1230_v63, %v4186_v54  ;;  %v1442_v2 = vpop.f32.mrf.mxu0  ;;  %6379 = vst [vmem:[#allocation133_spill] sm:$0xff] %v4245_v41 }
 0x1ba   : > { %v4220_v21 = vadd.f32 %v1439_v27, %v1231_v40 }
 0x1bb   : > { %1489 = vmatmul.f32.gmra.mxu0 %v4215_v56 }
 0x1bc   : > { %1071 = vmatmul.f32.gmra.mxu2 %v4215_v56  ;;  %1280 = vmatmul.f32.gmra.mxu3 %v3819_v1  ;;  %v4238_v49 = vpop.f32.mrf.mxu1 }
 0x1bd   : > { %6378 = vst [vmem:[#allocation132_spill] sm:$0xff] %v4238_v49  ;;  %v2251_v49 = vld [vmem:[%s6118_s6 + $0x68] sm:$0xff] }
 0x1be   : > { %1662 = vmatmul.f32.gmra.mxu1 %v3552_v3  ;;  %2292 = vmatpush.msra.mxu3 %v2251_v49 }
 0x1bf   : > { %v4232_v16 = vpop.f32.mrf.mxu2  ;;  %v1233_v25 = vpop.f32.mrf.mxu3 }
 0x1c0   : > { %v1234_v27 = vadd.f32 %v1233_v25, %v4186_v54  ;;  %v1445_v40 = vpop.f32.mrf.mxu0 }
 0x1c2   : > { %v4235_v63 = vadd.f32 %v1442_v2, %v1234_v27 }
 0x1c3   : > { %1492 = vmatmul.f32.gmra.mxu0 %v4230_v6 }
 0x1c4   : > { %1074 = vmatmul.f32.gmra.mxu2 %v4230_v6  ;;  %1283 = vmatmul.f32.gmra.mxu3 %v3844_v59  ;;  %v4256_v6 = vpop.f32.mrf.mxu1 }
 0x1c5   : > { %6380 = vst [vmem:[#allocation134_spill] sm:$0xff] %v4256_v6 }
 0x1c6   : > { %1665 = vmatmul.f32.gmra.mxu1 %v3571_v12 }
 0x1c7   : > { %v4247_v58 = vpop.f32.mrf.mxu2  ;;  %v1236_v25 = vpop.f32.mrf.mxu3 }
 0x1c8   : > { %v1237_v2 = vadd.f32 %v1236_v25, %v4186_v54  ;;  %v1448_v27 = vpop.f32.mrf.mxu0 }
 0x1ca   : > { %v4250_v11 = vadd.f32 %v1445_v40, %v1237_v2  ;;  %v4266_v40 = vadd.f32 %v3827_v9, %v3945_v52  ;;  %v2283_v52 = vld [vmem:[%s6118_s6 + $0x168] sm:$0xff] }
 0x1cb   : > { %1495 = vmatmul.f32.gmra.mxu0 %v4245_v41  ;;  %2710 = vmatpush.msra.mxu1 %v2283_v52 }
 0x1cc   : > { %1077 = vmatmul.f32.gmra.mxu2 %v4245_v41  ;;  %1286 = vmatmul.f32.gmra.mxu3 %v3866_v15  ;;  %6381 = vst [vmem:[#allocation135_spill] sm:$0xff] %v4266_v40  ;;  %v2267_v41 = vld [vmem:[%s6118_s6 + $0xe8] sm:$0xff]  ;;  %v4277_v37 = vpop.f32.mrf.mxu1 }
 0x1cd   : > { %6382 = vst [vmem:[#allocation136_spill] sm:$0xff] %v4277_v37  ;;  %2501 = vmatpush.msra.mxu0 %v2267_v41 }
 0x1ce   : > { %1668 = vmatmul.f32.gmra.mxu1 %v3590_v22 }
 0x1cf   : > { %v4268_v25 = vpop.f32.mrf.mxu2  ;;  %v1239_v2 = vpop.f32.mrf.mxu3 }
 0x1d0   : > { %v1240_v49 = vadd.f32 %v1239_v2, %v4186_v54  ;;  %v1451_v3 = vpop.f32.mrf.mxu0 }
 0x1d2   : > { %v4271_v6 = vadd.f32 %v1448_v27, %v1240_v49  ;;  %v4287_v27 = vadd.f32 %v3827_v9, %v3967_v53  ;;  %v4302_v53 = vadd.f32 %v3827_v9, %v3986_v62  ;;  %v4317_v62 = vadd.f32 %v3827_v9, %v4008_v18  ;;  %v762_v18 = vld [vmem:[%s6116_s4 + $0x250] sm:$0xff] }
 0x1d3   : > { %1498 = vmatmul.f32.gmra.mxu0 %v4266_v40  ;;  %1844 = vmatpush.msra.mxu2 %v762_v18 }
 0x1d4   : > { %1080 = vmatmul.f32.gmra.mxu2 %v4266_v40  ;;  %1289 = vmatmul.f32.gmra.mxu3 %v3888_v61  ;;  %6383 = vst [vmem:[#allocation137_spill] sm:$0xff] %v4287_v27  ;;  %v4295_v56 = vpop.f32.mrf.mxu1 }
 0x1d5   : > { %6384 = vst [vmem:[#allocation138_spill] sm:$0xff] %v4295_v56 }
 0x1d6   : > { %1671 = vmatmul.f32.gmra.mxu1 %v3609_v32  ;;  %6385 = vst [vmem:[#allocation139_spill] sm:$0xff] %v4302_v53 }
 0x1d7   : > { %v4289_v2 = vpop.f32.mrf.mxu2  ;;  %v1242_v49 = vpop.f32.mrf.mxu3  ;;  %6387 = vst [vmem:[#allocation141_spill] sm:$0xff] %v4317_v62 }
 0x1d8   : > { %v1243_v12 = vadd.f32 %v1242_v49, %v4186_v54  ;;  %v1454_v37 = vpop.f32.mrf.mxu0 }
 0x1da   : > { %v4292_v40 = vadd.f32 %v1451_v3, %v1243_v12 }
 0x1db   : > { %1501 = vmatmul.f32.gmra.mxu0 %v4287_v27 }
 0x1dc   : > { %1083 = vmatmul.f32.gmra.mxu2 %v4287_v27  ;;  %1292 = vmatmul.f32.gmra.mxu3 %v3907_v35  ;;  %v4310_v22 = vpop.f32.mrf.mxu1 }
 0x1dd   : > { %6386 = vst [vmem:[#allocation140_spill] sm:$0xff] %v4310_v22  ;;  %v2250_v22 = vld [vmem:[%s6118_s6 + $0x60] sm:$0xff] }
 0x1de   : > { %1674 = vmatmul.f32.gmra.mxu1 %v3628_v47  ;;  %2293 = vmatpush.msra.mxu3 %v2250_v22 }
 0x1df   : > { %v4304_v41 = vpop.f32.mrf.mxu2  ;;  %v1245_v52 = vpop.f32.mrf.mxu3 }
 0x1e0   : > { %v1246_v3 = vadd.f32 %v1245_v52, %v4186_v54  ;;  %v1457_v12 = vpop.f32.mrf.mxu0 }
 0x1e2   : > { %v4307_v49 = vadd.f32 %v1454_v37, %v1246_v3 }
 0x1e3   : > { %1504 = vmatmul.f32.gmra.mxu0 %v4302_v53 }
 0x1e4   : > { %1086 = vmatmul.f32.gmra.mxu2 %v4302_v53  ;;  %1295 = vmatmul.f32.gmra.mxu3 %v3929_v43  ;;  %v4328_v53 = vpop.f32.mrf.mxu1 }
 0x1e5   : > { %6388 = vst [vmem:[#allocation142_spill] sm:$0xff] %v4328_v53 }
 0x1e6   : > { %1677 = vmatmul.f32.gmra.mxu1 %v3647_v0 }
 0x1e7   : > { %v4319_v32 = vpop.f32.mrf.mxu2  ;;  %v1248_v52 = vpop.f32.mrf.mxu3 }
 0x1e8   : > { %v1249_v37 = vadd.f32 %v1248_v52, %v4186_v54  ;;  %v1460_v3 = vpop.f32.mrf.mxu0 }
 0x1ea   : > { %v4322_v56 = vadd.f32 %v1457_v12, %v1249_v37  ;;  %v4338_v12 = vadd.f32 %v3827_v9, %v4030_v4  ;;  %v2282_v4 = vld [vmem:[%s6118_s6 + $0x160] sm:$0xff] }
 0x1eb   : > { %1507 = vmatmul.f32.gmra.mxu0 %v4317_v62  ;;  %2711 = vmatpush.msra.mxu1 %v2282_v4 }
 0x1ec   : > { %1089 = vmatmul.f32.gmra.mxu2 %v4317_v62  ;;  %1298 = vmatmul.f32.gmra.mxu3 %v3951_v10  ;;  %6389 = vst [vmem:[#allocation143_spill] sm:$0xff] %v4338_v12  ;;  %v2266_v62 = vld [vmem:[%s6118_s6 + $0xe0] sm:$0xff]  ;;  %v4349_v18 = vpop.f32.mrf.mxu1 }
 0x1ed   : > { %6390 = vst [vmem:[#allocation144_spill] sm:$0xff] %v4349_v18  ;;  %2502 = vmatpush.msra.mxu0 %v2266_v62 }
 0x1ee   : > { %1680 = vmatmul.f32.gmra.mxu1 %v3666_v17 }
 0x1ef   : > { %v4340_v52 = vpop.f32.mrf.mxu2  ;;  %v1251_v37 = vpop.f32.mrf.mxu3 }
 0x1f0   : > { %v1252_v22 = vadd.f32 %v1251_v37, %v4186_v54  ;;  %v1463_v47 = vpop.f32.mrf.mxu0 }
 0x1f2   : > { %v4343_v53 = vadd.f32 %v1460_v3, %v1252_v22  ;;  %v4359_v3 = vadd.f32 %v3827_v9, %v4052_v26  ;;  %v4374_v26 = vadd.f32 %v3827_v9, %v4071_v44  ;;  %v4389_v44 = vadd.f32 %v3827_v9, %v4093_v57  ;;  %v759_v57 = vld [vmem:[%s6116_s4 + $0x238] sm:$0xff] }
 0x1f3   : > { %1510 = vmatmul.f32.gmra.mxu0 %v4338_v12  ;;  %1845 = vmatpush.msra.mxu2 %v759_v57 }
 0x1f4   : > { %1092 = vmatmul.f32.gmra.mxu2 %v4338_v12  ;;  %1301 = vmatmul.f32.gmra.mxu3 %v3973_v20  ;;  %6391 = vst [vmem:[#allocation145_spill] sm:$0xff] %v4359_v3  ;;  %v4367_v27 = vpop.f32.mrf.mxu1 }
 0x1f5   : > { %6392 = vst [vmem:[#allocation146_spill] sm:$0xff] %v4367_v27 }
 0x1f6   : > { %1683 = vmatmul.f32.gmra.mxu1 %v3688_v39  ;;  %6393 = vst [vmem:[#allocation147_spill] sm:$0xff] %v4374_v26 }
 0x1f7   : > { %v4361_v37 = vpop.f32.mrf.mxu2  ;;  %v1254_v22 = vpop.f32.mrf.mxu3  ;;  %6395 = vst [vmem:[#allocation149_spill] sm:$0xff] %v4389_v44 }
 0x1f8   : > { %v1255_v0 = vadd.f32 %v1254_v22, %v4186_v54  ;;  %v1466_v18 = vpop.f32.mrf.mxu0 }
 0x1fa   : > { %v4364_v12 = vadd.f32 %v1463_v47, %v1255_v0 }
 0x1fb   : > { %1513 = vmatmul.f32.gmra.mxu0 %v4359_v3 }
 0x1fc   : > { %1095 = vmatmul.f32.gmra.mxu2 %v4359_v3  ;;  %1304 = vmatmul.f32.gmra.mxu3 %v3992_v7  ;;  %v4382_v17 = vpop.f32.mrf.mxu1 }
 0x1fd   : > { %6394 = vst [vmem:[#allocation148_spill] sm:$0xff] %v4382_v17  ;;  %v2249_v17 = vld [vmem:[%s6118_s6 + $0x58] sm:$0xff] }
 0x1fe   : > { %1686 = vmatmul.f32.gmra.mxu1 %v3728_v29  ;;  %2294 = vmatpush.msra.mxu3 %v2249_v17 }
 0x1ff   : > { %v4376_v62 = vpop.f32.mrf.mxu2  ;;  %v1257_v4 = vpop.f32.mrf.mxu3 }
 0x200   : > { %v1258_v47 = vadd.f32 %v1257_v4, %v4186_v54  ;;  %v1469_v0 = vpop.f32.mrf.mxu0 }
 0x202   : > { %v4379_v22 = vadd.f32 %v1466_v18, %v1258_v47 }
 0x203   : > { %1516 = vmatmul.f32.gmra.mxu0 %v4374_v26 }
 0x204   : > { %1098 = vmatmul.f32.gmra.mxu2 %v4374_v26  ;;  %1307 = vmatmul.f32.gmra.mxu3 %v4014_v30  ;;  %v4400_v26 = vpop.f32.mrf.mxu1 }
 0x205   : > { %6396 = vst [vmem:[#allocation150_spill] sm:$0xff] %v4400_v26 }
 0x206   : > { %1689 = vmatmul.f32.gmra.mxu1 %v3765_v28 }
 0x207   : > { %v4391_v39 = vpop.f32.mrf.mxu2  ;;  %v1260_v4 = vpop.f32.mrf.mxu3 }
 0x208   : > { %v1261_v18 = vadd.f32 %v1260_v4, %v4186_v54  ;;  %v1472_v47 = vpop.f32.mrf.mxu0 }
 0x20a   : > { %v4394_v27 = vadd.f32 %v1469_v0, %v1261_v18  ;;  %v4410_v0 = vadd.f32 %v3827_v9, %v4118_v8  ;;  %v2281_v8 = vld [vmem:[%s6118_s6 + $0x158] sm:$0xff] }
 0x20b   : > { %1519 = vmatmul.f32.gmra.mxu0 %v4389_v44  ;;  %2712 = vmatpush.msra.mxu1 %v2281_v8 }
 0x20c   : > { %1101 = vmatmul.f32.gmra.mxu2 %v4389_v44  ;;  %1310 = vmatmul.f32.gmra.mxu3 %v4036_v34  ;;  %6397 = vst [vmem:[#allocation151_spill] sm:$0xff] %v4410_v0  ;;  %v2265_v44 = vld [vmem:[%s6118_s6 + $0xd8] sm:$0xff]  ;;  %v4421_v57 = vpop.f32.mrf.mxu1 }
 0x20d   : > { %6398 = vst [vmem:[#allocation152_spill] sm:$0xff] %v4421_v57  ;;  %2503 = vmatpush.msra.mxu0 %v2265_v44 }
 0x20e   : > { %1692 = vmatmul.f32.gmra.mxu1 %v3786_v13 }
 0x20f   : > { %v4412_v4 = vpop.f32.mrf.mxu2  ;;  %v1263_v18 = vpop.f32.mrf.mxu3 }
 0x210   : > { %v1264_v17 = vadd.f32 %v1263_v18, %v4186_v54  ;;  %v1475_v29 = vpop.f32.mrf.mxu0 }
 0x212   : > { %v4415_v26 = vadd.f32 %v1472_v47, %v1264_v17  ;;  %v4431_v47 = vadd.f32 %v3827_v9, %v4140_v38  ;;  %v4446_v38 = vadd.f32 %v3827_v9, %v4156_v48 }
 0x213   : > { %1522 = vmatmul.f32.gmra.mxu0 %v4410_v0 }
 0x214   : > { %1104 = vmatmul.f32.gmra.mxu2 %v4410_v0  ;;  %1313 = vmatmul.f32.gmra.mxu3 %v4058_v45  ;;  %6399 = vst [vmem:[#allocation153_spill] sm:$0xff] %v4431_v47  ;;  %v4439_v57 = vpop.f32.mrf.mxu1 }
 0x215   : > { %6400 = vst [vmem:[#allocation154_spill] sm:$0xff] %v4439_v57  ;;  %v2264_v57 = vld [vmem:[%s6118_s6 + $0xd0] sm:$0xff] }
 0x216   : > { %1695 = vmatmul.f32.gmra.mxu1 %v3804_v46  ;;  %6401 = vst [vmem:[#allocation155_spill] sm:$0xff] %v4446_v38  ;;  %2504 = vmatpush.msra.mxu0 %v2264_v57  ;;  %v4521_v57 = vld [vmem:[%s3370_s12 + $0x110] sm:$0xff] }
 0x217   : > { %v4433_v18 = vpop.f32.mrf.mxu2  ;;  %v1266_v17 = vpop.f32.mrf.mxu3  ;;  %6413 = vst [vmem:[#allocation167_spill] sm:$0xff] %v4521_v57 }
 0x218   : > { %v1267_v28 = vadd.f32 %v1266_v17, %v4186_v54  ;;  %v1478_v0 = vpop.f32.mrf.mxu0 }
 0x21a   : > { %v4436_v3 = vadd.f32 %v1475_v29, %v1267_v28 }
 0x21b   : > { %1525 = vmatmul.f32.gmra.mxu0 %v4431_v47 }
 0x21c   : > { %1107 = vmatmul.f32.gmra.mxu2 %v4431_v47  ;;  %1316 = vmatmul.f32.gmra.mxu3 %v4077_v55  ;;  %v4454_v13 = vpop.f32.mrf.mxu1 }
 0x21d   : > { %6402 = vst [vmem:[#allocation156_spill] sm:$0xff] %v4454_v13 }
 0x21e   : > { %1698 = vmatmul.f32.gmra.mxu1 %v3819_v1 }
 0x21f   : > { %v4448_v44 = vpop.f32.mrf.mxu2  ;;  %v1269_v8 = vpop.f32.mrf.mxu3 }
 0x220   : > { %v1270_v29 = vadd.f32 %v1269_v8, %v4186_v54  ;;  %v1481_v28 = vpop.f32.mrf.mxu0 }
 0x222   : > { %v4451_v17 = vadd.f32 %v1478_v0, %v1270_v29  ;;  %v4464_v0 = vadd.f32 %v3827_v9, %v3501_v42  ;;  %v756_v42 = vld [vmem:[%s6116_s4 + $0x220] sm:$0xff] }
 0x223   : > { %1528 = vmatmul.f32.gmra.mxu0 %v4446_v38  ;;  %1846 = vmatpush.msra.mxu2 %v756_v42 }
 0x224   : > { %1110 = vmatmul.f32.gmra.mxu2 %v4446_v38  ;;  %1319 = vmatmul.f32.gmra.mxu3 %v4102_v19  ;;  %6403 = vst [vmem:[#allocation157_spill] sm:$0xff] %v4464_v0  ;;  %v2248_v38 = vld [vmem:[%s6118_s6 + $0x50] sm:$0xff]  ;;  %v4472_v13 = vpop.f32.mrf.mxu1 }
 0x225   : > { %6404 = vst [vmem:[#allocation158_spill] sm:$0xff] %v4472_v13  ;;  %2295 = vmatpush.msra.mxu3 %v2248_v38 }
 0x226   : > { %1701 = vmatmul.f32.gmra.mxu1 %v3844_v59  ;;  %v4500_v59 = vld [vmem:[%s3370_s12 + $0x108] sm:$0xff] }
 0x227   : > { %v4459_v48 = vpop.f32.mrf.mxu2  ;;  %v1272_v46 = vpop.f32.mrf.mxu3  ;;  %6410 = vst [vmem:[#allocation164_spill] sm:$0xff] %v4500_v59 }
 0x228   : > { %v1273_v47 = vadd.f32 %v1272_v46, %v4186_v54  ;;  %v1484_v8 = vpop.f32.mrf.mxu0  ;;  %v4476_v46 = vld [vmem:[%s3370_s12 + $0x100] sm:$0xff] }
 0x229   : > { %6405 = vst [vmem:[#allocation159_spill] sm:$0xff] %v4476_v46 }
 0x22a   : > { %v4466_v29 = vadd.f32 %v1481_v28, %v1273_v47 }
 0x22b   : > { %1531 = vmatmul.f32.gmra.mxu0 %v4464_v0 }
 0x22c   : > { %1113 = vmatmul.f32.gmra.mxu2 %v4464_v0  ;;  %1322 = vmatmul.f32.gmra.mxu3 %v4476_v46  ;;  %v4488_v0 = vadd.f32 %v3827_v9, %v3520_v51  ;;  %v4496_v42 = vpop.f32.mrf.mxu1  ;;  %v2280_v51 = vld [vmem:[%s6118_s6 + $0x150] sm:$0xff] }
 0x22d   : > { %6409 = vst [vmem:[#allocation163_spill] sm:$0xff] %v4496_v42  ;;  %2713 = vmatpush.msra.mxu1 %v2280_v51 }
 0x22e   : > { %6407 = vst [vmem:[#allocation161_spill] sm:$0xff] %v4488_v0  ;;  %1704 = vmatmul.f32.gmra.mxu1 %v3866_v15 }
 0x22f   : > { %v4483_v47 = vpop.f32.mrf.mxu2  ;;  %v1275_v28 = vpop.f32.mrf.mxu3 }
 0x230   : > { %6406 = vst [vmem:[#allocation160_spill] sm:$0xff] %v4483_v47  ;;  %v1276_v1 = vadd.f32 %v1275_v28, %v4186_v54  ;;  %v1487_v38 = vpop.f32.mrf.mxu0 }
 0x232   : > { %v4490_v13 = vadd.f32 %v1484_v8, %v1276_v1 }
 0x233   : > { %1534 = vmatmul.f32.gmra.mxu0 %v4488_v0 }
 0x234   : > { %6408 = vst [vmem:[#allocation162_spill] sm:$0xff] %v4490_v13  ;;  %1116 = vmatmul.f32.gmra.mxu2 %v4488_v0  ;;  %1325 = vmatmul.f32.gmra.mxu3 %v4500_v59  ;;  %v4512_v0 = vadd.f32 %v3827_v9, %v3539_v60  ;;  %v4517_v47 = vpop.f32.mrf.mxu1 }
 0x235   : > { %6412 = vst [vmem:[#allocation166_spill] sm:$0xff] %v4517_v47 }
 0x236   : > { %6411 = vst [vmem:[#allocation165_spill] sm:$0xff] %v4512_v0  ;;  %1707 = vmatmul.f32.gmra.mxu1 %v3888_v61  ;;  %v4539_v61 = vld [vmem:[%s3370_s12 + $0x118] sm:$0xff] }
 0x237   : > { %v4507_v1 = vpop.f32.mrf.mxu2  ;;  %v1278_v8 = vpop.f32.mrf.mxu3  ;;  %6418 = vst [vmem:[#allocation172_spill] sm:$0xff] %v4539_v61 }
 0x238   : > { %v1279_v28 = vadd.f32 %v1278_v8, %v4186_v54  ;;  %v1490_v42 = vpop.f32.mrf.mxu0 }
 0x23a   : > { %v4514_v13 = vadd.f32 %v1487_v38, %v1279_v28  ;;  %v4530_v28 = vadd.f32 %v3827_v9, %v3558_v5 }
 0x23b   : > { %1537 = vmatmul.f32.gmra.mxu0 %v4512_v0 }
 0x23c   : > { %1119 = vmatmul.f32.gmra.mxu2 %v4512_v0  ;;  %1328 = vmatmul.f32.gmra.mxu3 %v4521_v57  ;;  %6415 = vst [vmem:[#allocation169_spill] sm:$0xff] %v4530_v28  ;;  %v4535_v0 = vpop.f32.mrf.mxu1 }
 0x23d   : > { %6417 = vst [vmem:[#allocation171_spill] sm:$0xff] %v4535_v0 }
 0x23e   : > { %1710 = vmatmul.f32.gmra.mxu1 %v3907_v35 }
 0x23f   : > { %v4525_v51 = vpop.f32.mrf.mxu2  ;;  %v1281_v8 = vpop.f32.mrf.mxu3 }
 0x240   : > { %6414 = vst [vmem:[#allocation168_spill] sm:$0xff] %v4525_v51  ;;  %v1282_v60 = vadd.f32 %v1281_v8, %v4186_v54  ;;  %v1493_v38 = vpop.f32.mrf.mxu0 }
 0x242   : > { %v4532_v15 = vadd.f32 %v1490_v42, %v1282_v60  ;;  %v4548_v60 = vadd.f32 %v3827_v9, %v3577_v14  ;;  %v753_v14 = vld [vmem:[%s6116_s4 + $0x208] sm:$0xff] }
 0x243   : > { %1540 = vmatmul.f32.gmra.mxu0 %v4530_v28  ;;  %1847 = vmatpush.msra.mxu2 %v753_v14 }
 0x244   : > { %6416 = vst [vmem:[#allocation170_spill] sm:$0xff] %v4532_v15  ;;  %1122 = vmatmul.f32.gmra.mxu2 %v4530_v28  ;;  %1331 = vmatmul.f32.gmra.mxu3 %v4539_v61  ;;  %v2247_v28 = vld [vmem:[%s6118_s6 + $0x48] sm:$0xff]  ;;  %v4556_v15 = vpop.f32.mrf.mxu1 }
 0x245   : > { %6420 = vst [vmem:[#allocation174_spill] sm:$0xff] %v4548_v60  ;;  %2296 = vmatpush.msra.mxu3 %v2247_v28 }
 0x246   : > { %6422 = vst [vmem:[#allocation176_spill] sm:$0xff] %v4556_v15  ;;  %1713 = vmatmul.f32.gmra.mxu1 %v3929_v43  ;;  %v4584_v43 = vld [vmem:[%s3370_s12 + $0x128] sm:$0xff] }
 0x247   : > { %v4543_v8 = vpop.f32.mrf.mxu2  ;;  %v1284_v47 = vpop.f32.mrf.mxu3  ;;  %6428 = vst [vmem:[#allocation182_spill] sm:$0xff] %v4584_v43 }
 0x248   : > { %6419 = vst [vmem:[#allocation173_spill] sm:$0xff] %v4543_v8  ;;  %v1285_v5 = vadd.f32 %v1284_v47, %v4186_v54  ;;  %v1496_v42 = vpop.f32.mrf.mxu0  ;;  %v4560_v47 = vld [vmem:[%s3370_s12 + $0x120] sm:$0xff] }
 0x249   : > { %6423 = vst [vmem:[#allocation177_spill] sm:$0xff] %v4560_v47 }
 0x24a   : > { %v4550_v0 = vadd.f32 %v1493_v38, %v1285_v5 }
 0x24b   : > { %1543 = vmatmul.f32.gmra.mxu0 %v4548_v60 }
 0x24c   : > { %6421 = vst [vmem:[#allocation175_spill] sm:$0xff] %v4550_v0  ;;  %1125 = vmatmul.f32.gmra.mxu2 %v4548_v60  ;;  %1334 = vmatmul.f32.gmra.mxu3 %v4560_v47  ;;  %v4572_v60 = vadd.f32 %v3827_v9, %v3596_v24  ;;  %v2263_v0 = vld [vmem:[%s6118_s6 + $0xc8] sm:$0xff]  ;;  %v4580_v14 = vpop.f32.mrf.mxu1 }
 0x24d   : > { %6427 = vst [vmem:[#allocation181_spill] sm:$0xff] %v4580_v14  ;;  %v2279_v24 = vld [vmem:[%s6118_s6 + $0x148] sm:$0xff]  ;;  %2505 = vmatpush.msra.mxu0 %v2263_v0  ;;  %v4605_v0 = vld [vmem:[%s3370_s12 + $0x130] sm:$0xff] }
 0x24e   : > { %6425 = vst [vmem:[#allocation179_spill] sm:$0xff] %v4572_v60  ;;  %2714 = vmatpush.msra.mxu1 %v2279_v24 }
 0x24f   : > { %v4567_v38 = vpop.f32.mrf.mxu2  ;;  %v1287_v5 = vpop.f32.mrf.mxu3  ;;  %1716 = vmatmul.f32.gmra.mxu1 %v3951_v10  ;;  %6433 = vst [vmem:[#allocation187_spill] sm:$0xff] %v4605_v0 }
 0x250   : > { %6424 = vst [vmem:[#allocation178_spill] sm:$0xff] %v4567_v38  ;;  %v1288_v35 = vadd.f32 %v1287_v5, %v4186_v54  ;;  %v1499_v28 = vpop.f32.mrf.mxu0 }
 0x252   : > { %v4574_v15 = vadd.f32 %v1496_v42, %v1288_v35 }
 0x253   : > { %1546 = vmatmul.f32.gmra.mxu0 %v4572_v60 }
 0x254   : > { %6426 = vst [vmem:[#allocation180_spill] sm:$0xff] %v4574_v15  ;;  %1128 = vmatmul.f32.gmra.mxu2 %v4572_v60  ;;  %1337 = vmatmul.f32.gmra.mxu3 %v4584_v43  ;;  %v4596_v60 = vadd.f32 %v3827_v9, %v3615_v36  ;;  %v4601_v38 = vpop.f32.mrf.mxu1 }
 0x255   : > { %6432 = vst [vmem:[#allocation186_spill] sm:$0xff] %v4601_v38 }
 0x256   : > { %6430 = vst [vmem:[#allocation184_spill] sm:$0xff] %v4596_v60 }
 0x257   : > { %v4591_v35 = vpop.f32.mrf.mxu2  ;;  %v1290_v42 = vpop.f32.mrf.mxu3  ;;  %1719 = vmatmul.f32.gmra.mxu1 %v3973_v20  ;;  %v4623_v20 = vld [vmem:[%s3370_s12 + $0x138] sm:$0xff] }
 0x258   : > { %6429 = vst [vmem:[#allocation183_spill] sm:$0xff] %v4591_v35  ;;  %v1291_v5 = vadd.f32 %v1290_v42, %v4186_v54  ;;  %v1502_v14 = vpop.f32.mrf.mxu0 }
 0x259   : > { %6438 = vst [vmem:[#allocation192_spill] sm:$0xff] %v4623_v20 }
 0x25a   : > { %v4598_v15 = vadd.f32 %v1499_v28, %v1291_v5  ;;  %v4614_v5 = vadd.f32 %v3827_v9, %v3634_v50 }
 0x25b   : > { %1549 = vmatmul.f32.gmra.mxu0 %v4596_v60 }
 0x25c   : > { %6431 = vst [vmem:[#allocation185_spill] sm:$0xff] %v4598_v15  ;;  %1131 = vmatmul.f32.gmra.mxu2 %v4596_v60  ;;  %1340 = vmatmul.f32.gmra.mxu3 %v4605_v0  ;;  %v4619_v60 = vpop.f32.mrf.mxu1 }
 0x25d   : > { %6435 = vst [vmem:[#allocation189_spill] sm:$0xff] %v4614_v5 }
 0x25e   : > { %6437 = vst [vmem:[#allocation191_spill] sm:$0xff] %v4619_v60 }
 0x25f   : > { %v4609_v24 = vpop.f32.mrf.mxu2  ;;  %v1293_v42 = vpop.f32.mrf.mxu3  ;;  %1722 = vmatmul.f32.gmra.mxu1 %v3992_v7  ;;  %v4644_v7 = vld [vmem:[%s3370_s12 + $0x140] sm:$0xff] }
 0x260   : > { %6434 = vst [vmem:[#allocation188_spill] sm:$0xff] %v4609_v24  ;;  %v1294_v36 = vadd.f32 %v1293_v42, %v4186_v54  ;;  %v1505_v28 = vpop.f32.mrf.mxu0 }
 0x261   : > { %6444 = vst [vmem:[#allocation196_spill] sm:$0xff] %v4644_v7 }
 0x262   : > { %v4616_v10 = vadd.f32 %v1502_v14, %v1294_v36  ;;  %v6440_v36 = vld [vmem:[#allocation21_spill] sm:$0xff] }
 0x263   : > { %1552 = vmatmul.f32.gmra.mxu0 %v4614_v5 }
 0x264   : > { %6436 = vst [vmem:[#allocation190_spill] sm:$0xff] %v4616_v10  ;;  %1134 = vmatmul.f32.gmra.mxu2 %v4614_v5  ;;  %1343 = vmatmul.f32.gmra.mxu3 %v4623_v20  ;;  %v4632_v10 = vadd.f32 %v3827_v9, %v6440_v36  ;;  %v2246_v5 = vld [vmem:[%s6118_s6 + $0x40] sm:$0xff]  ;;  %v4640_v24 = vpop.f32.mrf.mxu1  ;;  %v750_v9 = vld [vmem:[%s6116_s4 + $0x1f0] sm:$0xff] }
 0x265   : > { %6443 = vst [vmem:[#allocation195_spill] sm:$0xff] %v4640_v24  ;;  %2297 = vmatpush.msra.mxu3 %v2246_v5  ;;  %1848 = vmatpush.msra.mxu2 %v750_v9  ;;  %v4657_v36 = vld [vmem:[%s6115_s3] ss:$0 sm:$0xff] }
 0x266   : > { %6441 = vst [vmem:[#allocation21_spill] sm:$0xff] %v4632_v10  ;;  %v2262_v9 = vld [vmem:[%s6118_s6 + $0xc0] sm:$0xff] }
 0x267   : > { %v4627_v42 = vpop.f32.mrf.mxu2  ;;  %v1296_v38 = vpop.f32.mrf.mxu3  ;;  %1725 = vmatmul.f32.gmra.mxu1 %v4014_v30  ;;  %2506 = vmatpush.msra.mxu0 %v2262_v9  ;;  %v4694_v9 = vld [vmem:[%s3370_s12 + $0x150] sm:$0xff] }
 0x268   : > { %6439 = vst [vmem:[#allocation193_spill] sm:$0xff] %v4627_v42  ;;  %v1297_v50 = vadd.f32 %v1296_v38, %v4186_v54  ;;  %v1508_v14 = vpop.f32.mrf.mxu0 }
 0x269   : > { %6456 = vst [vmem:[#allocation204_spill] sm:$0xff] %v4694_v9 }
 0x26a   : > { %v4634_v60 = vadd.f32 %v1505_v28, %v1297_v50 }
 0x26b   : > { %1555 = vmatmul.f32.gmra.mxu0 %v4632_v10 }
 0x26c   : > { %6442 = vst [vmem:[#allocation194_spill] sm:$0xff] %v4634_v60  ;;  %1137 = vmatmul.f32.gmra.mxu2 %v4632_v10  ;;  %1346 = vmatmul.f32.gmra.mxu3 %v4644_v7  ;;  %v6446_v10 = vld [vmem:[#allocation24_spill] sm:$0xff]  ;;  %v4669_v30 = vpop.f32.mrf.mxu1 }
 0x26d   : > { %v4661_v24 = vadd.f32 %v4657_v36, %v6446_v10  ;;  %6449 = vst [vmem:[#allocation199_spill] sm:$0xff] %v4669_v30  ;;  %v2278_v10 = vld [vmem:[%s6118_s6 + $0x140] sm:$0xff] }
 0x26e   : > { %2715 = vmatpush.msra.mxu1 %v2278_v10 }
 0x26f   : > { %v4651_v38 = vpop.f32.mrf.mxu2  ;;  %v1299_v28 = vpop.f32.mrf.mxu3  ;;  %6447 = vst [vmem:[#allocation24_spill] sm:$0xff] %v4661_v24  ;;  %1728 = vmatmul.f32.gmra.mxu1 %v4036_v34 }
 0x270   : > { %6445 = vst [vmem:[#allocation197_spill] sm:$0xff] %v4651_v38  ;;  %v1300_v50 = vadd.f32 %v1299_v28, %v4186_v54  ;;  %v1511_v5 = vpop.f32.mrf.mxu0  ;;  %v4673_v28 = vld [vmem:[%s3370_s12 + $0x148] sm:$0xff] }
 0x271   : > { %6450 = vst [vmem:[#allocation200_spill] sm:$0xff] %v4673_v28 }
 0x272   : > { %v4663_v60 = vadd.f32 %v1508_v14, %v1300_v50 }
 0x273   : > { %1558 = vmatmul.f32.gmra.mxu0 %v4661_v24 }
 0x274   : > { %6448 = vst [vmem:[#allocation198_spill] sm:$0xff] %v4663_v60  ;;  %1140 = vmatmul.f32.gmra.mxu2 %v4661_v24  ;;  %1349 = vmatmul.f32.gmra.mxu3 %v4673_v28  ;;  %v6452_v24 = vld [vmem:[#allocation27_spill] sm:$0xff]  ;;  %v4690_v15 = vpop.f32.mrf.mxu1 }
 0x275   : > { %v4685_v38 = vadd.f32 %v4657_v36, %v6452_v24  ;;  %6455 = vst [vmem:[#allocation203_spill] sm:$0xff] %v4690_v15 }
 0x277   : > { %v4680_v14 = vpop.f32.mrf.mxu2  ;;  %v1302_v50 = vpop.f32.mrf.mxu3  ;;  %6453 = vst [vmem:[#allocation27_spill] sm:$0xff] %v4685_v38  ;;  %1731 = vmatmul.f32.gmra.mxu1 %v4058_v45  ;;  %v4712_v45 = vld [vmem:[%s3370_s12 + $0x158] sm:$0xff] }
 0x278   : > { %6451 = vst [vmem:[#allocation201_spill] sm:$0xff] %v4680_v14  ;;  %v1303_v30 = vadd.f32 %v1302_v50, %v4186_v54  ;;  %v1514_v60 = vpop.f32.mrf.mxu0 }
 0x279   : > { %6462 = vst [vmem:[#allocation208_spill] sm:$0xff] %v4712_v45 }
 0x27a   : > { %v4687_v42 = vadd.f32 %v1511_v5, %v1303_v30  ;;  %v6458_v5 = vld [vmem:[#allocation30_spill] sm:$0xff] }
 0x27b   : > { %1561 = vmatmul.f32.gmra.mxu0 %v4685_v38  ;;  %v4703_v34 = vadd.f32 %v4657_v36, %v6458_v5 }
 0x27c   : > { %6454 = vst [vmem:[#allocation202_spill] sm:$0xff] %v4687_v42  ;;  %1143 = vmatmul.f32.gmra.mxu2 %v4685_v38  ;;  %1352 = vmatmul.f32.gmra.mxu3 %v4694_v9  ;;  %v4708_v38 = vpop.f32.mrf.mxu1 }
 0x27d   : > { %6459 = vst [vmem:[#allocation30_spill] sm:$0xff] %v4703_v34 }
 0x27e   : > { %6461 = vst [vmem:[#allocation207_spill] sm:$0xff] %v4708_v38 }
 0x27f   : > { %v4698_v10 = vpop.f32.mrf.mxu2  ;;  %v1305_v50 = vpop.f32.mrf.mxu3  ;;  %1734 = vmatmul.f32.gmra.mxu1 %v4077_v55 }
 0x280   : > { %6457 = vst [vmem:[#allocation205_spill] sm:$0xff] %v4698_v10  ;;  %v1306_v24 = vadd.f32 %v1305_v50, %v4186_v54  ;;  %v1517_v30 = vpop.f32.mrf.mxu0 }
 0x282   : > { %v4705_v42 = vadd.f32 %v1514_v60, %v1306_v24  ;;  %v6464_v24 = vld [vmem:[#allocation33_spill] sm:$0xff] }
 0x283   : > { %1564 = vmatmul.f32.gmra.mxu0 %v4703_v34 }
 0x284   : > { %6460 = vst [vmem:[#allocation206_spill] sm:$0xff] %v4705_v42  ;;  %1146 = vmatmul.f32.gmra.mxu2 %v4703_v34  ;;  %1355 = vmatmul.f32.gmra.mxu3 %v4712_v45  ;;  %v4721_v42 = vadd.f32 %v4657_v36, %v6464_v24  ;;  %v2245_v34 = vld [vmem:[%s6118_s6 + $0x38] sm:$0xff]  ;;  %v4729_v10 = vpop.f32.mrf.mxu1 }
 0x285   : > { %6467 = vst [vmem:[#allocation211_spill] sm:$0xff] %v4729_v10  ;;  %2298 = vmatpush.msra.mxu3 %v2245_v34  ;;  %v6470_v10 = vld [vmem:[#allocation37_spill] sm:$0xff] }
 0x286   : > { %6465 = vst [vmem:[#allocation33_spill] sm:$0xff] %v4721_v42 }
 0x287   : > { %v4716_v50 = vpop.f32.mrf.mxu2  ;;  %v1308_v15 = vpop.f32.mrf.mxu3  ;;  %1737 = vmatmul.f32.gmra.mxu1 %v4102_v19  ;;  %v4757_v19 = vld [vmem:[%s3370_s12 + $0x168] sm:$0xff] }
 0x288   : > { %6463 = vst [vmem:[#allocation209_spill] sm:$0xff] %v4716_v50  ;;  %v1309_v5 = vadd.f32 %v1308_v15, %v4186_v54  ;;  %v1520_v60 = vpop.f32.mrf.mxu0  ;;  %v4733_v15 = vld [vmem:[%s3370_s12 + $0x160] sm:$0xff]  ;;  %v2261_v50 = vld [vmem:[%s6118_s6 + $0xb8] sm:$0xff] }
 0x289   : > { %6468 = vst [vmem:[#allocation212_spill] sm:$0xff] %v4733_v15  ;;  %2507 = vmatpush.msra.mxu0 %v2261_v50  ;;  %v4778_v50 = vld [vmem:[%s3370_s12 + $0x170] sm:$0xff] }
 0x28a   : > { %v4723_v38 = vadd.f32 %v1517_v30, %v1309_v5  ;;  %v747_v30 = vld [vmem:[%s6116_s4 + $0x1d8] sm:$0xff]  ;;  %6474 = vst [vmem:[#allocation216_spill] sm:$0xff] %v4757_v19 }
 0x28b   : > { %1567 = vmatmul.f32.gmra.mxu0 %v4721_v42  ;;  %1849 = vmatpush.msra.mxu2 %v747_v30  ;;  %6480 = vst [vmem:[#allocation220_spill] sm:$0xff] %v4778_v50 }
 0x28c   : > { %6466 = vst [vmem:[#allocation210_spill] sm:$0xff] %v4723_v38  ;;  %1149 = vmatmul.f32.gmra.mxu2 %v4721_v42  ;;  %1358 = vmatmul.f32.gmra.mxu3 %v4733_v15  ;;  %v4745_v42 = vadd.f32 %v4657_v36, %v6470_v10  ;;  %v4753_v30 = vpop.f32.mrf.mxu1 }
 0x28d   : > { %6473 = vst [vmem:[#allocation215_spill] sm:$0xff] %v4753_v30 }
 0x28e   : > { %6471 = vst [vmem:[#allocation37_spill] sm:$0xff] %v4745_v42 }
 0x28f   : > { %v4740_v5 = vpop.f32.mrf.mxu2  ;;  %v1311_v24 = vpop.f32.mrf.mxu3  ;;  %1740 = vmatmul.f32.gmra.mxu1 %v4476_v46 }
 0x290   : > { %6469 = vst [vmem:[#allocation213_spill] sm:$0xff] %v4740_v5  ;;  %v1312_v55 = vadd.f32 %v1311_v24, %v4186_v54  ;;  %v1523_v34 = vpop.f32.mrf.mxu0 }
 0x292   : > { %v4747_v38 = vadd.f32 %v1520_v60, %v1312_v55  ;;  %v2277_v55 = vld [vmem:[%s6118_s6 + $0x138] sm:$0xff] }
 0x293   : > { %1570 = vmatmul.f32.gmra.mxu0 %v4745_v42  ;;  %2716 = vmatpush.msra.mxu1 %v2277_v55 }
 0x294   : > { %6472 = vst [vmem:[#allocation214_spill] sm:$0xff] %v4747_v38  ;;  %1152 = vmatmul.f32.gmra.mxu2 %v4745_v42  ;;  %1361 = vmatmul.f32.gmra.mxu3 %v4757_v19  ;;  %v6476_v42 = vld [vmem:[#allocation41_spill] sm:$0xff]  ;;  %v4774_v14 = vpop.f32.mrf.mxu1 }
 0x295   : > { %v4769_v38 = vadd.f32 %v4657_v36, %v6476_v42  ;;  %6479 = vst [vmem:[#allocation219_spill] sm:$0xff] %v4774_v14 }
 0x297   : > { %v4764_v10 = vpop.f32.mrf.mxu2  ;;  %v1314_v60 = vpop.f32.mrf.mxu3  ;;  %6477 = vst [vmem:[#allocation41_spill] sm:$0xff] %v4769_v38  ;;  %1743 = vmatmul.f32.gmra.mxu1 %v4500_v59  ;;  %v4796_v59 = vld [vmem:[%s3370_s12 + $0x178] sm:$0xff] }
 0x298   : > { %6475 = vst [vmem:[#allocation217_spill] sm:$0xff] %v4764_v10  ;;  %v1315_v24 = vadd.f32 %v1314_v60, %v4186_v54  ;;  %v1526_v30 = vpop.f32.mrf.mxu0 }
 0x299   : > { %6486 = vst [vmem:[#allocation224_spill] sm:$0xff] %v4796_v59 }
 0x29a   : > { %v4771_v5 = vadd.f32 %v1523_v34, %v1315_v24  ;;  %v6482_v24 = vld [vmem:[#allocation46_spill] sm:$0xff] }
 0x29b   : > { %1573 = vmatmul.f32.gmra.mxu0 %v4769_v38  ;;  %v4787_v46 = vadd.f32 %v4657_v36, %v6482_v24 }
 0x29c   : > { %6478 = vst [vmem:[#allocation218_spill] sm:$0xff] %v4771_v5  ;;  %1155 = vmatmul.f32.gmra.mxu2 %v4769_v38  ;;  %1364 = vmatmul.f32.gmra.mxu3 %v4778_v50  ;;  %v4792_v38 = vpop.f32.mrf.mxu1 }
 0x29d   : > { %6483 = vst [vmem:[#allocation46_spill] sm:$0xff] %v4787_v46 }
 0x29e   : > { %6485 = vst [vmem:[#allocation223_spill] sm:$0xff] %v4792_v38  ;;  %v4808_v38 = vperm.slane %v4178_v23, 0  ;;  %v744_v23 = vld [vmem:[%s6116_s4 + $0x1c0] sm:$0xff] }
 0x29f   : > { %v4782_v55 = vpop.f32.mrf.mxu2  ;;  %v1317_v60 = vpop.f32.mrf.mxu3  ;;  %1746 = vmatmul.f32.gmra.mxu1 %v4521_v57  ;;  %1850 = vmatpush.msra.mxu2 %v744_v23  ;;  %v2260_v23 = vld [vmem:[%s6118_s6 + $0xb0] sm:$0xff] }
 0x2a0   : > { %6481 = vst [vmem:[#allocation221_spill] sm:$0xff] %v4782_v55  ;;  %v1318_v42 = vadd.f32 %v1317_v60, %v4186_v54  ;;  %v1529_v34 = vpop.f32.mrf.mxu0  ;;  %v2244_v55 = vld [vmem:[%s6118_s6 + $0x30] sm:$0xff]  ;;  %2508 = vmatpush.msra.mxu0 %v2260_v23 }
 0x2a1   : > { %2299 = vmatpush.msra.mxu3 %v2244_v55 }
 0x2a2   : > { %v4789_v5 = vadd.f32 %v1526_v30, %v1318_v42  ;;  %v6488_v42 = vld [vmem:[#allocation51_spill] sm:$0xff] }
 0x2a3   : > { %1576 = vmatmul.f32.gmra.mxu0 %v4787_v46 }
 0x2a4   : > { %6484 = vst [vmem:[#allocation222_spill] sm:$0xff] %v4789_v5  ;;  %1158 = vmatmul.f32.gmra.mxu2 %v4787_v46  ;;  %1367 = vmatmul.f32.gmra.mxu3 %v4796_v59  ;;  %v4805_v5 = vadd.f32 %v4657_v36, %v6488_v42  ;;  %v4816_v57 = vpop.f32.mrf.mxu1 }
 0x2a5   : > { %6491 = vst [vmem:[#allocation227_spill] sm:$0xff] %v4816_v57 }
 0x2a6   : > { %6489 = vst [vmem:[#allocation51_spill] sm:$0xff] %v4805_v5 }
 0x2a7   : > { %v4800_v60 = vpop.f32.mrf.mxu2  ;;  %v1320_v14 = vpop.f32.mrf.mxu3  ;;  %1749 = vmatmul.f32.gmra.mxu1 %v4539_v61 }
 0x2a8   : > { %6487 = vst [vmem:[#allocation225_spill] sm:$0xff] %v4800_v60  ;;  %v1321_v24 = vadd.f32 %v1320_v14, %v4186_v54  ;;  %v1532_v30 = vpop.f32.mrf.mxu0  ;;  %v4820_v14 = vld [vmem:[%s3370_s12 + $0x180] sm:$0xff]  ;;  %v6495_v60 = vld [vmem:[#allocation56_spill] sm:$0xff] }
 0x2a9   : > { %6492 = vst [vmem:[#allocation228_spill] sm:$0xff] %v4820_v14  ;;  %v4834_v10 = vadd.f32 %v4657_v36, %v6495_v60 }
 0x2aa   : > { %v4810_v46 = vadd.f32 %v1529_v34, %v1321_v24  ;;  %v6493_v34 = vld [vmem:[#allocation5_spill] sm:$0xff] }
 0x2ab   : > { %1579 = vmatmul.f32.gmra.mxu0 %v4805_v5  ;;  %v906_v24 = vadd.f32 %v6493_v34, %v4808_v38  ;;  %6496 = vst [vmem:[#allocation56_spill] sm:$0xff] %v4834_v10 }
 0x2ac   : > { %6490 = vst [vmem:[#allocation226_spill] sm:$0xff] %v4810_v46  ;;  %1161 = vmatmul.f32.gmra.mxu2 %v4805_v5  ;;  %1370 = vmatmul.f32.gmra.mxu3 %v4820_v14  ;;  %v4842_v34 = vpop.f32.mrf.mxu1 }
 0x2ad   : > { %6498 = vst [vmem:[#allocation230_spill] sm:$0xff] %v4842_v34 }
 0x2af   : > { %v1114_v42 = vpop.f32.mrf.mxu2  ;;  %v1323_v57 = vpop.f32.mrf.mxu3  ;;  %1752 = vmatmul.f32.gmra.mxu1 %v4560_v47  ;;  %v6509_v47 = vld [vmem:[#allocation66_spill] sm:$0xff] }
 0x2b0   : > { %v4829_v55 = vadd.f32 %v1114_v42, %v906_v24  ;;  %v1324_v5 = vadd.f32 %v1323_v57, %v4186_v54  ;;  %v1535_v46 = vpop.f32.mrf.mxu0  ;;  %v4846_v24 = vld [vmem:[%s3370_s12 + $0x188] sm:$0xff]  ;;  %v2276_v57 = vld [vmem:[%s6118_s6 + $0x130] sm:$0xff] }
 0x2b1   : > { %6499 = vst [vmem:[#allocation231_spill] sm:$0xff] %v4846_v24  ;;  %2717 = vmatpush.msra.mxu1 %v2276_v57  ;;  %v4869_v57 = vld [vmem:[%s3370_s12 + $0x190] sm:$0xff] }
 0x2b2   : > { %6494 = vst [vmem:[#allocation5_spill] sm:$0xff] %v4829_v55  ;;  %v4836_v35 = vadd.f32 %v1532_v30, %v1324_v5  ;;  %v6500_v5 = vld [vmem:[#allocation7_spill] sm:$0xff]  ;;  %v6502_v55 = vld [vmem:[#allocation61_spill] sm:$0xff] }
 0x2b3   : > { %1582 = vmatmul.f32.gmra.mxu0 %v4834_v10  ;;  %v909_v60 = vadd.f32 %v6500_v5, %v4808_v38  ;;  %6506 = vst [vmem:[#allocation234_spill] sm:$0xff] %v4869_v57  ;;  %v6507_v5 = vld [vmem:[#allocation9_spill] sm:$0xff] }
 0x2b4   : > { %6497 = vst [vmem:[#allocation229_spill] sm:$0xff] %v4836_v35  ;;  %1164 = vmatmul.f32.gmra.mxu2 %v4834_v10  ;;  %1373 = vmatmul.f32.gmra.mxu3 %v4846_v24  ;;  %v4860_v35 = vadd.f32 %v4657_v36, %v6502_v55  ;;  %v4865_v23 = vpop.f32.mrf.mxu1 }
 0x2b5   : > { %6505 = vst [vmem:[#allocation233_spill] sm:$0xff] %v4865_v23  ;;  %v4880_v23 = vadd.f32 %v4657_v36, %v6509_v47 }
 0x2b6   : > { %6503 = vst [vmem:[#allocation61_spill] sm:$0xff] %v4860_v35 }
 0x2b7   : > { %v1117_v30 = vpop.f32.mrf.mxu2  ;;  %v1326_v42 = vpop.f32.mrf.mxu3  ;;  %1755 = vmatmul.f32.gmra.mxu1 %v4584_v43  ;;  %6510 = vst [vmem:[#allocation66_spill] sm:$0xff] %v4880_v23 }
 0x2b8   : > { %v4855_v61 = vadd.f32 %v1117_v30, %v909_v60  ;;  %v1327_v10 = vadd.f32 %v1326_v42, %v4186_v54  ;;  %v1538_v34 = vpop.f32.mrf.mxu0  ;;  %v912_v60 = vadd.f32 %v6507_v5, %v4808_v38  ;;  %v4889_v5 = vld [vmem:[%s3370_s12 + $0x198] sm:$0xff] }
 0x2b9   : > { %6513 = vst [vmem:[#allocation237_spill] sm:$0xff] %v4889_v5 }
 0x2ba   : > { %6501 = vst [vmem:[#allocation7_spill] sm:$0xff] %v4855_v61  ;;  %v4862_v8 = vadd.f32 %v1535_v46, %v1327_v10 }
 0x2bb   : > { %1585 = vmatmul.f32.gmra.mxu0 %v4860_v35 }
 0x2bc   : > { %6504 = vst [vmem:[#allocation232_spill] sm:$0xff] %v4862_v8  ;;  %1167 = vmatmul.f32.gmra.mxu2 %v4860_v35  ;;  %1376 = vmatmul.f32.gmra.mxu3 %v4869_v57  ;;  %v4885_v61 = vpop.f32.mrf.mxu1 }
 0x2bd   : > { %6512 = vst [vmem:[#allocation236_spill] sm:$0xff] %v4885_v61  ;;  %v6516_v61 = vld [vmem:[#allocation71_spill] sm:$0xff] }
 0x2bf   : > { %v1120_v55 = vpop.f32.mrf.mxu2  ;;  %v1329_v30 = vpop.f32.mrf.mxu3  ;;  %1758 = vmatmul.f32.gmra.mxu1 %v4605_v0 }
 0x2c0   : > { %v4875_v46 = vadd.f32 %v1120_v55, %v912_v60  ;;  %v1330_v10 = vadd.f32 %v1329_v30, %v4186_v54  ;;  %v1541_v42 = vpop.f32.mrf.mxu0  ;;  %v6514_v60 = vld [vmem:[#allocation11_spill] sm:$0xff] }
 0x2c1   : > { %v915_v55 = vadd.f32 %v6514_v60, %v4808_v38 }
 0x2c2   : > { %6508 = vst [vmem:[#allocation9_spill] sm:$0xff] %v4875_v46  ;;  %v4882_v35 = vadd.f32 %v1538_v34, %v1330_v10 }
 0x2c3   : > { %1588 = vmatmul.f32.gmra.mxu0 %v4880_v23 }
 0x2c4   : > { %6511 = vst [vmem:[#allocation235_spill] sm:$0xff] %v4882_v35  ;;  %1170 = vmatmul.f32.gmra.mxu2 %v4880_v23  ;;  %1379 = vmatmul.f32.gmra.mxu3 %v4889_v5  ;;  %v4900_v23 = vadd.f32 %v4657_v36, %v6516_v61  ;;  %v2243_v35 = vld [vmem:[%s6118_s6 + $0x28] sm:$0xff]  ;;  %v4908_v60 = vpop.f32.mrf.mxu1 }
 0x2c5   : > { %6519 = vst [vmem:[#allocation239_spill] sm:$0xff] %v4908_v60  ;;  %2300 = vmatpush.msra.mxu3 %v2243_v35  ;;  %v741_v61 = vld [vmem:[%s6116_s4 + $0x1a8] sm:$0xff]  ;;  %v6523_v60 = vld [vmem:[#allocation76_spill] sm:$0xff] }
 0x2c6   : > { %6517 = vst [vmem:[#allocation71_spill] sm:$0xff] %v4900_v23  ;;  %1851 = vmatpush.msra.mxu2 %v741_v61  ;;  %v2259_v61 = vld [vmem:[%s6118_s6 + $0xa8] sm:$0xff] }
 0x2c7   : > { %v1123_v47 = vpop.f32.mrf.mxu2  ;;  %v1332_v30 = vpop.f32.mrf.mxu3  ;;  %1761 = vmatmul.f32.gmra.mxu1 %v4623_v20  ;;  %2509 = vmatpush.msra.mxu0 %v2259_v61 }
 0x2c8   : > { %v4895_v34 = vadd.f32 %v1123_v47, %v915_v55  ;;  %v1333_v10 = vadd.f32 %v1332_v30, %v4186_v54  ;;  %v1544_v43 = vpop.f32.mrf.mxu0  ;;  %v4912_v55 = vld [vmem:[%s3370_s12 + $0x1a0] sm:$0xff] }
 0x2c9   : > { %6520 = vst [vmem:[#allocation240_spill] sm:$0xff] %v4912_v55 }
 0x2ca   : > { %6515 = vst [vmem:[#allocation11_spill] sm:$0xff] %v4895_v34  ;;  %v4902_v46 = vadd.f32 %v1541_v42, %v1333_v10  ;;  %v6521_v42 = vld [vmem:[#allocation13_spill] sm:$0xff]  ;;  %v4926_v34 = vadd.f32 %v4657_v36, %v6523_v60 }
 0x2cb   : > { %1591 = vmatmul.f32.gmra.mxu0 %v4900_v23  ;;  %v918_v47 = vadd.f32 %v6521_v42, %v4808_v38 }
 0x2cc   : > { %6518 = vst [vmem:[#allocation238_spill] sm:$0xff] %v4902_v46  ;;  %1173 = vmatmul.f32.gmra.mxu2 %v4900_v23  ;;  %1382 = vmatmul.f32.gmra.mxu3 %v4912_v55  ;;  %v4934_v42 = vpop.f32.mrf.mxu1 }
 0x2cd   : > { %6524 = vst [vmem:[#allocation76_spill] sm:$0xff] %v4926_v34 }
 0x2ce   : > { %6526 = vst [vmem:[#allocation242_spill] sm:$0xff] %v4934_v42 }
 0x2cf   : > { %v1126_v30 = vpop.f32.mrf.mxu2  ;;  %v1335_v10 = vpop.f32.mrf.mxu3  ;;  %1764 = vmatmul.f32.gmra.mxu1 %v4644_v7  ;;  %v6537_v7 = vld [vmem:[#allocation86_spill] sm:$0xff] }
 0x2d0   : > { %v4921_v35 = vadd.f32 %v1126_v30, %v918_v47  ;;  %v1336_v0 = vadd.f32 %v1335_v10, %v4186_v54  ;;  %v1547_v23 = vpop.f32.mrf.mxu0  ;;  %v4938_v47 = vld [vmem:[%s3370_s12 + $0x1a8] sm:$0xff] }
 0x2d1   : > { %6527 = vst [vmem:[#allocation243_spill] sm:$0xff] %v4938_v47 }
 0x2d2   : > { %6522 = vst [vmem:[#allocation13_spill] sm:$0xff] %v4921_v35  ;;  %v4928_v46 = vadd.f32 %v1544_v43, %v1336_v0  ;;  %v2275_v43 = vld [vmem:[%s6118_s6 + $0x128] sm:$0xff]  ;;  %v6530_v35 = vld [vmem:[#allocation81_spill] sm:$0xff] }
 0x2d3   : > { %1594 = vmatmul.f32.gmra.mxu0 %v4926_v34  ;;  %2718 = vmatpush.msra.mxu1 %v2275_v43  ;;  %v6528_v0 = vld [vmem:[#allocation15_spill] sm:$0xff]  ;;  %v4961_v43 = vld [vmem:[%s3370_s12 + $0x1b0] sm:$0xff] }
 0x2d4   : > { %6525 = vst [vmem:[#allocation241_spill] sm:$0xff] %v4928_v46  ;;  %1176 = vmatmul.f32.gmra.mxu2 %v4926_v34  ;;  %1385 = vmatmul.f32.gmra.mxu3 %v4938_v47  ;;  %v921_v60 = vadd.f32 %v6528_v0, %v4808_v38  ;;  %v4952_v46 = vadd.f32 %v4657_v36, %v6530_v35  ;;  %v4957_v61 = vpop.f32.mrf.mxu1  ;;  %v6535_v0 = vld [vmem:[#allocation17_spill] sm:$0xff] }
 0x2d5   : > { %6533 = vst [vmem:[#allocation245_spill] sm:$0xff] %v4957_v61  ;;  %v4972_v61 = vadd.f32 %v4657_v36, %v6537_v7 }
 0x2d6   : > { %6531 = vst [vmem:[#allocation81_spill] sm:$0xff] %v4952_v46 }
 0x2d7   : > { %v1129_v30 = vpop.f32.mrf.mxu2  ;;  %v1338_v10 = vpop.f32.mrf.mxu3  ;;  %6534 = vst [vmem:[#allocation246_spill] sm:$0xff] %v4961_v43  ;;  %1767 = vmatmul.f32.gmra.mxu1 %v4673_v28 }
 0x2d8   : > { %v4947_v20 = vadd.f32 %v1129_v30, %v921_v60  ;;  %v1339_v34 = vadd.f32 %v1338_v10, %v4186_v54  ;;  %v1550_v42 = vpop.f32.mrf.mxu0  ;;  %v924_v60 = vadd.f32 %v6535_v0, %v4808_v38  ;;  %6538 = vst [vmem:[#allocation86_spill] sm:$0xff] %v4972_v61  ;;  %v4981_v0 = vld [vmem:[%s3370_s12 + $0x1b8] sm:$0xff] }
 0x2d9   : > { %6541 = vst [vmem:[#allocation249_spill] sm:$0xff] %v4981_v0 }
 0x2da   : > { %6529 = vst [vmem:[#allocation15_spill] sm:$0xff] %v4947_v20  ;;  %v4954_v8 = vadd.f32 %v1547_v23, %v1339_v34 }
 0x2db   : > { %1597 = vmatmul.f32.gmra.mxu0 %v4952_v46 }
 0x2dc   : > { %6532 = vst [vmem:[#allocation244_spill] sm:$0xff] %v4954_v8  ;;  %1179 = vmatmul.f32.gmra.mxu2 %v4952_v46  ;;  %1388 = vmatmul.f32.gmra.mxu3 %v4961_v43  ;;  %v4977_v20 = vpop.f32.mrf.mxu1 }
 0x2dd   : > { %6540 = vst [vmem:[#allocation248_spill] sm:$0xff] %v4977_v20  ;;  %v6544_v20 = vld [vmem:[#allocation91_spill] sm:$0xff] }
 0x2df   : > { %v1132_v35 = vpop.f32.mrf.mxu2  ;;  %v1341_v30 = vpop.f32.mrf.mxu3  ;;  %1770 = vmatmul.f32.gmra.mxu1 %v4694_v9 }
 0x2e0   : > { %v4967_v23 = vadd.f32 %v1132_v35, %v924_v60  ;;  %v1342_v34 = vadd.f32 %v1341_v30, %v4186_v54  ;;  %v1553_v10 = vpop.f32.mrf.mxu0  ;;  %v6542_v60 = vld [vmem:[#allocation19_spill] sm:$0xff] }
 0x2e1   : > { %v927_v35 = vadd.f32 %v6542_v60, %v4808_v38 }
 0x2e2   : > { %6536 = vst [vmem:[#allocation17_spill] sm:$0xff] %v4967_v23  ;;  %v4974_v46 = vadd.f32 %v1550_v42, %v1342_v34 }
 0x2e3   : > { %1600 = vmatmul.f32.gmra.mxu0 %v4972_v61 }
 0x2e4   : > { %6539 = vst [vmem:[#allocation247_spill] sm:$0xff] %v4974_v46  ;;  %1182 = vmatmul.f32.gmra.mxu2 %v4972_v61  ;;  %1391 = vmatmul.f32.gmra.mxu3 %v4981_v0  ;;  %v4992_v61 = vadd.f32 %v4657_v36, %v6544_v20  ;;  %v2242_v46 = vld [vmem:[%s6118_s6 + $0x20] sm:$0xff]  ;;  %v5000_v60 = vpop.f32.mrf.mxu1  ;;  %v738_v20 = vld [vmem:[%s6116_s4 + $0x190] sm:$0xff] }
 0x2e5   : > { %6547 = vst [vmem:[#allocation251_spill] sm:$0xff] %v5000_v60  ;;  %2301 = vmatpush.msra.mxu3 %v2242_v46  ;;  %1852 = vmatpush.msra.mxu2 %v738_v20  ;;  %v6551_v60 = vld [vmem:[#allocation96_spill] sm:$0xff]  ;;  %v2258_v20 = vld [vmem:[%s6118_s6 + $0xa0] sm:$0xff] }
 0x2e6   : > { %6545 = vst [vmem:[#allocation91_spill] sm:$0xff] %v4992_v61  ;;  %2510 = vmatpush.msra.mxu0 %v2258_v20 }
 0x2e7   : > { %v1135_v7 = vpop.f32.mrf.mxu2  ;;  %v1344_v30 = vpop.f32.mrf.mxu3  ;;  %1773 = vmatmul.f32.gmra.mxu1 %v4712_v45 }
 0x2e8   : > { %v4987_v42 = vadd.f32 %v1135_v7, %v927_v35  ;;  %v1345_v34 = vadd.f32 %v1344_v30, %v4186_v54  ;;  %v1556_v28 = vpop.f32.mrf.mxu0  ;;  %v5004_v35 = vld [vmem:[%s3370_s12 + $0x1c0] sm:$0xff] }
 0x2e9   : > { %6548 = vst [vmem:[#allocation252_spill] sm:$0xff] %v5004_v35 }
 0x2ea   : > { %6543 = vst [vmem:[#allocation19_spill] sm:$0xff] %v4987_v42  ;;  %v4994_v23 = vadd.f32 %v1553_v10, %v1345_v34  ;;  %v6549_v10 = vld [vmem:[#allocation22_spill] sm:$0xff]  ;;  %v5018_v42 = vadd.f32 %v4657_v36, %v6551_v60 }
 0x2eb   : > { %1603 = vmatmul.f32.gmra.mxu0 %v4992_v61  ;;  %v930_v7 = vadd.f32 %v6549_v10, %v4808_v38 }
 0x2ec   : > { %6546 = vst [vmem:[#allocation250_spill] sm:$0xff] %v4994_v23  ;;  %1185 = vmatmul.f32.gmra.mxu2 %v4992_v61  ;;  %1394 = vmatmul.f32.gmra.mxu3 %v5004_v35  ;;  %v5026_v10 = vpop.f32.mrf.mxu1 }
 0x2ed   : > { %6552 = vst [vmem:[#allocation96_spill] sm:$0xff] %v5018_v42 }
 0x2ee   : > { %6554 = vst [vmem:[#allocation254_spill] sm:$0xff] %v5026_v10 }
 0x2ef   : > { %v1138_v30 = vpop.f32.mrf.mxu2  ;;  %v1347_v34 = vpop.f32.mrf.mxu3  ;;  %1776 = vmatmul.f32.gmra.mxu1 %v4733_v15  ;;  %v6565_v15 = vld [vmem:[#allocation106_spill] sm:$0xff] }
 0x2f0   : > { %v5013_v46 = vadd.f32 %v1138_v30, %v930_v7  ;;  %v1348_v9 = vadd.f32 %v1347_v34, %v4186_v54  ;;  %v1559_v61 = vpop.f32.mrf.mxu0  ;;  %v5030_v7 = vld [vmem:[%s3370_s12 + $0x1c8] sm:$0xff] }
 0x2f1   : > { %6555 = vst [vmem:[#allocation255_spill] sm:$0xff] %v5030_v7 }
 0x2f2   : > { %6550 = vst [vmem:[#allocation22_spill] sm:$0xff] %v5013_v46  ;;  %v5020_v23 = vadd.f32 %v1556_v28, %v1348_v9  ;;  %v2274_v28 = vld [vmem:[%s6118_s6 + $0x120] sm:$0xff]  ;;  %v6556_v9 = vld [vmem:[#allocation25_spill] sm:$0xff] }
 0x2f3   : > { %1606 = vmatmul.f32.gmra.mxu0 %v5018_v42  ;;  %2719 = vmatpush.msra.mxu1 %v2274_v28  ;;  %v933_v60 = vadd.f32 %v6556_v9, %v4808_v38  ;;  %v6558_v46 = vld [vmem:[#allocation101_spill] sm:$0xff]  ;;  %v5053_v28 = vld [vmem:[%s3370_s12 + $0x1d0] sm:$0xff] }
 0x2f4   : > { %6553 = vst [vmem:[#allocation253_spill] sm:$0xff] %v5020_v23  ;;  %1188 = vmatmul.f32.gmra.mxu2 %v5018_v42  ;;  %1397 = vmatmul.f32.gmra.mxu3 %v5030_v7  ;;  %v5044_v23 = vadd.f32 %v4657_v36, %v6558_v46  ;;  %v5049_v20 = vpop.f32.mrf.mxu1  ;;  %v6563_v9 = vld [vmem:[#allocation28_spill] sm:$0xff] }
 0x2f5   : > { %6561 = vst [vmem:[#allocation257_spill] sm:$0xff] %v5049_v20  ;;  %v5064_v20 = vadd.f32 %v4657_v36, %v6565_v15  ;;  %v2257_v15 = vld [vmem:[%s6118_s6 + $0x98] sm:$0xff] }
 0x2f6   : > { %6559 = vst [vmem:[#allocation101_spill] sm:$0xff] %v5044_v23  ;;  %2511 = vmatpush.msra.mxu0 %v2257_v15 }
 0x2f7   : > { %v1141_v30 = vpop.f32.mrf.mxu2  ;;  %v1350_v34 = vpop.f32.mrf.mxu3  ;;  %6562 = vst [vmem:[#allocation258_spill] sm:$0xff] %v5053_v28  ;;  %1779 = vmatmul.f32.gmra.mxu1 %v4757_v19 }
 0x2f8   : > { %v5039_v45 = vadd.f32 %v1141_v30, %v933_v60  ;;  %v1351_v42 = vadd.f32 %v1350_v34, %v4186_v54  ;;  %v1562_v10 = vpop.f32.mrf.mxu0  ;;  %v936_v60 = vadd.f32 %v6563_v9, %v4808_v38  ;;  %6566 = vst [vmem:[#allocation106_spill] sm:$0xff] %v5064_v20  ;;  %v5073_v9 = vld [vmem:[%s3370_s12 + $0x1d8] sm:$0xff] }
 0x2f9   : > { %6569 = vst [vmem:[#allocation261_spill] sm:$0xff] %v5073_v9 }
 0x2fa   : > { %6557 = vst [vmem:[#allocation25_spill] sm:$0xff] %v5039_v45  ;;  %v5046_v8 = vadd.f32 %v1559_v61, %v1351_v42 }
 0x2fb   : > { %1609 = vmatmul.f32.gmra.mxu0 %v5044_v23 }
 0x2fc   : > { %6560 = vst [vmem:[#allocation256_spill] sm:$0xff] %v5046_v8  ;;  %1191 = vmatmul.f32.gmra.mxu2 %v5044_v23  ;;  %1400 = vmatmul.f32.gmra.mxu3 %v5053_v28  ;;  %v5069_v45 = vpop.f32.mrf.mxu1 }
 0x2fd   : > { %6568 = vst [vmem:[#allocation260_spill] sm:$0xff] %v5069_v45  ;;  %v2255_v45 = vld [vmem:[%s6118_s6 + $0x88] sm:$0xff] }
 0x2ff   : > { %v1144_v46 = vpop.f32.mrf.mxu2  ;;  %v1353_v30 = vpop.f32.mrf.mxu3  ;;  %1782 = vmatmul.f32.gmra.mxu1 %v4778_v50  ;;  %v2239_v50 = vld [vmem:[%s6118_s6 + $0x8] sm:$0xff] }
 0x300   : > { %v5059_v61 = vadd.f32 %v1144_v46, %v936_v60  ;;  %v1354_v42 = vadd.f32 %v1353_v30, %v4186_v54  ;;  %v1565_v34 = vpop.f32.mrf.mxu0  ;;  %v2241_v60 = vld [vmem:[%s6118_s6 + $0x18] sm:$0xff]  ;;  %v2240_v30 = vld [vmem:[%s6118_s6 + $0x10] sm:$0xff] }
 0x301   : > { %2302 = vmatpush.msra.mxu3 %v2241_v60 }
 0x302   : > { %6564 = vst [vmem:[#allocation28_spill] sm:$0xff] %v5059_v61  ;;  %v5066_v23 = vadd.f32 %v1562_v10, %v1354_v42  ;;  %v6570_v10 = vld [vmem:[#allocation31_spill] sm:$0xff]  ;;  %v2256_v42 = vld [vmem:[%s6118_s6 + $0x90] sm:$0xff] }
 0x303   : > { %1612 = vmatmul.f32.gmra.mxu0 %v5064_v20  ;;  %v939_v46 = vadd.f32 %v6570_v10, %v4808_v38  ;;  %2303 = vmatpush.msra.mxu3 %v2240_v30  ;;  %v6572_v61 = vld [vmem:[#allocation111_spill] sm:$0xff] }
 0x304   : > { %6567 = vst [vmem:[#allocation259_spill] sm:$0xff] %v5066_v23  ;;  %1194 = vmatmul.f32.gmra.mxu2 %v5064_v20  ;;  %1403 = vmatmul.f32.gmra.mxu3 %v5073_v9  ;;  %v5102_v23 = vadd.f32 %v4657_v36, %v6572_v61 }
 0x305   : > { %2512 = vmatpush.msra.mxu0 %v2256_v42  ;;  %2304 = vmatpush.msra.mxu3 %v2239_v50  ;;  %v5117_v50 = vld [vmem:[%s3370_s12 + $0x1e0] sm:$0xff] }
 0x306   : > { %6573 = vst [vmem:[#allocation111_spill] sm:$0xff] %v5102_v23 }
 0x307   : > { %v1147_v19 = vpop.f32.mrf.mxu2  ;;  %v1356_v20 = vpop.f32.mrf.mxu3  ;;  %2513 = vmatpush.msra.mxu0 %v2255_v45  ;;  %6576 = vst [vmem:[#allocation264_spill] sm:$0xff] %v5117_v50  ;;  %v6577_v45 = vld [vmem:[#allocation34_spill] sm:$0xff]  ;;  %1785 = vmatmul.f32.gmra.mxu1 %v4796_v59 }
 0x308   : > { %v5091_v60 = vadd.f32 %v1147_v19, %v939_v46  ;;  %v1357_v15 = vadd.f32 %v1356_v20, %v4186_v54  ;;  %v1568_v10 = vpop.f32.mrf.mxu0  ;;  %v2238_v19 = vld [vmem:[%s6118_s6] sm:$0xff]  ;;  %v5113_v46 = vpop.f32.mrf.mxu1  ;;  %v942_v61 = vadd.f32 %v6577_v45, %v4808_v38  ;;  %v5137_v45 = vld [vmem:[%s3370_s12 + $0x1e8] sm:$0xff] }
 0x309   : > { %v2254_v20 = vld [vmem:[%s6118_s6 + $0x80] sm:$0xff]  ;;  %6575 = vst [vmem:[#allocation263_spill] sm:$0xff] %v5113_v46  ;;  %2305 = vmatpush.msra.mxu3 %v2238_v19 }
 0x30a   : > { %6571 = vst [vmem:[#allocation31_spill] sm:$0xff] %v5091_v60  ;;  %v5104_v30 = vadd.f32 %v1565_v34, %v1357_v15  ;;  %2514 = vmatpush.msra.mxu0 %v2254_v20  ;;  %v6579_v60 = vld [vmem:[#allocation115_spill] sm:$0xff] }
 0x30b   : > { %1615 = vmatmul.f32.gmra.mxu0 %v5102_v23  ;;  %6583 = vst [vmem:[#allocation267_spill] sm:$0xff] %v5137_v45 }
 0x30c   : > { %6574 = vst [vmem:[#allocation262_spill] sm:$0xff] %v5104_v30  ;;  %1197 = vmatmul.f32.gmra.mxu2 %v5102_v23  ;;  %1406 = vmatmul.f32.gmra.mxu3 %v5117_v50  ;;  %v5128_v23 = vadd.f32 %v4657_v36, %v6579_v60  ;;  %v6584_v60 = vld [vmem:[#allocation38_spill] sm:$0xff] }
 0x30e   : > { %6580 = vst [vmem:[#allocation115_spill] sm:$0xff] %v5128_v23 }
 0x30f   : > { %v1150_v34 = vpop.f32.mrf.mxu2  ;;  %v1359_v42 = vpop.f32.mrf.mxu3  ;;  %1788 = vmatmul.f32.gmra.mxu1 %v4820_v14 }
 0x310   : > { %v5123_v15 = vadd.f32 %v1150_v34, %v942_v61  ;;  %v1360_v46 = vadd.f32 %v1359_v42, %v4186_v54  ;;  %v1571_v19 = vpop.f32.mrf.mxu0  ;;  %v5133_v20 = vpop.f32.mrf.mxu1  ;;  %v2273_v61 = vld [vmem:[%s6118_s6 + $0x118] sm:$0xff] }
 0x311   : > { %6582 = vst [vmem:[#allocation266_spill] sm:$0xff] %v5133_v20  ;;  %2720 = vmatpush.msra.mxu1 %v2273_v61  ;;  %v6586_v20 = vld [vmem:[#allocation119_spill] sm:$0xff] }
 0x312   : > { %6578 = vst [vmem:[#allocation34_spill] sm:$0xff] %v5123_v15  ;;  %v5130_v30 = vadd.f32 %v1568_v10, %v1360_v46  ;;  %v945_v10 = vadd.f32 %v6584_v60, %v4808_v38  ;;  %v5151_v15 = vadd.f32 %v4657_v36, %v6586_v20  ;;  %v5160_v60 = vld [vmem:[%s3370_s12 + $0x1f0] sm:$0xff] }
 0x313   : > { %1618 = vmatmul.f32.gmra.mxu0 %v5128_v23  ;;  %6590 = vst [vmem:[#allocation270_spill] sm:$0xff] %v5160_v60 }
 0x314   : > { %6581 = vst [vmem:[#allocation265_spill] sm:$0xff] %v5130_v30  ;;  %1200 = vmatmul.f32.gmra.mxu2 %v5128_v23  ;;  %1409 = vmatmul.f32.gmra.mxu3 %v5137_v45 }
 0x315   : > { %6587 = vst [vmem:[#allocation119_spill] sm:$0xff] %v5151_v15 }
 0x317   : > { %v1153_v46 = vpop.f32.mrf.mxu2  ;;  %v1362_v34 = vpop.f32.mrf.mxu3  ;;  %1791 = vmatmul.f32.gmra.mxu1 %v4846_v24 }
 0x318   : > { %v5146_v42 = vadd.f32 %v1153_v46, %v945_v10  ;;  %v1363_v59 = vadd.f32 %v1362_v34, %v4186_v54  ;;  %v1574_v23 = vpop.f32.mrf.mxu0  ;;  %v5156_v61 = vpop.f32.mrf.mxu1  ;;  %v6591_v10 = vld [vmem:[#allocation42_spill] sm:$0xff] }
 0x319   : > { %6589 = vst [vmem:[#allocation269_spill] sm:$0xff] %v5156_v61  ;;  %v948_v46 = vadd.f32 %v6591_v10, %v4808_v38  ;;  %v6593_v61 = vld [vmem:[#allocation123_spill] sm:$0xff] }
 0x31a   : > { %6585 = vst [vmem:[#allocation38_spill] sm:$0xff] %v5146_v42  ;;  %v5153_v30 = vadd.f32 %v1571_v19, %v1363_v59  ;;  %v6597_v10 = vld [vmem:[#allocation35_spill] sm:$0xff] }
 0x31b   : > { %1621 = vmatmul.f32.gmra.mxu0 %v5151_v15  ;;  %v810_v24 = vadd.f32 %v6597_v10, %v4808_v38 }
 0x31c   : > { %6588 = vst [vmem:[#allocation268_spill] sm:$0xff] %v5153_v30  ;;  %1203 = vmatmul.f32.gmra.mxu2 %v5151_v15  ;;  %1412 = vmatmul.f32.gmra.mxu3 %v5160_v60  ;;  %v5171_v15 = vadd.f32 %v4657_v36, %v6593_v61 }
 0x31d   : > { %v1019_v36 = vadd.f32 %v4196_v33, %v810_v24  ;;  %v6603_v24 = vld [vmem:[#allocation45_spill] sm:$0xff] }
 0x31e   : > { %6594 = vst [vmem:[#allocation123_spill] sm:$0xff] %v5171_v15 }
 0x31f   : > { %v1156_v20 = vpop.f32.mrf.mxu2  ;;  %v1365_v34 = vpop.f32.mrf.mxu3  ;;  %1794 = vmatmul.f32.gmra.mxu1 %v4869_v57  ;;  %v2050_v57 = vmax.f32 %v4220_v21, 0.0 }
 0x320   : > { %v5166_v59 = vadd.f32 %v1156_v20, %v948_v46  ;;  %v1366_v19 = vadd.f32 %v1365_v34, %v4186_v54  ;;  %v1577_v14 = vpop.f32.mrf.mxu0  ;;  %v5176_v30 = vpop.f32.mrf.mxu1  ;;  %v5182_v46 = vld [vmem:[%s3370_s12 + $0x1f8] sm:$0xff]  ;;  %v6599_v20 = vld [vmem:[#allocation47_spill] sm:$0xff] }
 0x321   : > { %6596 = vst [vmem:[#allocation272_spill] sm:$0xff] %v5176_v30  ;;  %v951_v34 = vadd.f32 %v6599_v20, %v4808_v38  ;;  %v6602_v20 = vld [vmem:[#allocation39_spill] sm:$0xff] }
 0x322   : > { %6592 = vst [vmem:[#allocation42_spill] sm:$0xff] %v5166_v59  ;;  %v5173_v42 = vadd.f32 %v1574_v23, %v1366_v19  ;;  %v6600_v59 = vld [vmem:[#allocation127_spill] sm:$0xff]  ;;  %v813_v33 = vadd.f32 %v6602_v20, %v4808_v38 }
 0x323   : > { %1624 = vmatmul.f32.gmra.mxu0 %v5171_v15  ;;  %6598 = vst [vmem:[#allocation35_spill] sm:$0xff] %v5182_v46 }
 0x324   : > { %6595 = vst [vmem:[#allocation271_spill] sm:$0xff] %v5173_v42  ;;  %1206 = vmatmul.f32.gmra.mxu2 %v5171_v15  ;;  %1415 = vmatmul.f32.gmra.mxu3 %v5182_v46  ;;  %v2047_v15 = vmax.f32 %v6600_v59, 0.0  ;;  %v2046_v42 = vmax.f32 %v1019_v36, 0.0 }
 0x327   : > { %v1159_v23 = vpop.f32.mrf.mxu2  ;;  %v1368_v61 = vpop.f32.mrf.mxu3  ;;  %1797 = vmatmul.f32.gmra.mxu1 %v4889_v5 }
 0x328   : > { %v5189_v19 = vadd.f32 %v1159_v23, %v951_v34  ;;  %v1369_v30 = vadd.f32 %v1368_v61, %v4186_v54  ;;  %v1580_v10 = vpop.f32.mrf.mxu0  ;;  %v5195_v51 = vpop.f32.mrf.mxu1  ;;  %v6604_v34 = vld [vmem:[#allocation52_spill] sm:$0xff]  ;;  %v1022_v61 = vadd.f32 %v4217_v31, %v813_v33  ;;  %v6606_v33 = vld [vmem:[#allocation50_spill] sm:$0xff] }
 0x329   : > { %6601 = vst [vmem:[#allocation47_spill] sm:$0xff] %v5195_v51  ;;  %v954_v23 = vadd.f32 %v6604_v34, %v4808_v38  ;;  %v2272_v34 = vld [vmem:[%s6118_s6 + $0x110] sm:$0xff] }
 0x32a   : > { %v5193_v8 = vadd.f32 %v1577_v14, %v1369_v30  ;;  %v2049_v20 = vmax.f32 %v1022_v61, 0.0  ;;  %2721 = vmatpush.msra.mxu1 %v2272_v34 }
 0x32b   : > { %2515 = vmatmul.f32.vlgmr.msra.gmra.mxu0 %v2047_v15 }
 0x32c   : > { %1853 = vmatmul.f32.vlgmr.msra.gmra.mxu2 %v6603_v24  ;;  %2306 = vmatmul.f32.vlgmr.msra.gmra.mxu3 %v2046_v42  ;;  %v6605_v24 = vld [vmem:[#allocation43_spill] sm:$0xff] }
 0x32d   : > { %v816_v31 = vadd.f32 %v6605_v24, %v4808_v38 }
 0x32f   : > { %v1162_v59 = vpop.f32.mrf.mxu2  ;;  %v1371_v36 = vpop.f32.mrf.mxu3  ;;  %1800 = vmatmul.f32.gmra.mxu1 %v4912_v55  ;;  %v2056_v55 = vmax.f32 %v4250_v11, 0.0 }
 0x330   : > { %v5204_v14 = vadd.f32 %v1162_v59, %v954_v23  ;;  %v1372_v30 = vadd.f32 %v1371_v36, %v4186_v54  ;;  %v1583_v15 = vpop.f32.mrf.mxu0  ;;  %v5210_v42 = vpop.f32.mrf.mxu1  ;;  %v6607_v23 = vld [vmem:[#allocation57_spill] sm:$0xff] }
 0x331   : > { %v957_v21 = vadd.f32 %v6607_v23, %v4808_v38  ;;  %v6608_v23 = vld [vmem:[#allocation48_spill] sm:$0xff] }
 0x332   : > { %v5208_v51 = vadd.f32 %v1580_v10, %v1372_v30  ;;  %v1025_v10 = vadd.f32 %v4232_v16, %v816_v31  ;;  %v819_v16 = vadd.f32 %v6608_v23, %v4808_v38  ;;  %v6609_v31 = vld [vmem:[#allocation55_spill] sm:$0xff] }
 0x333   : > { %2518 = vmatmul.f32.gmra.mxu0 %v2050_v57 }
 0x334   : > { %1856 = vmatmul.f32.gmra.mxu2 %v6606_v33  ;;  %2309 = vmatmul.f32.gmra.mxu3 %v2049_v20  ;;  %v2053_v20 = vmax.f32 %v4235_v63, 0.0  ;;  %v2052_v24 = vmax.f32 %v1025_v10, 0.0 }
 0x337   : > { %v1165_v57 = vpop.f32.mrf.mxu2  ;;  %v1374_v61 = vpop.f32.mrf.mxu3  ;;  %1803 = vmatmul.f32.gmra.mxu1 %v4938_v47 }
 0x338   : > { %v5222_v59 = vadd.f32 %v1165_v57, %v957_v21  ;;  %v1375_v36 = vadd.f32 %v1374_v61, %v4186_v54  ;;  %v1586_v30 = vpop.f32.mrf.mxu0  ;;  %v5228_v34 = vpop.f32.mrf.mxu1  ;;  %v6610_v21 = vld [vmem:[#allocation62_spill] sm:$0xff]  ;;  %v1028_v61 = vadd.f32 %v4247_v58, %v819_v16  ;;  %v6612_v16 = vld [vmem:[#allocation60_spill] sm:$0xff] }
 0x339   : > { %v960_v57 = vadd.f32 %v6610_v21, %v4808_v38  ;;  %v6613_v21 = vld [vmem:[#allocation67_spill] sm:$0xff] }
 0x33a   : > { %v5226_v33 = vadd.f32 %v1583_v15, %v1375_v36  ;;  %v2055_v23 = vmax.f32 %v1028_v61, 0.0 }
 0x33b   : > { %2521 = vmatmul.f32.gmra.mxu0 %v2053_v20 }
 0x33c   : > { %1859 = vmatmul.f32.gmra.mxu2 %v6609_v31  ;;  %2312 = vmatmul.f32.gmra.mxu3 %v2052_v24  ;;  %v6611_v31 = vld [vmem:[#allocation53_spill] sm:$0xff] }
 0x33d   : > { %v822_v58 = vadd.f32 %v6611_v31, %v4808_v38 }
 0x33f   : > { %v1168_v63 = vpop.f32.mrf.mxu2  ;;  %v1377_v10 = vpop.f32.mrf.mxu3  ;;  %1806 = vmatmul.f32.gmra.mxu1 %v4961_v43 }
 0x340   : > { %v5237_v15 = vadd.f32 %v1168_v63, %v960_v57  ;;  %v1378_v36 = vadd.f32 %v1377_v10, %v4186_v54  ;;  %v1589_v20 = vpop.f32.mrf.mxu0  ;;  %v5243_v24 = vpop.f32.mrf.mxu1  ;;  %v963_v57 = vadd.f32 %v6613_v21, %v4808_v38  ;;  %v1031_v63 = vadd.f32 %v4268_v25, %v822_v58  ;;  %v6615_v58 = vld [vmem:[#allocation65_spill] sm:$0xff]  ;;  %v6616_v21 = vld [vmem:[#allocation72_spill] sm:$0xff] }
 0x342   : > { %v5241_v5 = vadd.f32 %v1586_v30, %v1378_v36  ;;  %v2059_v36 = vmax.f32 %v4271_v6, 0.0  ;;  %v2058_v31 = vmax.f32 %v1031_v63, 0.0 }
 0x343   : > { %2524 = vmatmul.f32.gmra.mxu0 %v2056_v55 }
 0x344   : > { %1862 = vmatmul.f32.gmra.mxu2 %v6612_v16  ;;  %2315 = vmatmul.f32.gmra.mxu3 %v2055_v23  ;;  %v6614_v16 = vld [vmem:[#allocation58_spill] sm:$0xff] }
 0x345   : > { %v825_v25 = vadd.f32 %v6614_v16, %v4808_v38 }
 0x347   : > { %v1171_v11 = vpop.f32.mrf.mxu2  ;;  %v1380_v61 = vpop.f32.mrf.mxu3  ;;  %1809 = vmatmul.f32.gmra.mxu1 %v4981_v0 }
 0x348   : > { %v5252_v30 = vadd.f32 %v1171_v11, %v963_v57  ;;  %v1381_v55 = vadd.f32 %v1380_v61, %v4186_v54  ;;  %v1592_v10 = vpop.f32.mrf.mxu0  ;;  %v5258_v23 = vpop.f32.mrf.mxu1  ;;  %v966_v57 = vadd.f32 %v6616_v21, %v4808_v38  ;;  %v1034_v11 = vadd.f32 %v4289_v2, %v825_v25  ;;  %v6618_v25 = vld [vmem:[#allocation70_spill] sm:$0xff]  ;;  %v2271_v21 = vld [vmem:[%s6118_s6 + $0x108] sm:$0xff] }
 0x349   : > { %2722 = vmatpush.msra.mxu1 %v2271_v21 }
 0x34a   : > { %v5256_v47 = vadd.f32 %v1589_v20, %v1381_v55  ;;  %v2061_v16 = vmax.f32 %v1034_v11, 0.0 }
 0x34b   : > { %2527 = vmatmul.f32.gmra.mxu0 %v2059_v36  ;;  %v2062_v36 = vmax.f32 %v4292_v40, 0.0 }
 0x34c   : > { %1865 = vmatmul.f32.gmra.mxu2 %v6615_v58  ;;  %2318 = vmatmul.f32.gmra.mxu3 %v2058_v31  ;;  %v6617_v58 = vld [vmem:[#allocation63_spill] sm:$0xff] }
 0x34d   : > { %v828_v2 = vadd.f32 %v6617_v58, %v4808_v38 }
 0x34f   : > { %v1174_v6 = vpop.f32.mrf.mxu2  ;;  %v1383_v63 = vpop.f32.mrf.mxu3  ;;  %1812 = vmatmul.f32.gmra.mxu1 %v5004_v35  ;;  %v2068_v35 = vmax.f32 %v4322_v56, 0.0 }
 0x350   : > { %v5267_v20 = vadd.f32 %v1174_v6, %v966_v57  ;;  %v1384_v61 = vadd.f32 %v1383_v63, %v4186_v54  ;;  %v1595_v55 = vpop.f32.mrf.mxu0  ;;  %v5273_v31 = vpop.f32.mrf.mxu1  ;;  %v6619_v57 = vld [vmem:[#allocation77_spill] sm:$0xff] }
 0x351   : > { %v969_v40 = vadd.f32 %v6619_v57, %v4808_v38  ;;  %v6621_v57 = vld [vmem:[#allocation68_spill] sm:$0xff] }
 0x352   : > { %v5271_v43 = vadd.f32 %v1592_v10, %v1384_v61  ;;  %v1037_v10 = vadd.f32 %v4304_v41, %v828_v2  ;;  %v831_v41 = vadd.f32 %v6621_v57, %v4808_v38  ;;  %v6622_v2 = vld [vmem:[#allocation75_spill] sm:$0xff] }
 0x353   : > { %2530 = vmatmul.f32.gmra.mxu0 %v2062_v36 }
 0x354   : > { %1868 = vmatmul.f32.gmra.mxu2 %v6618_v25  ;;  %2321 = vmatmul.f32.gmra.mxu3 %v2061_v16  ;;  %v2065_v16 = vmax.f32 %v4307_v49, 0.0  ;;  %v2064_v58 = vmax.f32 %v1037_v10, 0.0 }
 0x357   : > { %v1177_v11 = vpop.f32.mrf.mxu2  ;;  %v1386_v6 = vpop.f32.mrf.mxu3  ;;  %1815 = vmatmul.f32.gmra.mxu1 %v5030_v7 }
 0x358   : > { %v5285_v63 = vadd.f32 %v1177_v11, %v969_v40  ;;  %v1387_v61 = vadd.f32 %v1386_v6, %v4186_v54  ;;  %v1598_v36 = vpop.f32.mrf.mxu0  ;;  %v5291_v21 = vpop.f32.mrf.mxu1  ;;  %v6623_v40 = vld [vmem:[#allocation82_spill] sm:$0xff]  ;;  %v1040_v6 = vadd.f32 %v4319_v32, %v831_v41  ;;  %v6626_v41 = vld [vmem:[#allocation80_spill] sm:$0xff] }
 0x359   : > { %6620 = vst [vmem:[#allocation127_spill] sm:$0xff] %v5291_v21  ;;  %v972_v11 = vadd.f32 %v6623_v40, %v4808_v38  ;;  %v6627_v40 = vld [vmem:[#allocation87_spill] sm:$0xff] }
 0x35a   : > { %v5289_v25 = vadd.f32 %v1595_v55, %v1387_v61  ;;  %v2067_v57 = vmax.f32 %v1040_v6, 0.0 }
 0x35b   : > { %2533 = vmatmul.f32.gmra.mxu0 %v2065_v16 }
 0x35c   : > { %1871 = vmatmul.f32.gmra.mxu2 %v6622_v2  ;;  %2324 = vmatmul.f32.gmra.mxu3 %v2064_v58  ;;  %v6625_v2 = vld [vmem:[#allocation73_spill] sm:$0xff] }
 0x35d   : > { %v834_v32 = vadd.f32 %v6625_v2, %v4808_v38 }
 0x35f   : > { %v1180_v49 = vpop.f32.mrf.mxu2  ;;  %v1389_v10 = vpop.f32.mrf.mxu3  ;;  %1818 = vmatmul.f32.gmra.mxu1 %v5053_v28 }
 0x360   : > { %v5300_v55 = vadd.f32 %v1180_v49, %v972_v11  ;;  %v1390_v61 = vadd.f32 %v1389_v10, %v4186_v54  ;;  %v1601_v16 = vpop.f32.mrf.mxu0  ;;  %v5306_v58 = vpop.f32.mrf.mxu1  ;;  %v975_v11 = vadd.f32 %v6627_v40, %v4808_v38  ;;  %v1043_v49 = vadd.f32 %v4340_v52, %v834_v32  ;;  %v6630_v32 = vld [vmem:[#allocation85_spill] sm:$0xff]  ;;  %v6631_v40 = vld [vmem:[#allocation92_spill] sm:$0xff] }
 0x361   : > { %6624 = vst [vmem:[#allocation39_spill] sm:$0xff] %v5306_v58 }
 0x362   : > { %v5304_v0 = vadd.f32 %v1598_v36, %v1390_v61  ;;  %v2071_v61 = vmax.f32 %v4343_v53, 0.0  ;;  %v2070_v2 = vmax.f32 %v1043_v49, 0.0 }
 0x363   : > { %2536 = vmatmul.f32.gmra.mxu0 %v2068_v35 }
 0x364   : > { %1874 = vmatmul.f32.gmra.mxu2 %v6626_v41  ;;  %2327 = vmatmul.f32.gmra.mxu3 %v2067_v57  ;;  %v6629_v41 = vld [vmem:[#allocation78_spill] sm:$0xff] }
 0x365   : > { %v837_v52 = vadd.f32 %v6629_v41, %v4808_v38 }
 0x367   : > { %v1183_v56 = vpop.f32.mrf.mxu2  ;;  %v1392_v6 = vpop.f32.mrf.mxu3  ;;  %1821 = vmatmul.f32.gmra.mxu1 %v5073_v9 }
 0x368   : > { %v5315_v36 = vadd.f32 %v1183_v56, %v975_v11  ;;  %v1393_v35 = vadd.f32 %v1392_v6, %v4186_v54  ;;  %v1604_v10 = vpop.f32.mrf.mxu0  ;;  %v5321_v57 = vpop.f32.mrf.mxu1  ;;  %v978_v11 = vadd.f32 %v6631_v40, %v4808_v38  ;;  %v1046_v56 = vadd.f32 %v4361_v37, %v837_v52  ;;  %v6634_v52 = vld [vmem:[#allocation90_spill] sm:$0xff] }
 0x369   : > { %6628 = vst [vmem:[#allocation45_spill] sm:$0xff] %v5321_v57  ;;  %v2270_v40 = vld [vmem:[%s6118_s6 + $0x100] sm:$0xff] }
 0x36a   : > { %v5319_v7 = vadd.f32 %v1601_v16, %v1393_v35  ;;  %v2073_v41 = vmax.f32 %v1046_v56, 0.0  ;;  %2723 = vmatpush.msra.mxu1 %v2270_v40 }
 0x36b   : > { %2539 = vmatmul.f32.gmra.mxu0 %v2071_v61  ;;  %v2074_v61 = vmax.f32 %v4364_v12, 0.0 }
 0x36c   : > { %1877 = vmatmul.f32.gmra.mxu2 %v6630_v32  ;;  %2330 = vmatmul.f32.gmra.mxu3 %v2070_v2  ;;  %v6633_v32 = vld [vmem:[#allocation83_spill] sm:$0xff] }
 0x36d   : > { %v840_v37 = vadd.f32 %v6633_v32, %v4808_v38 }
 0x36f   : > { %v1186_v53 = vpop.f32.mrf.mxu2  ;;  %v1395_v49 = vpop.f32.mrf.mxu3  ;;  %1824 = vmatmul.f32.gmra.mxu1 %v5117_v50  ;;  %v2080_v50 = vmax.f32 %v4394_v27, 0.0 }
 0x370   : > { %v5330_v16 = vadd.f32 %v1186_v53, %v978_v11  ;;  %v1396_v6 = vadd.f32 %v1395_v49, %v4186_v54  ;;  %v1607_v35 = vpop.f32.mrf.mxu0  ;;  %v5336_v2 = vpop.f32.mrf.mxu1  ;;  %v6635_v11 = vld [vmem:[#allocation97_spill] sm:$0xff] }
 0x371   : > { %6632 = vst [vmem:[#allocation52_spill] sm:$0xff] %v5336_v2  ;;  %v981_v12 = vadd.f32 %v6635_v11, %v4808_v38  ;;  %v6637_v11 = vld [vmem:[#allocation88_spill] sm:$0xff] }
 0x372   : > { %v5334_v28 = vadd.f32 %v1604_v10, %v1396_v6  ;;  %v1049_v10 = vadd.f32 %v4376_v62, %v840_v37  ;;  %v843_v62 = vadd.f32 %v6637_v11, %v4808_v38  ;;  %v6638_v37 = vld [vmem:[#allocation95_spill] sm:$0xff] }
 0x373   : > { %2542 = vmatmul.f32.gmra.mxu0 %v2074_v61 }
 0x374   : > { %1880 = vmatmul.f32.gmra.mxu2 %v6634_v52  ;;  %2333 = vmatmul.f32.gmra.mxu3 %v2073_v41  ;;  %v2077_v41 = vmax.f32 %v4379_v22, 0.0  ;;  %v2076_v32 = vmax.f32 %v1049_v10, 0.0 }
 0x377   : > { %v1189_v56 = vpop.f32.mrf.mxu2  ;;  %v1398_v53 = vpop.f32.mrf.mxu3  ;;  %1827 = vmatmul.f32.gmra.mxu1 %v5137_v45 }
 0x378   : > { %v5348_v49 = vadd.f32 %v1189_v56, %v981_v12  ;;  %v1399_v6 = vadd.f32 %v1398_v53, %v4186_v54  ;;  %v1610_v61 = vpop.f32.mrf.mxu0  ;;  %v5354_v40 = vpop.f32.mrf.mxu1  ;;  %v6639_v12 = vld [vmem:[#allocation102_spill] sm:$0xff]  ;;  %v1052_v53 = vadd.f32 %v4391_v39, %v843_v62  ;;  %v6644_v62 = vld [vmem:[#allocation100_spill] sm:$0xff] }
 0x379   : > { %6636 = vst [vmem:[#allocation43_spill] sm:$0xff] %v5354_v40  ;;  %v984_v56 = vadd.f32 %v6639_v12, %v4808_v38  ;;  %v6645_v12 = vld [vmem:[#allocation107_spill] sm:$0xff] }
 0x37a   : > { %v5352_v52 = vadd.f32 %v1607_v35, %v1399_v6  ;;  %v2079_v11 = vmax.f32 %v1052_v53, 0.0 }
 0x37b   : > { %2545 = vmatmul.f32.gmra.mxu0 %v2077_v41 }
 0x37c   : > { %1883 = vmatmul.f32.gmra.mxu2 %v6638_v37  ;;  %2336 = vmatmul.f32.gmra.mxu3 %v2076_v32  ;;  %v6643_v37 = vld [vmem:[#allocation93_spill] sm:$0xff] }
 0x37d   : > { %v846_v39 = vadd.f32 %v6643_v37, %v4808_v38 }
 0x37f   : > { %v1192_v22 = vpop.f32.mrf.mxu2  ;;  %v1401_v10 = vpop.f32.mrf.mxu3  ;;  %1830 = vmatmul.f32.gmra.mxu1 %v5160_v60 }
 0x380   : > { %v5363_v35 = vadd.f32 %v1192_v22, %v984_v56  ;;  %v1402_v6 = vadd.f32 %v1401_v10, %v4186_v54  ;;  %v1613_v41 = vpop.f32.mrf.mxu0  ;;  %v5369_v32 = vpop.f32.mrf.mxu1  ;;  %v987_v56 = vadd.f32 %v6645_v12, %v4808_v38  ;;  %v1055_v22 = vadd.f32 %v4412_v4, %v846_v39  ;;  %v6650_v39 = vld [vmem:[#allocation105_spill] sm:$0xff]  ;;  %v6651_v12 = vld [vmem:[#allocation112_spill] sm:$0xff] }
 0x381   : > { %6642 = vst [vmem:[#allocation48_spill] sm:$0xff] %v5369_v32  ;;  %v6679_v32 = vld [vmem:[#allocation126_spill] sm:$0xff] }
 0x382   : > { %6640 = vst [vmem:[#allocation50_spill] sm:$0xff] %v5363_v35  ;;  %v5367_v9 = vadd.f32 %v1610_v61, %v1402_v6  ;;  %v2083_v6 = vmax.f32 %v4415_v26, 0.0  ;;  %v2082_v37 = vmax.f32 %v1055_v22, 0.0 }
 0x383   : > { %2548 = vmatmul.f32.gmra.mxu0 %v2080_v50 }
 0x384   : > { %6641 = vst [vmem:[#allocation57_spill] sm:$0xff] %v5367_v9  ;;  %1886 = vmatmul.f32.gmra.mxu2 %v6644_v62  ;;  %2339 = vmatmul.f32.gmra.mxu3 %v2079_v11  ;;  %v6649_v62 = vld [vmem:[#allocation98_spill] sm:$0xff] }
 0x385   : > { %v849_v4 = vadd.f32 %v6649_v62, %v4808_v38 }
 0x387   : > { %v1195_v27 = vpop.f32.mrf.mxu2  ;;  %v1404_v53 = vpop.f32.mrf.mxu3  ;;  %1833 = vmatmul.f32.gmra.mxu1 %v5182_v46 }
 0x388   : > { %v5378_v61 = vadd.f32 %v1195_v27, %v987_v56  ;;  %v1405_v50 = vadd.f32 %v1404_v53, %v4186_v54  ;;  %v1616_v10 = vpop.f32.mrf.mxu0  ;;  %v5384_v11 = vpop.f32.mrf.mxu1  ;;  %v990_v56 = vadd.f32 %v6651_v12, %v4808_v38  ;;  %v1058_v27 = vadd.f32 %v4433_v18, %v849_v4  ;;  %v6656_v4 = vld [vmem:[#allocation110_spill] sm:$0xff]  ;;  %v6657_v12 = vld [vmem:[#allocation116_spill] sm:$0xff] }
 0x389   : > { %6648 = vst [vmem:[#allocation53_spill] sm:$0xff] %v5384_v11 }
 0x38a   : > { %6646 = vst [vmem:[#allocation55_spill] sm:$0xff] %v5378_v61  ;;  %v5382_v45 = vadd.f32 %v1613_v41, %v1405_v50  ;;  %v2085_v62 = vmax.f32 %v1058_v27, 0.0 }
 0x38b   : > { %2551 = vmatmul.f32.gmra.mxu0 %v2083_v6  ;;  %v2086_v6 = vmax.f32 %v4436_v3, 0.0 }
 0x38c   : > { %6647 = vst [vmem:[#allocation62_spill] sm:$0xff] %v5382_v45  ;;  %1889 = vmatmul.f32.gmra.mxu2 %v6650_v39  ;;  %2342 = vmatmul.f32.gmra.mxu3 %v2082_v37  ;;  %v6655_v39 = vld [vmem:[#allocation103_spill] sm:$0xff] }
 0x38d   : > { %v852_v18 = vadd.f32 %v6655_v39, %v4808_v38 }
 0x38f   : > { %v1198_v26 = vpop.f32.mrf.mxu2  ;;  %v1407_v22 = vpop.f32.mrf.mxu3 }
 0x390   : > { %v5393_v41 = vadd.f32 %v1198_v26, %v990_v56  ;;  %v1408_v53 = vadd.f32 %v1407_v22, %v4186_v54  ;;  %v1619_v50 = vpop.f32.mrf.mxu0  ;;  %v5399_v37 = vpop.f32.mrf.mxu1  ;;  %v993_v56 = vadd.f32 %v6657_v12, %v4808_v38  ;;  %v1061_v26 = vadd.f32 %v4448_v44, %v852_v18  ;;  %v6663_v18 = vld [vmem:[#allocation120_spill] sm:$0xff] }
 0x391   : > { %6654 = vst [vmem:[#allocation58_spill] sm:$0xff] %v5399_v37  ;;  %v996_v12 = vadd.f32 %v6663_v18, %v4808_v38  ;;  %v6669_v18 = vld [vmem:[#allocation160_spill] sm:$0xff] }
 0x392   : > { %6652 = vst [vmem:[#allocation60_spill] sm:$0xff] %v5393_v41  ;;  %v5397_v60 = vadd.f32 %v1616_v10, %v1408_v53  ;;  %v2089_v53 = vmax.f32 %v4451_v17, 0.0 }
 0x393   : > { %2554 = vmatmul.f32.gmra.mxu0 %v2086_v6  ;;  %v2088_v6 = vmax.f32 %v1061_v26, 0.0 }
 0x394   : > { %6653 = vst [vmem:[#allocation67_spill] sm:$0xff] %v5397_v60  ;;  %1892 = vmatmul.f32.gmra.mxu2 %v6656_v4  ;;  %2345 = vmatmul.f32.gmra.mxu3 %v2085_v62  ;;  %v6660_v62 = vld [vmem:[#allocation108_spill] sm:$0xff]  ;;  %v6661_v4 = vld [vmem:[#allocation114_spill] sm:$0xff] }
 0x395   : > { %v855_v39 = vadd.f32 %v6660_v62, %v4808_v38 }
 0x397   : > { %v1201_v22 = vpop.f32.mrf.mxu2  ;;  %v1410_v46 = vpop.f32.mrf.mxu3 }
 0x398   : > { %v5407_v3 = vadd.f32 %v1201_v22, %v993_v56  ;;  %v1411_v10 = vadd.f32 %v1410_v46, %v4186_v54  ;;  %v1622_v27 = vpop.f32.mrf.mxu0  ;;  %v5416_v44 = vpop.f32.mrf.mxu1  ;;  %v1064_v46 = vadd.f32 %v4459_v48, %v855_v39  ;;  %v6668_v48 = vld [vmem:[#allocation124_spill] sm:$0xff] }
 0x399   : > { %6662 = vst [vmem:[#allocation63_spill] sm:$0xff] %v5416_v44  ;;  %v6667_v44 = vld [vmem:[#allocation118_spill] sm:$0xff]  ;;  %v999_v39 = vadd.f32 %v6668_v48, %v4808_v38 }
 0x39a   : > { %6658 = vst [vmem:[#allocation65_spill] sm:$0xff] %v5407_v3  ;;  %v5411_v37 = vadd.f32 %v1619_v50, %v1411_v10  ;;  %v2092_v10 = vmax.f32 %v4466_v29, 0.0 }
 0x39b   : > { %2557 = vmatmul.f32.gmra.mxu0 %v2089_v53  ;;  %v2091_v53 = vmax.f32 %v1064_v46, 0.0 }
 0x39c   : > { %6659 = vst [vmem:[#allocation72_spill] sm:$0xff] %v5411_v37  ;;  %1895 = vmatmul.f32.gmra.mxu2 %v6661_v4  ;;  %2348 = vmatmul.f32.gmra.mxu3 %v2088_v6  ;;  %v6666_v6 = vld [vmem:[#allocation113_spill] sm:$0xff] }
 0x39d   : > { %v858_v4 = vadd.f32 %v6666_v6, %v4808_v38 }
 0x39f   : > { %v1204_v56 = vpop.f32.mrf.mxu2  ;;  %v1413_v22 = vpop.f32.mrf.mxu3 }
 0x3a0   : > { %v5421_v17 = vadd.f32 %v1204_v56, %v996_v12  ;;  %v1414_v50 = vadd.f32 %v1413_v22, %v4186_v54  ;;  %v1625_v26 = vpop.f32.mrf.mxu0  ;;  %v1067_v12 = vadd.f32 %v6669_v18, %v858_v4  ;;  %v5433_v56 = vpop.f32.mrf.mxu1  ;;  %v6674_v4 = vld [vmem:[#allocation117_spill] sm:$0xff] }
 0x3a1   : > { %6670 = vst [vmem:[#allocation68_spill] sm:$0xff] %v5433_v56  ;;  %v861_v18 = vadd.f32 %v6674_v4, %v4808_v38 }
 0x3a2   : > { %6664 = vst [vmem:[#allocation70_spill] sm:$0xff] %v5421_v17  ;;  %v5425_v62 = vadd.f32 %v1622_v27, %v1414_v50  ;;  %v6672_v50 = vld [vmem:[#allocation162_spill] sm:$0xff]  ;;  %v2094_v6 = vmax.f32 %v1067_v12, 0.0 }
 0x3a3   : > { %2560 = vmatmul.f32.gmra.mxu0 %v2092_v10  ;;  %v2095_v10 = vmax.f32 %v6672_v50, 0.0 }
 0x3a4   : > { %6665 = vst [vmem:[#allocation77_spill] sm:$0xff] %v5425_v62  ;;  %1898 = vmatmul.f32.gmra.mxu2 %v6667_v44  ;;  %2351 = vmatmul.f32.gmra.mxu3 %v2091_v53  ;;  %v3201_v44 = vld [vmem:[%s6117_s5] sm:$0x7] }
 0x3a5   : > { %v5442_v53 = vperm.slane %v3201_v44, 2 }
 0x3a7   : > { %v1207_v22 = vpop.f32.mrf.mxu2  ;;  %v1416_v11 = vpop.f32.mrf.mxu3 }
 0x3a8   : > { %v5435_v29 = vadd.f32 %v1207_v22, %v999_v39  ;;  %v1417_v27 = vadd.f32 %v1416_v11, %v4186_v54  ;;  %v2516_v46 = vpop.f32.mrf.mxu0  ;;  %v6675_v39 = vld [vmem:[#allocation122_spill] sm:$0xff]  ;;  %v6676_v11 = vld [vmem:[#allocation152_spill] sm:$0xff]  ;;  %v1070_v22 = vadd.f32 %v4507_v1, %v861_v18  ;;  %v5458_v4 = vpop.f32.mrf.mxu1 }
 0x3a9   : > { %v5452_v54 = vld [vmem:[%s6119_s7] ss:$0 sm:$0xff]  ;;  %v1646_v12 = vadd.f32 %v6676_v11, %v5442_v53  ;;  %6677 = vst [vmem:[#allocation73_spill] sm:$0xff] %v5458_v4 }
 0x3aa   : > { %6671 = vst [vmem:[#allocation75_spill] sm:$0xff] %v5435_v29  ;;  %v5444_v48 = vadd.f32 %v1625_v26, %v1417_v27  ;;  %v6680_v1 = vld [vmem:[#allocation154_spill] sm:$0xff] }
 0x3ab   : > { %2563 = vmatmul.f32.gmra.mxu0 %v2095_v10  ;;  %v1649_v18 = vadd.f32 %v6680_v1, %v5442_v53  ;;  %v6685_v1 = vld [vmem:[#allocation129_spill] sm:$0xff] }
 0x3ac   : > { %6673 = vst [vmem:[#allocation82_spill] sm:$0xff] %v5444_v48  ;;  %1901 = vmatmul.f32.gmra.mxu2 %v6675_v39  ;;  %2354 = vmatmul.f32.gmra.mxu3 %v2094_v6  ;;  %v2098_v6 = vmax.f32 %v4514_v13, 0.0  ;;  %v2097_v39 = vmax.f32 %v1070_v22, 0.0  ;;  %v6678_v48 = vld [vmem:[#allocation121_spill] sm:$0xff] }
 0x3ad   : > { %v864_v11 = vadd.f32 %v6678_v48, %v4808_v38 }
 0x3af   : > { %v1854_v50 = vpop.f32.mrf.mxu2  ;;  %v2307_v26 = vpop.f32.mrf.mxu3 }
 0x3b0   : > { %v1855_v27 = vadd.f32 %v1854_v50, %v1646_v12  ;;  %v2308_v10 = vadd.f32 %v5452_v54, %v2307_v26  ;;  %v2519_v44 = vpop.f32.mrf.mxu0  ;;  %v6681_v12 = vld [vmem:[#allocation168_spill] sm:$0xff]  ;;  %v5471_v48 = vpop.f32.mrf.mxu1 }
 0x3b1   : > { %v1073_v50 = vadd.f32 %v6681_v12, %v864_v11  ;;  %6683 = vst [vmem:[#allocation80_spill] sm:$0xff] %v5471_v48  ;;  %v6686_v11 = vld [vmem:[#allocation156_spill] sm:$0xff] }
 0x3b2   : > { %v2048_v56 = vmax.f32 %v1855_v27, 0.0  ;;  %v5461_v29 = vadd.f32 %v2516_v46, %v2308_v10  ;;  %v6682_v27 = vld [vmem:[#allocation170_spill] sm:$0xff] }
 0x3b3   : > { %2566 = vmatmul.f32.gmra.mxu0 %v2098_v6  ;;  %v2101_v10 = vmax.f32 %v6682_v27, 0.0  ;;  %v2100_v6 = vmax.f32 %v1073_v50, 0.0 }
 0x3b4   : > { %1904 = vmatmul.f32.gmra.mxu2 %v6679_v32  ;;  %2357 = vmatmul.f32.gmra.mxu3 %v2097_v39 }
 0x3b5   : > { %2724 = vmatmul.f32.vlgmr.msra.gmra.mxu1 %v2048_v56  ;;  %v6684_v56 = vld [vmem:[#allocation125_spill] sm:$0xff] }
 0x3b6   : > { %v867_v39 = vadd.f32 %v6684_v56, %v4808_v38 }
 0x3b7   : > { %v1857_v26 = vpop.f32.mrf.mxu2  ;;  %v2310_v4 = vpop.f32.mrf.mxu3 }
 0x3b8   : > { %v1858_v13 = vadd.f32 %v1857_v26, %v1649_v18  ;;  %v2311_v22 = vadd.f32 %v5452_v54, %v2310_v4  ;;  %v2522_v46 = vpop.f32.mrf.mxu0  ;;  %v1652_v4 = vadd.f32 %v6686_v11, %v5442_v53  ;;  %v6687_v18 = vld [vmem:[#allocation173_spill] sm:$0xff]  ;;  %v6692_v11 = vld [vmem:[#allocation158_spill] sm:$0xff] }
 0x3b9   : > { %v1076_v12 = vadd.f32 %v6687_v18, %v867_v39  ;;  %v5488_v39 = vpop.f32.mrf.mxu1  ;;  %v6693_v18 = vld [vmem:[#allocation178_spill] sm:$0xff] }
 0x3ba   : > { %v2051_v17 = vmax.f32 %v1858_v13, 0.0  ;;  %v5473_v32 = vadd.f32 %v2519_v44, %v2311_v22  ;;  %v6688_v22 = vld [vmem:[#allocation175_spill] sm:$0xff]  ;;  %6691 = vst [vmem:[#allocation87_spill] sm:$0xff] %v5488_v39  ;;  %v6696_v39 = vld [vmem:[#allocation133_spill] sm:$0xff] }
 0x3bb   : > { %2569 = vmatmul.f32.gmra.mxu0 %v2101_v10  ;;  %v2104_v10 = vmax.f32 %v6688_v22, 0.0  ;;  %v2103_v48 = vmax.f32 %v1076_v12, 0.0  ;;  %v6694_v22 = vld [vmem:[#allocation180_spill] sm:$0xff] }
 0x3bc   : > { %1907 = vmatmul.f32.gmra.mxu2 %v6685_v1  ;;  %2360 = vmatmul.f32.gmra.mxu3 %v2100_v6  ;;  %v6690_v1 = vld [vmem:[#allocation131_spill] sm:$0xff] }
 0x3bd   : > { %2727 = vmatmul.f32.gmra.mxu1 %v2051_v17  ;;  %v6689_v17 = vld [vmem:[#allocation128_spill] sm:$0xff] }
 0x3be   : > { %v870_v6 = vadd.f32 %v6689_v17, %v4808_v38 }
 0x3bf   : > { %v1860_v26 = vpop.f32.mrf.mxu2  ;;  %v2313_v50 = vpop.f32.mrf.mxu3 }
 0x3c0   : > { %v1861_v13 = vadd.f32 %v1860_v26, %v1652_v4  ;;  %v2314_v27 = vadd.f32 %v5452_v54, %v2313_v50  ;;  %v2525_v44 = vpop.f32.mrf.mxu0  ;;  %v1655_v4 = vadd.f32 %v6692_v11, %v5442_v53  ;;  %v1079_v26 = vadd.f32 %v6693_v18, %v870_v6  ;;  %v6697_v6 = vld [vmem:[#allocation163_spill] sm:$0xff] }
 0x3c1   : > { %v1658_v11 = vadd.f32 %v6697_v6, %v5442_v53  ;;  %v6702_v6 = vld [vmem:[#allocation135_spill] sm:$0xff] }
 0x3c2   : > { %v2054_v62 = vmax.f32 %v1861_v13, 0.0  ;;  %v5483_v56 = vadd.f32 %v2522_v46, %v2314_v27  ;;  %v2106_v17 = vmax.f32 %v1079_v26, 0.0 }
 0x3c3   : > { %2572 = vmatmul.f32.gmra.mxu0 %v2104_v10  ;;  %v2107_v10 = vmax.f32 %v6694_v22, 0.0  ;;  %v6700_v22 = vld [vmem:[#allocation185_spill] sm:$0xff] }
 0x3c4   : > { %1910 = vmatmul.f32.gmra.mxu2 %v6690_v1  ;;  %2363 = vmatmul.f32.gmra.mxu3 %v2103_v48 }
 0x3c5   : > { %2730 = vmatmul.f32.gmra.mxu1 %v2054_v62  ;;  %v6695_v62 = vld [vmem:[#allocation130_spill] sm:$0xff] }
 0x3c6   : > { %v873_v48 = vadd.f32 %v6695_v62, %v4808_v38 }
 0x3c7   : > { %v1863_v50 = vpop.f32.mrf.mxu2  ;;  %v2316_v12 = vpop.f32.mrf.mxu3 }
 0x3c8   : > { %v1864_v13 = vadd.f32 %v1863_v50, %v1655_v4  ;;  %v2317_v46 = vadd.f32 %v5452_v54, %v2316_v12  ;;  %v2528_v27 = vpop.f32.mrf.mxu0  ;;  %v6698_v4 = vld [vmem:[#allocation183_spill] sm:$0xff]  ;;  %v5503_v50 = vpop.f32.mrf.mxu1 }
 0x3c9   : > { %v1082_v18 = vadd.f32 %v6698_v4, %v873_v48  ;;  %6699 = vst [vmem:[#allocation78_spill] sm:$0xff] %v5503_v50  ;;  %v6703_v48 = vld [vmem:[#allocation166_spill] sm:$0xff]  ;;  %v6704_v4 = vld [vmem:[#allocation188_spill] sm:$0xff] }
 0x3ca   : > { %v2057_v40 = vmax.f32 %v1864_v13, 0.0  ;;  %v5495_v1 = vadd.f32 %v2525_v44, %v2317_v46 }
 0x3cb   : > { %2575 = vmatmul.f32.gmra.mxu0 %v2107_v10  ;;  %v2110_v10 = vmax.f32 %v6700_v22, 0.0  ;;  %v2109_v62 = vmax.f32 %v1082_v18, 0.0 }
 0x3cc   : > { %1913 = vmatmul.f32.gmra.mxu2 %v6696_v39  ;;  %2366 = vmatmul.f32.gmra.mxu3 %v2106_v17 }
 0x3cd   : > { %2733 = vmatmul.f32.gmra.mxu1 %v2057_v40  ;;  %v6701_v40 = vld [vmem:[#allocation132_spill] sm:$0xff] }
 0x3ce   : > { %v876_v17 = vadd.f32 %v6701_v40, %v4808_v38 }
 0x3cf   : > { %v1866_v12 = vpop.f32.mrf.mxu2  ;;  %v2319_v26 = vpop.f32.mrf.mxu3 }
 0x3d0   : > { %v1867_v13 = vadd.f32 %v1866_v12, %v1658_v11  ;;  %v2320_v44 = vadd.f32 %v5452_v54, %v2319_v26  ;;  %v2531_v46 = vpop.f32.mrf.mxu0  ;;  %v1661_v11 = vadd.f32 %v6703_v48, %v5442_v53  ;;  %v1085_v12 = vadd.f32 %v6704_v4, %v876_v17  ;;  %v6708_v48 = vld [vmem:[#allocation137_spill] sm:$0xff]  ;;  %v6709_v17 = vld [vmem:[#allocation171_spill] sm:$0xff] }
 0x3d2   : > { %v2060_v3 = vmax.f32 %v1867_v13, 0.0  ;;  %v5507_v39 = vadd.f32 %v2528_v27, %v2320_v44  ;;  %v5516_v13 = vpop.f32.mrf.mxu1  ;;  %v6706_v44 = vld [vmem:[#allocation190_spill] sm:$0xff]  ;;  %v2112_v40 = vmax.f32 %v1085_v12, 0.0 }
 0x3d3   : > { %2578 = vmatmul.f32.gmra.mxu0 %v2110_v10  ;;  %6705 = vst [vmem:[#allocation85_spill] sm:$0xff] %v5516_v13  ;;  %v2113_v10 = vmax.f32 %v6706_v44, 0.0 }
 0x3d4   : > { %1916 = vmatmul.f32.gmra.mxu2 %v6702_v6  ;;  %2369 = vmatmul.f32.gmra.mxu3 %v2109_v62 }
 0x3d5   : > { %2736 = vmatmul.f32.gmra.mxu1 %v2060_v3  ;;  %v6707_v3 = vld [vmem:[#allocation134_spill] sm:$0xff] }
 0x3d6   : > { %v879_v62 = vadd.f32 %v6707_v3, %v4808_v38 }
 0x3d7   : > { %v1869_v26 = vpop.f32.mrf.mxu2  ;;  %v2322_v50 = vpop.f32.mrf.mxu3 }
 0x3d8   : > { %v1870_v22 = vadd.f32 %v1869_v26, %v1661_v11  ;;  %v2323_v18 = vadd.f32 %v5452_v54, %v2322_v50  ;;  %v2534_v27 = vpop.f32.mrf.mxu0  ;;  %v1664_v50 = vadd.f32 %v6709_v17, %v5442_v53  ;;  %v6710_v11 = vld [vmem:[#allocation193_spill] sm:$0xff]  ;;  %v6714_v17 = vld [vmem:[#allocation139_spill] sm:$0xff] }
 0x3d9   : > { %v1088_v4 = vadd.f32 %v6710_v11, %v879_v62  ;;  %v6715_v62 = vld [vmem:[#allocation176_spill] sm:$0xff] }
 0x3da   : > { %v2063_v37 = vmax.f32 %v1870_v22, 0.0  ;;  %v5519_v6 = vadd.f32 %v2531_v46, %v2323_v18  ;;  %v6711_v22 = vld [vmem:[#allocation194_spill] sm:$0xff]  ;;  %v5529_v3 = vpop.f32.mrf.mxu1 }
 0x3db   : > { %2581 = vmatmul.f32.gmra.mxu0 %v2113_v10  ;;  %v2116_v18 = vmax.f32 %v6711_v22, 0.0  ;;  %v2115_v10 = vmax.f32 %v1088_v4, 0.0  ;;  %6712 = vst [vmem:[#allocation92_spill] sm:$0xff] %v5529_v3 }
 0x3dc   : > { %1919 = vmatmul.f32.gmra.mxu2 %v6708_v48  ;;  %2372 = vmatmul.f32.gmra.mxu3 %v2112_v40 }
 0x3dd   : > { %2739 = vmatmul.f32.gmra.mxu1 %v2063_v37  ;;  %v6713_v37 = vld [vmem:[#allocation136_spill] sm:$0xff] }
 0x3de   : > { %v882_v40 = vadd.f32 %v6713_v37, %v4808_v38 }
 0x3df   : > { %v1872_v26 = vpop.f32.mrf.mxu2  ;;  %v2325_v13 = vpop.f32.mrf.mxu3 }
 0x3e0   : > { %v1873_v44 = vadd.f32 %v1872_v26, %v1664_v50  ;;  %v2326_v12 = vadd.f32 %v5452_v54, %v2325_v13  ;;  %v2537_v46 = vpop.f32.mrf.mxu0  ;;  %v1667_v13 = vadd.f32 %v6715_v62, %v5442_v53  ;;  %v6716_v50 = vld [vmem:[#allocation197_spill] sm:$0xff] }
 0x3e1   : > { %v1091_v11 = vadd.f32 %v6716_v50, %v882_v40  ;;  %v6721_v62 = vld [vmem:[#allocation181_spill] sm:$0xff] }
 0x3e2   : > { %v2066_v2 = vmax.f32 %v1873_v44, 0.0  ;;  %v5531_v48 = vadd.f32 %v2534_v27, %v2326_v12  ;;  %v6717_v12 = vld [vmem:[#allocation198_spill] sm:$0xff]  ;;  %v5546_v40 = vpop.f32.mrf.mxu1  ;;  %v6722_v50 = vld [vmem:[#allocation201_spill] sm:$0xff] }
 0x3e3   : > { %2584 = vmatmul.f32.gmra.mxu0 %v2116_v18  ;;  %v2119_v18 = vmax.f32 %v6717_v12, 0.0  ;;  %v2118_v3 = vmax.f32 %v1091_v11, 0.0  ;;  %6720 = vst [vmem:[#allocation83_spill] sm:$0xff] %v5546_v40  ;;  %v6723_v12 = vld [vmem:[#allocation202_spill] sm:$0xff]  ;;  %v6725_v40 = vld [vmem:[#allocation143_spill] sm:$0xff] }
 0x3e4   : > { %1922 = vmatmul.f32.gmra.mxu2 %v6714_v17  ;;  %2375 = vmatmul.f32.gmra.mxu3 %v2115_v10  ;;  %v6719_v17 = vld [vmem:[#allocation141_spill] sm:$0xff] }
 0x3e5   : > { %2742 = vmatmul.f32.gmra.mxu1 %v2066_v2  ;;  %v6718_v2 = vld [vmem:[#allocation138_spill] sm:$0xff] }
 0x3e6   : > { %v885_v10 = vadd.f32 %v6718_v2, %v4808_v38 }
 0x3e7   : > { %v1875_v26 = vpop.f32.mrf.mxu2  ;;  %v2328_v4 = vpop.f32.mrf.mxu3 }
 0x3e8   : > { %v1876_v44 = vadd.f32 %v1875_v26, %v1667_v13  ;;  %v2329_v22 = vadd.f32 %v5452_v54, %v2328_v4  ;;  %v2540_v27 = vpop.f32.mrf.mxu0  ;;  %v1670_v13 = vadd.f32 %v6721_v62, %v5442_v53  ;;  %v1094_v26 = vadd.f32 %v6722_v50, %v885_v10  ;;  %v6726_v10 = vld [vmem:[#allocation186_spill] sm:$0xff] }
 0x3e9   : > { %v1673_v62 = vadd.f32 %v6726_v10, %v5442_v53  ;;  %v6731_v10 = vld [vmem:[#allocation145_spill] sm:$0xff] }
 0x3ea   : > { %v2069_v41 = vmax.f32 %v1876_v44, 0.0  ;;  %v5541_v37 = vadd.f32 %v2537_v46, %v2329_v22  ;;  %v2121_v2 = vmax.f32 %v1094_v26, 0.0 }
 0x3eb   : > { %2587 = vmatmul.f32.gmra.mxu0 %v2119_v18  ;;  %v2122_v18 = vmax.f32 %v6723_v12, 0.0  ;;  %v6729_v12 = vld [vmem:[#allocation206_spill] sm:$0xff] }
 0x3ec   : > { %1925 = vmatmul.f32.gmra.mxu2 %v6719_v17  ;;  %2378 = vmatmul.f32.gmra.mxu3 %v2118_v3 }
 0x3ed   : > { %2745 = vmatmul.f32.gmra.mxu1 %v2069_v41  ;;  %v6724_v41 = vld [vmem:[#allocation140_spill] sm:$0xff] }
 0x3ee   : > { %v888_v3 = vadd.f32 %v6724_v41, %v4808_v38 }
 0x3ef   : > { %v1878_v4 = vpop.f32.mrf.mxu2  ;;  %v2331_v11 = vpop.f32.mrf.mxu3 }
 0x3f0   : > { %v1879_v44 = vadd.f32 %v1878_v4, %v1670_v13  ;;  %v2332_v46 = vadd.f32 %v5452_v54, %v2331_v11  ;;  %v2543_v22 = vpop.f32.mrf.mxu0  ;;  %v6727_v13 = vld [vmem:[#allocation205_spill] sm:$0xff]  ;;  %v5561_v4 = vpop.f32.mrf.mxu1 }
 0x3f1   : > { %v1097_v50 = vadd.f32 %v6727_v13, %v888_v3  ;;  %6728 = vst [vmem:[#allocation90_spill] sm:$0xff] %v5561_v4  ;;  %v6732_v3 = vld [vmem:[#allocation191_spill] sm:$0xff]  ;;  %v6733_v13 = vld [vmem:[#allocation209_spill] sm:$0xff] }
 0x3f2   : > { %v2072_v60 = vmax.f32 %v1879_v44, 0.0  ;;  %v5553_v17 = vadd.f32 %v2540_v27, %v2332_v46 }
 0x3f3   : > { %2590 = vmatmul.f32.gmra.mxu0 %v2122_v18  ;;  %v2125_v18 = vmax.f32 %v6729_v12, 0.0  ;;  %v2124_v41 = vmax.f32 %v1097_v50, 0.0 }
 0x3f4   : > { %1928 = vmatmul.f32.gmra.mxu2 %v6725_v40  ;;  %2381 = vmatmul.f32.gmra.mxu3 %v2121_v2 }
 0x3f5   : > { %2748 = vmatmul.f32.gmra.mxu1 %v2072_v60  ;;  %v6730_v60 = vld [vmem:[#allocation142_spill] sm:$0xff] }
 0x3f6   : > { %v891_v2 = vadd.f32 %v6730_v60, %v4808_v38 }
 0x3f7   : > { %v1881_v11 = vpop.f32.mrf.mxu2  ;;  %v2334_v26 = vpop.f32.mrf.mxu3 }
 0x3f8   : > { %v1882_v44 = vadd.f32 %v1881_v11, %v1673_v62  ;;  %v2335_v27 = vadd.f32 %v5452_v54, %v2334_v26  ;;  %v2546_v46 = vpop.f32.mrf.mxu0  ;;  %v1676_v62 = vadd.f32 %v6732_v3, %v5442_v53  ;;  %v1100_v11 = vadd.f32 %v6733_v13, %v891_v2  ;;  %v6737_v3 = vld [vmem:[#allocation147_spill] sm:$0xff] }
 0x3f9   : > { %v6738_v2 = vld [vmem:[#allocation195_spill] sm:$0xff] }
 0x3fa   : > { %v2075_v57 = vmax.f32 %v1882_v44, 0.0  ;;  %v5565_v40 = vadd.f32 %v2543_v22, %v2335_v27  ;;  %v5574_v44 = vpop.f32.mrf.mxu1  ;;  %v6735_v27 = vld [vmem:[#allocation210_spill] sm:$0xff]  ;;  %v2127_v60 = vmax.f32 %v1100_v11, 0.0 }
 0x3fb   : > { %2593 = vmatmul.f32.gmra.mxu0 %v2125_v18  ;;  %6734 = vst [vmem:[#allocation97_spill] sm:$0xff] %v5574_v44  ;;  %v2128_v18 = vmax.f32 %v6735_v27, 0.0 }
 0x3fc   : > { %1931 = vmatmul.f32.gmra.mxu2 %v6731_v10  ;;  %2384 = vmatmul.f32.gmra.mxu3 %v2124_v41 }
 0x3fd   : > { %2751 = vmatmul.f32.gmra.mxu1 %v2075_v57  ;;  %v6736_v57 = vld [vmem:[#allocation144_spill] sm:$0xff] }
 0x3fe   : > { %v894_v41 = vadd.f32 %v6736_v57, %v4808_v38 }
 0x3ff   : > { %v1884_v26 = vpop.f32.mrf.mxu2  ;;  %v2337_v4 = vpop.f32.mrf.mxu3 }
 0x400   : > { %v1885_v12 = vadd.f32 %v1884_v26, %v1676_v62  ;;  %v2338_v50 = vadd.f32 %v5452_v54, %v2337_v4  ;;  %v2549_v22 = vpop.f32.mrf.mxu0  ;;  %v1679_v4 = vadd.f32 %v6738_v2, %v5442_v53  ;;  %v6739_v62 = vld [vmem:[#allocation213_spill] sm:$0xff] }
 0x401   : > { %v1103_v13 = vadd.f32 %v6739_v62, %v894_v41  ;;  %v6743_v2 = vld [vmem:[#allocation149_spill] sm:$0xff]  ;;  %v6744_v41 = vld [vmem:[#allocation199_spill] sm:$0xff] }
 0x402   : > { %v2078_v61 = vmax.f32 %v1885_v12, 0.0  ;;  %v5577_v10 = vadd.f32 %v2546_v46, %v2338_v50  ;;  %v6740_v12 = vld [vmem:[#allocation214_spill] sm:$0xff]  ;;  %v5587_v57 = vpop.f32.mrf.mxu1 }
 0x403   : > { %2596 = vmatmul.f32.gmra.mxu0 %v2128_v18  ;;  %v2131_v50 = vmax.f32 %v6740_v12, 0.0  ;;  %v2130_v18 = vmax.f32 %v1103_v13, 0.0  ;;  %6741 = vst [vmem:[#allocation88_spill] sm:$0xff] %v5587_v57 }
 0x404   : > { %1934 = vmatmul.f32.gmra.mxu2 %v6737_v3  ;;  %2387 = vmatmul.f32.gmra.mxu3 %v2127_v60 }
 0x405   : > { %2754 = vmatmul.f32.gmra.mxu1 %v2078_v61  ;;  %v6742_v61 = vld [vmem:[#allocation146_spill] sm:$0xff] }
 0x406   : > { %v897_v60 = vadd.f32 %v6742_v61, %v4808_v38 }
 0x407   : > { %v1887_v26 = vpop.f32.mrf.mxu2  ;;  %v2340_v44 = vpop.f32.mrf.mxu3 }
 0x408   : > { %v1888_v27 = vadd.f32 %v1887_v26, %v1679_v4  ;;  %v2341_v11 = vadd.f32 %v5452_v54, %v2340_v44  ;;  %v2552_v46 = vpop.f32.mrf.mxu0  ;;  %v1682_v44 = vadd.f32 %v6744_v41, %v5442_v53  ;;  %v6745_v4 = vld [vmem:[#allocation217_spill] sm:$0xff]  ;;  %v6750_v41 = vld [vmem:[#allocation203_spill] sm:$0xff] }
 0x409   : > { %v1106_v62 = vadd.f32 %v6745_v4, %v897_v60  ;;  %v6751_v4 = vld [vmem:[#allocation221_spill] sm:$0xff] }
 0x40a   : > { %v2081_v45 = vmax.f32 %v1888_v27, 0.0  ;;  %v5589_v3 = vadd.f32 %v2549_v22, %v2341_v11  ;;  %v6746_v11 = vld [vmem:[#allocation218_spill] sm:$0xff]  ;;  %v5604_v60 = vpop.f32.mrf.mxu1 }
 0x40b   : > { %2599 = vmatmul.f32.gmra.mxu0 %v2131_v50  ;;  %v2134_v50 = vmax.f32 %v6746_v11, 0.0  ;;  %v2133_v57 = vmax.f32 %v1106_v62, 0.0  ;;  %6749 = vst [vmem:[#allocation95_spill] sm:$0xff] %v5604_v60  ;;  %v6752_v11 = vld [vmem:[#allocation222_spill] sm:$0xff]  ;;  %v6754_v60 = vld [vmem:[#allocation153_spill] sm:$0xff] }
 0x40c   : > { %1937 = vmatmul.f32.gmra.mxu2 %v6743_v2  ;;  %2390 = vmatmul.f32.gmra.mxu3 %v2130_v18  ;;  %v6748_v2 = vld [vmem:[#allocation151_spill] sm:$0xff] }
 0x40d   : > { %2757 = vmatmul.f32.gmra.mxu1 %v2081_v45  ;;  %v6747_v45 = vld [vmem:[#allocation148_spill] sm:$0xff] }
 0x40e   : > { %v900_v18 = vadd.f32 %v6747_v45, %v4808_v38 }
 0x40f   : > { %v1890_v26 = vpop.f32.mrf.mxu2  ;;  %v2343_v13 = vpop.f32.mrf.mxu3 }
 0x410   : > { %v1891_v27 = vadd.f32 %v1890_v26, %v1682_v44  ;;  %v2344_v12 = vadd.f32 %v5452_v54, %v2343_v13  ;;  %v2555_v22 = vpop.f32.mrf.mxu0  ;;  %v1685_v44 = vadd.f32 %v6750_v41, %v5442_v53  ;;  %v1109_v26 = vadd.f32 %v6751_v4, %v900_v18  ;;  %v6755_v18 = vld [vmem:[#allocation207_spill] sm:$0xff] }
 0x411   : > { %v1688_v41 = vadd.f32 %v6755_v18, %v5442_v53 }
 0x412   : > { %v2084_v58 = vmax.f32 %v1891_v27, 0.0  ;;  %v5599_v61 = vadd.f32 %v2552_v46, %v2344_v12  ;;  %v2136_v45 = vmax.f32 %v1109_v26, 0.0 }
 0x413   : > { %2602 = vmatmul.f32.gmra.mxu0 %v2134_v50  ;;  %v2137_v50 = vmax.f32 %v6752_v11, 0.0  ;;  %v6758_v11 = vld [vmem:[#allocation226_spill] sm:$0xff] }
 0x414   : > { %1940 = vmatmul.f32.gmra.mxu2 %v6748_v2  ;;  %2393 = vmatmul.f32.gmra.mxu3 %v2133_v57 }
 0x415   : > { %2760 = vmatmul.f32.gmra.mxu1 %v2084_v58  ;;  %v6753_v58 = vld [vmem:[#allocation150_spill] sm:$0xff] }
 0x416   : > { %v903_v57 = vadd.f32 %v6753_v58, %v4808_v38 }
 0x417   : > { %v1893_v13 = vpop.f32.mrf.mxu2  ;;  %v2346_v62 = vpop.f32.mrf.mxu3 }
 0x418   : > { %v1894_v27 = vadd.f32 %v1893_v13, %v1685_v44  ;;  %v2347_v46 = vadd.f32 %v5452_v54, %v2346_v62  ;;  %v2558_v12 = vpop.f32.mrf.mxu0  ;;  %v6756_v44 = vld [vmem:[#allocation225_spill] sm:$0xff]  ;;  %v5619_v13 = vpop.f32.mrf.mxu1 }
 0x419   : > { %v1112_v4 = vadd.f32 %v6756_v44, %v903_v57  ;;  %6757 = vst [vmem:[#allocation102_spill] sm:$0xff] %v5619_v13 }
 0x41a   : > { %v2087_v35 = vmax.f32 %v1894_v27, 0.0  ;;  %v5611_v2 = vadd.f32 %v2555_v22, %v2347_v46 }
 0x41b   : > { %2605 = vmatmul.f32.gmra.mxu0 %v2137_v50  ;;  %v2140_v50 = vmax.f32 %v6758_v11, 0.0  ;;  %v2139_v38 = vmax.f32 %v1112_v4, 0.0  ;;  %v6762_v4 = vld [vmem:[#allocation229_spill] sm:$0xff] }
 0x41c   : > { %1943 = vmatmul.f32.gmra.mxu2 %v6754_v60  ;;  %2396 = vmatmul.f32.gmra.mxu3 %v2136_v45  ;;  %v6760_v45 = vld [vmem:[#allocation211_spill] sm:$0xff] }
 0x41d   : > { %2763 = vmatmul.f32.gmra.mxu1 %v2087_v35  ;;  %v6759_v35 = vld [vmem:[#allocation155_spill] sm:$0xff]  ;;  %v1691_v57 = vadd.f32 %v6760_v45, %v5442_v53 }
 0x41f   : > { %v1896_v62 = vpop.f32.mrf.mxu2  ;;  %v2349_v26 = vpop.f32.mrf.mxu3 }
 0x420   : > { %v1897_v27 = vadd.f32 %v1896_v62, %v1688_v41  ;;  %v2350_v22 = vadd.f32 %v5452_v54, %v2349_v26  ;;  %v2561_v46 = vpop.f32.mrf.mxu0  ;;  %v5629_v26 = vpop.f32.mrf.mxu1 }
 0x421   : > { %6761 = vst [vmem:[#allocation93_spill] sm:$0xff] %v5629_v26 }
 0x422   : > { %v2090_v58 = vmax.f32 %v1897_v27, 0.0  ;;  %v5623_v60 = vadd.f32 %v2558_v12, %v2350_v22  ;;  %v2143_v27 = vmax.f32 %v6762_v4, 0.0  ;;  %v6763_v12 = vld [vmem:[#allocation5_spill] sm:$0xff] }
 0x423   : > { %2608 = vmatmul.f32.gmra.mxu0 %v2140_v50  ;;  %v2142_v22 = vmax.f32 %v6763_v12, 0.0  ;;  %v6766_v12 = vld [vmem:[#allocation232_spill] sm:$0xff] }
 0x424   : > { %1946 = vmatmul.f32.gmra.mxu2 %v6759_v35  ;;  %2399 = vmatmul.f32.gmra.mxu3 %v2139_v38  ;;  %v6764_v38 = vld [vmem:[#allocation157_spill] sm:$0xff] }
 0x425   : > { %2766 = vmatmul.f32.gmra.mxu1 %v2090_v58  ;;  %v6765_v58 = vld [vmem:[#allocation215_spill] sm:$0xff] }
 0x426   : > { %v1694_v35 = vadd.f32 %v6765_v58, %v5442_v53  ;;  %v3202_v58 = vld [vmem:[%s3370_s12] sm:$0xff] }
 0x427   : > { %v1899_v18 = vpop.f32.mrf.mxu2  ;;  %v2352_v44 = vpop.f32.mrf.mxu3 }
 0x428   : > { %v1900_v41 = vadd.f32 %v1899_v18, %v1691_v57  ;;  %v2353_v62 = vadd.f32 %v5452_v54, %v2352_v44  ;;  %v2564_v11 = vpop.f32.mrf.mxu0 }
 0x42a   : > { %v2093_v50 = vmax.f32 %v1900_v41, 0.0  ;;  %v5633_v13 = vadd.f32 %v2561_v46, %v2353_v62  ;;  %v2146_v41 = vmax.f32 %v6766_v12, 0.0  ;;  %v6767_v46 = vld [vmem:[#allocation7_spill] sm:$0xff] }
 0x42b   : > { %2611 = vmatmul.f32.gmra.mxu0 %v2143_v27  ;;  %v2145_v62 = vmax.f32 %v6767_v46, 0.0  ;;  %v6770_v12 = vld [vmem:[#allocation235_spill] sm:$0xff]  ;;  %v6771_v46 = vld [vmem:[#allocation9_spill] sm:$0xff] }
 0x42c   : > { %1949 = vmatmul.f32.gmra.mxu2 %v6764_v38  ;;  %2402 = vmatmul.f32.gmra.mxu3 %v2142_v22  ;;  %v2148_v9 = vmax.f32 %v6771_v46, 0.0 }
 0x42d   : > { %2769 = vmatmul.f32.gmra.mxu1 %v2093_v50  ;;  %v6768_v50 = vld [vmem:[#allocation161_spill] sm:$0xff] }
 0x42f   : > { %v1902_v45 = vpop.f32.mrf.mxu2  ;;  %v2355_v57 = vpop.f32.mrf.mxu3 }
 0x430   : > { %v1903_v18 = vadd.f32 %v1902_v45, %v1694_v35  ;;  %v2356_v44 = vadd.f32 %v5452_v54, %v2355_v57  ;;  %v2567_v4 = vpop.f32.mrf.mxu0  ;;  %v6769_v45 = vld [vmem:[#allocation219_spill] sm:$0xff] }
 0x431   : > { %v1697_v57 = vadd.f32 %v6769_v45, %v5442_v53  ;;  %v6774_v45 = vld [vmem:[#allocation223_spill] sm:$0xff] }
 0x432   : > { %v2096_v27 = vmax.f32 %v1903_v18, 0.0  ;;  %v2725_v26 = vpop.f32.mrf.mxu1  ;;  %v5641_v38 = vadd.f32 %v2564_v11, %v2356_v44 }
 0x433   : > { %v2726_v22 = vadd.f32 %v2725_v26, %v5461_v29  ;;  %2614 = vmatmul.f32.gmra.mxu0 %v2146_v41  ;;  %v2149_v41 = vmax.f32 %v6770_v12, 0.0  ;;  %v6775_v12 = vld [vmem:[#allocation238_spill] sm:$0xff] }
 0x434   : > { %1952 = vmatmul.f32.gmra.mxu2 %v6768_v50  ;;  %2405 = vmatmul.f32.gmra.mxu3 %v2145_v62 }
 0x435   : > { %v2917_v35 = vadd.f32 %v3202_v58, %v2726_v22  ;;  %2772 = vmatmul.f32.gmra.mxu1 %v2096_v27  ;;  %v6772_v22 = vld [vmem:[#allocation165_spill] sm:$0xff]  ;;  %v6773_v58 = vld [vmem:[#allocation2_spill] sm:$0xff] }
 0x437   : > { %2981 = vst [vmem:[%s5648_s17] sm:$0xff] %v2917_v35  ;;  %v1905_v11 = vpop.f32.mrf.mxu2  ;;  %v2358_v18 = vpop.f32.mrf.mxu3 }
 0x438   : > { %v1906_v29 = vadd.f32 %v1905_v11, %v1697_v57  ;;  %v2359_v26 = vadd.f32 %v5452_v54, %v2358_v18  ;;  %v2570_v44 = vpop.f32.mrf.mxu0  ;;  %v1700_v57 = vadd.f32 %v6774_v45, %v5442_v53  ;;  %v6779_v45 = vld [vmem:[#allocation227_spill] sm:$0xff] }
 0x43a   : > { %v2099_v50 = vmax.f32 %v1906_v29, 0.0  ;;  %v2728_v62 = vpop.f32.mrf.mxu1  ;;  %v5658_v21 = vadd.f32 %v2567_v4, %v2359_v26 }
 0x43b   : > { %v2729_v27 = vadd.f32 %v2728_v62, %v5473_v32  ;;  %2617 = vmatmul.f32.gmra.mxu0 %v2149_v41  ;;  %v2152_v32 = vmax.f32 %v6775_v12, 0.0  ;;  %v6776_v41 = vld [vmem:[#allocation11_spill] sm:$0xff]  ;;  %v6780_v12 = vld [vmem:[#allocation241_spill] sm:$0xff] }
 0x43c   : > { %1955 = vmatmul.f32.gmra.mxu2 %v6772_v22  ;;  %2408 = vmatmul.f32.gmra.mxu3 %v2148_v9  ;;  %v2151_v46 = vmax.f32 %v6776_v41, 0.0 }
 0x43d   : > { %v2918_v35 = vadd.f32 %v2729_v27, %v6773_v58  ;;  %2775 = vmatmul.f32.gmra.mxu1 %v2099_v50  ;;  %v6777_v27 = vld [vmem:[#allocation169_spill] sm:$0xff]  ;;  %v6778_v58 = vld [vmem:[#allocation3_spill] sm:$0xff] }
 0x43f   : > { %2982 = vst [vmem:[%s5648_s17 + $0x8] sm:$0xff] %v2918_v35  ;;  %v1908_v11 = vpop.f32.mrf.mxu2  ;;  %v2361_v18 = vpop.f32.mrf.mxu3 }
 0x440   : > { %v1909_v29 = vadd.f32 %v1908_v11, %v1700_v57  ;;  %v2362_v4 = vadd.f32 %v5452_v54, %v2361_v18  ;;  %v2573_v26 = vpop.f32.mrf.mxu0  ;;  %v1703_v57 = vadd.f32 %v6779_v45, %v5442_v53  ;;  %v6784_v45 = vld [vmem:[#allocation230_spill] sm:$0xff] }
 0x442   : > { %v2102_v62 = vmax.f32 %v1909_v29, 0.0  ;;  %v2731_v9 = vpop.f32.mrf.mxu1  ;;  %v5669_v22 = vadd.f32 %v2570_v44, %v2362_v4 }
 0x443   : > { %v2732_v50 = vadd.f32 %v2731_v9, %v5483_v56  ;;  %2620 = vmatmul.f32.gmra.mxu0 %v2152_v32  ;;  %v2155_v56 = vmax.f32 %v6780_v12, 0.0  ;;  %v6781_v32 = vld [vmem:[#allocation13_spill] sm:$0xff]  ;;  %v6785_v12 = vld [vmem:[#allocation244_spill] sm:$0xff] }
 0x444   : > { %1958 = vmatmul.f32.gmra.mxu2 %v6777_v27  ;;  %2411 = vmatmul.f32.gmra.mxu3 %v2151_v46  ;;  %v2154_v41 = vmax.f32 %v6781_v32, 0.0 }
 0x445   : > { %v2919_v35 = vadd.f32 %v2732_v50, %v6778_v58  ;;  %2778 = vmatmul.f32.gmra.mxu1 %v2102_v62  ;;  %v6782_v50 = vld [vmem:[#allocation174_spill] sm:$0xff]  ;;  %v6783_v58 = vld [vmem:[#allocation4_spill] sm:$0xff] }
 0x447   : > { %2983 = vst [vmem:[%s5648_s17 + $0x10] sm:$0xff] %v2919_v35  ;;  %v1911_v11 = vpop.f32.mrf.mxu2  ;;  %v2364_v18 = vpop.f32.mrf.mxu3 }
 0x448   : > { %v1912_v29 = vadd.f32 %v1911_v11, %v1703_v57  ;;  %v2365_v44 = vadd.f32 %v5452_v54, %v2364_v18  ;;  %v2576_v4 = vpop.f32.mrf.mxu0  ;;  %v1706_v57 = vadd.f32 %v6784_v45, %v5442_v53  ;;  %v6789_v45 = vld [vmem:[#allocation233_spill] sm:$0xff] }
 0x44a   : > { %v2105_v9 = vmax.f32 %v1912_v29, 0.0  ;;  %v2734_v46 = vpop.f32.mrf.mxu1  ;;  %v5680_v27 = vadd.f32 %v2573_v26, %v2365_v44 }
 0x44b   : > { %v2735_v62 = vadd.f32 %v2734_v46, %v5495_v1  ;;  %2623 = vmatmul.f32.gmra.mxu0 %v2155_v56  ;;  %v2158_v1 = vmax.f32 %v6785_v12, 0.0  ;;  %v6786_v56 = vld [vmem:[#allocation15_spill] sm:$0xff] }
 0x44c   : > { %1961 = vmatmul.f32.gmra.mxu2 %v6782_v50  ;;  %2414 = vmatmul.f32.gmra.mxu3 %v2154_v41  ;;  %v2157_v32 = vmax.f32 %v6786_v56, 0.0  ;;  %v6790_v12 = vld [vmem:[#allocation247_spill] sm:$0xff] }
 0x44d   : > { %v2920_v35 = vadd.f32 %v2735_v62, %v6783_v58  ;;  %2781 = vmatmul.f32.gmra.mxu1 %v2105_v9  ;;  %v6787_v62 = vld [vmem:[#allocation179_spill] sm:$0xff]  ;;  %v6788_v58 = vld [vmem:[#allocation6_spill] sm:$0xff] }
 0x44f   : > { %2984 = vst [vmem:[%s5648_s17 + $0x18] sm:$0xff] %v2920_v35  ;;  %v1914_v11 = vpop.f32.mrf.mxu2  ;;  %v2367_v18 = vpop.f32.mrf.mxu3 }
 0x450   : > { %v1915_v29 = vadd.f32 %v1914_v11, %v1706_v57  ;;  %v2368_v26 = vadd.f32 %v5452_v54, %v2367_v18  ;;  %v2579_v44 = vpop.f32.mrf.mxu0  ;;  %v1709_v57 = vadd.f32 %v6789_v45, %v5442_v53  ;;  %v6794_v45 = vld [vmem:[#allocation236_spill] sm:$0xff] }
 0x452   : > { %v2108_v46 = vmax.f32 %v1915_v29, 0.0  ;;  %v2737_v41 = vpop.f32.mrf.mxu1  ;;  %v5691_v50 = vadd.f32 %v2576_v4, %v2368_v26 }
 0x453   : > { %v2738_v9 = vadd.f32 %v2737_v41, %v5507_v39  ;;  %2626 = vmatmul.f32.gmra.mxu0 %v2158_v1  ;;  %v2161_v39 = vmax.f32 %v6790_v12, 0.0  ;;  %v6791_v1 = vld [vmem:[#allocation17_spill] sm:$0xff]  ;;  %v6795_v12 = vld [vmem:[#allocation250_spill] sm:$0xff] }
 0x454   : > { %1964 = vmatmul.f32.gmra.mxu2 %v6787_v62  ;;  %2417 = vmatmul.f32.gmra.mxu3 %v2157_v32  ;;  %v2160_v56 = vmax.f32 %v6791_v1, 0.0 }
 0x455   : > { %v2921_v35 = vadd.f32 %v2738_v9, %v6788_v58  ;;  %2784 = vmatmul.f32.gmra.mxu1 %v2108_v46  ;;  %v6792_v9 = vld [vmem:[#allocation184_spill] sm:$0xff] }
 0x456   : > { %v6793_v58 = vld [vmem:[#allocation8_spill] sm:$0xff] }
 0x457   : > { %2985 = vst [vmem:[%s5648_s17 + $0x20] sm:$0xff] %v2921_v35  ;;  %v1917_v11 = vpop.f32.mrf.mxu2  ;;  %v2370_v18 = vpop.f32.mrf.mxu3 }
 0x458   : > { %v1918_v29 = vadd.f32 %v1917_v11, %v1709_v57  ;;  %v2371_v4 = vadd.f32 %v5452_v54, %v2370_v18  ;;  %v2582_v26 = vpop.f32.mrf.mxu0  ;;  %v1712_v57 = vadd.f32 %v6794_v45, %v5442_v53  ;;  %v6799_v45 = vld [vmem:[#allocation239_spill] sm:$0xff] }
 0x45a   : > { %v2111_v41 = vmax.f32 %v1918_v29, 0.0  ;;  %v2740_v32 = vpop.f32.mrf.mxu1  ;;  %v5702_v62 = vadd.f32 %v2579_v44, %v2371_v4 }
 0x45b   : > { %v2741_v46 = vadd.f32 %v2740_v32, %v5519_v6  ;;  %2629 = vmatmul.f32.gmra.mxu0 %v2161_v39  ;;  %v2164_v6 = vmax.f32 %v6795_v12, 0.0  ;;  %v6796_v39 = vld [vmem:[#allocation19_spill] sm:$0xff]  ;;  %v6800_v12 = vld [vmem:[#allocation253_spill] sm:$0xff] }
 0x45c   : > { %1967 = vmatmul.f32.gmra.mxu2 %v6792_v9  ;;  %2420 = vmatmul.f32.gmra.mxu3 %v2160_v56  ;;  %v2163_v1 = vmax.f32 %v6796_v39, 0.0 }
 0x45d   : > { %v2922_v35 = vadd.f32 %v2741_v46, %v6793_v58  ;;  %2787 = vmatmul.f32.gmra.mxu1 %v2111_v41  ;;  %v6797_v46 = vld [vmem:[#allocation189_spill] sm:$0xff]  ;;  %v6798_v58 = vld [vmem:[#allocation10_spill] sm:$0xff] }
 0x45f   : > { %2986 = vst [vmem:[%s5648_s17 + $0x28] sm:$0xff] %v2922_v35  ;;  %v1920_v11 = vpop.f32.mrf.mxu2  ;;  %v2373_v18 = vpop.f32.mrf.mxu3 }
 0x460   : > { %v1921_v29 = vadd.f32 %v1920_v11, %v1712_v57  ;;  %v2374_v44 = vadd.f32 %v5452_v54, %v2373_v18  ;;  %v2585_v4 = vpop.f32.mrf.mxu0  ;;  %v1715_v57 = vadd.f32 %v6799_v45, %v5442_v53  ;;  %v6804_v45 = vld [vmem:[#allocation242_spill] sm:$0xff] }
 0x462   : > { %v2114_v32 = vmax.f32 %v1921_v29, 0.0  ;;  %v2743_v56 = vpop.f32.mrf.mxu1  ;;  %v5713_v9 = vadd.f32 %v2582_v26, %v2374_v44 }
 0x463   : > { %v2744_v41 = vadd.f32 %v2743_v56, %v5531_v48  ;;  %2632 = vmatmul.f32.gmra.mxu0 %v2164_v6  ;;  %v2167_v48 = vmax.f32 %v6800_v12, 0.0  ;;  %v6801_v6 = vld [vmem:[#allocation22_spill] sm:$0xff]  ;;  %v6805_v12 = vld [vmem:[#allocation256_spill] sm:$0xff] }
 0x464   : > { %1970 = vmatmul.f32.gmra.mxu2 %v6797_v46  ;;  %2423 = vmatmul.f32.gmra.mxu3 %v2163_v1  ;;  %v2166_v39 = vmax.f32 %v6801_v6, 0.0 }
 0x465   : > { %v2923_v35 = vadd.f32 %v2744_v41, %v6798_v58  ;;  %2790 = vmatmul.f32.gmra.mxu1 %v2114_v32  ;;  %v6802_v41 = vld [vmem:[#allocation21_spill] sm:$0xff]  ;;  %v6803_v58 = vld [vmem:[#allocation12_spill] sm:$0xff] }
 0x467   : > { %2987 = vst [vmem:[%s5648_s17 + $0x30] sm:$0xff] %v2923_v35  ;;  %v1923_v11 = vpop.f32.mrf.mxu2  ;;  %v2376_v18 = vpop.f32.mrf.mxu3 }
 0x468   : > { %v1924_v29 = vadd.f32 %v1923_v11, %v1715_v57  ;;  %v2377_v26 = vadd.f32 %v5452_v54, %v2376_v18  ;;  %v2588_v44 = vpop.f32.mrf.mxu0  ;;  %v1718_v57 = vadd.f32 %v6804_v45, %v5442_v53  ;;  %v6809_v45 = vld [vmem:[#allocation245_spill] sm:$0xff] }
 0x46a   : > { %v2117_v56 = vmax.f32 %v1924_v29, 0.0  ;;  %v2746_v1 = vpop.f32.mrf.mxu1  ;;  %v5724_v46 = vadd.f32 %v2585_v4, %v2377_v26 }
 0x46b   : > { %v2747_v32 = vadd.f32 %v2746_v1, %v5541_v37  ;;  %2635 = vmatmul.f32.gmra.mxu0 %v2167_v48  ;;  %v2170_v37 = vmax.f32 %v6805_v12, 0.0  ;;  %v6806_v48 = vld [vmem:[#allocation25_spill] sm:$0xff]  ;;  %v6810_v12 = vld [vmem:[#allocation259_spill] sm:$0xff] }
 0x46c   : > { %1973 = vmatmul.f32.gmra.mxu2 %v6802_v41  ;;  %2426 = vmatmul.f32.gmra.mxu3 %v2166_v39  ;;  %v2169_v6 = vmax.f32 %v6806_v48, 0.0 }
 0x46d   : > { %v2924_v35 = vadd.f32 %v2747_v32, %v6803_v58  ;;  %2793 = vmatmul.f32.gmra.mxu1 %v2117_v56  ;;  %v6807_v32 = vld [vmem:[#allocation24_spill] sm:$0xff]  ;;  %v6808_v58 = vld [vmem:[#allocation14_spill] sm:$0xff] }
 0x46f   : > { %2988 = vst [vmem:[%s5648_s17 + $0x38] sm:$0xff] %v2924_v35  ;;  %v1926_v11 = vpop.f32.mrf.mxu2  ;;  %v2379_v18 = vpop.f32.mrf.mxu3 }
 0x470   : > { %v1927_v29 = vadd.f32 %v1926_v11, %v1718_v57  ;;  %v2380_v4 = vadd.f32 %v5452_v54, %v2379_v18  ;;  %v2591_v26 = vpop.f32.mrf.mxu0  ;;  %v1721_v57 = vadd.f32 %v6809_v45, %v5442_v53  ;;  %v6814_v45 = vld [vmem:[#allocation248_spill] sm:$0xff] }
 0x472   : > { %v2120_v1 = vmax.f32 %v1927_v29, 0.0  ;;  %v2749_v39 = vpop.f32.mrf.mxu1  ;;  %v5735_v41 = vadd.f32 %v2588_v44, %v2380_v4 }
 0x473   : > { %v2750_v56 = vadd.f32 %v2749_v39, %v5553_v17  ;;  %2638 = vmatmul.f32.gmra.mxu0 %v2170_v37  ;;  %v2173_v17 = vmax.f32 %v6810_v12, 0.0  ;;  %v6811_v37 = vld [vmem:[#allocation28_spill] sm:$0xff]  ;;  %v6815_v12 = vld [vmem:[#allocation262_spill] sm:$0xff] }
 0x474   : > { %1976 = vmatmul.f32.gmra.mxu2 %v6807_v32  ;;  %2429 = vmatmul.f32.gmra.mxu3 %v2169_v6  ;;  %v2172_v48 = vmax.f32 %v6811_v37, 0.0 }
 0x475   : > { %v2925_v35 = vadd.f32 %v2750_v56, %v6808_v58  ;;  %2796 = vmatmul.f32.gmra.mxu1 %v2120_v1  ;;  %v6812_v56 = vld [vmem:[#allocation27_spill] sm:$0xff]  ;;  %v6813_v58 = vld [vmem:[#allocation16_spill] sm:$0xff] }
 0x477   : > { %2989 = vst [vmem:[%s5648_s17 + $0x40] sm:$0xff] %v2925_v35  ;;  %v1929_v11 = vpop.f32.mrf.mxu2  ;;  %v2382_v18 = vpop.f32.mrf.mxu3 }
 0x478   : > { %v1930_v29 = vadd.f32 %v1929_v11, %v1721_v57  ;;  %v2383_v44 = vadd.f32 %v5452_v54, %v2382_v18  ;;  %v2594_v4 = vpop.f32.mrf.mxu0  ;;  %v1724_v57 = vadd.f32 %v6814_v45, %v5442_v53  ;;  %v6819_v45 = vld [vmem:[#allocation251_spill] sm:$0xff] }
 0x47a   : > { %v2123_v39 = vmax.f32 %v1930_v29, 0.0  ;;  %v2752_v6 = vpop.f32.mrf.mxu1  ;;  %v5746_v32 = vadd.f32 %v2591_v26, %v2383_v44 }
 0x47b   : > { %v2753_v1 = vadd.f32 %v2752_v6, %v5565_v40  ;;  %2641 = vmatmul.f32.gmra.mxu0 %v2173_v17  ;;  %v2176_v40 = vmax.f32 %v6815_v12, 0.0  ;;  %v6816_v17 = vld [vmem:[#allocation31_spill] sm:$0xff]  ;;  %v6820_v12 = vld [vmem:[#allocation265_spill] sm:$0xff] }
 0x47c   : > { %1979 = vmatmul.f32.gmra.mxu2 %v6812_v56  ;;  %2432 = vmatmul.f32.gmra.mxu3 %v2172_v48  ;;  %v2175_v37 = vmax.f32 %v6816_v17, 0.0 }
 0x47d   : > { %v2926_v35 = vadd.f32 %v2753_v1, %v6813_v58  ;;  %2799 = vmatmul.f32.gmra.mxu1 %v2123_v39  ;;  %v6817_v1 = vld [vmem:[#allocation30_spill] sm:$0xff] }
 0x47e   : > { %v6818_v58 = vld [vmem:[#allocation18_spill] sm:$0xff] }
 0x47f   : > { %2990 = vst [vmem:[%s5648_s17 + $0x48] sm:$0xff] %v2926_v35  ;;  %v1932_v11 = vpop.f32.mrf.mxu2  ;;  %v2385_v18 = vpop.f32.mrf.mxu3 }
 0x480   : > { %v1933_v29 = vadd.f32 %v1932_v11, %v1724_v57  ;;  %v2386_v26 = vadd.f32 %v5452_v54, %v2385_v18  ;;  %v2597_v44 = vpop.f32.mrf.mxu0  ;;  %v1727_v57 = vadd.f32 %v6819_v45, %v5442_v53  ;;  %v6824_v45 = vld [vmem:[#allocation254_spill] sm:$0xff] }
 0x482   : > { %v2126_v6 = vmax.f32 %v1933_v29, 0.0  ;;  %v2755_v48 = vpop.f32.mrf.mxu1  ;;  %v5757_v56 = vadd.f32 %v2594_v4, %v2386_v26 }
 0x483   : > { %v2756_v39 = vadd.f32 %v2755_v48, %v5577_v10  ;;  %2644 = vmatmul.f32.gmra.mxu0 %v2176_v40  ;;  %v2179_v10 = vmax.f32 %v6820_v12, 0.0  ;;  %v6821_v40 = vld [vmem:[#allocation34_spill] sm:$0xff]  ;;  %v6825_v12 = vld [vmem:[#allocation268_spill] sm:$0xff] }
 0x484   : > { %1982 = vmatmul.f32.gmra.mxu2 %v6817_v1  ;;  %2435 = vmatmul.f32.gmra.mxu3 %v2175_v37  ;;  %v2178_v17 = vmax.f32 %v6821_v40, 0.0 }
 0x485   : > { %v2927_v35 = vadd.f32 %v2756_v39, %v6818_v58  ;;  %2802 = vmatmul.f32.gmra.mxu1 %v2126_v6  ;;  %v6822_v39 = vld [vmem:[#allocation33_spill] sm:$0xff]  ;;  %v6823_v58 = vld [vmem:[#allocation20_spill] sm:$0xff] }
 0x487   : > { %2991 = vst [vmem:[%s5648_s17 + $0x50] sm:$0xff] %v2927_v35  ;;  %v1935_v11 = vpop.f32.mrf.mxu2  ;;  %v2388_v18 = vpop.f32.mrf.mxu3 }
 0x488   : > { %v1936_v29 = vadd.f32 %v1935_v11, %v1727_v57  ;;  %v2389_v4 = vadd.f32 %v5452_v54, %v2388_v18  ;;  %v2600_v26 = vpop.f32.mrf.mxu0  ;;  %v1730_v57 = vadd.f32 %v6824_v45, %v5442_v53  ;;  %v6829_v45 = vld [vmem:[#allocation257_spill] sm:$0xff] }
 0x48a   : > { %v2129_v48 = vmax.f32 %v1936_v29, 0.0  ;;  %v2758_v37 = vpop.f32.mrf.mxu1  ;;  %v5768_v1 = vadd.f32 %v2597_v44, %v2389_v4 }
 0x48b   : > { %v2759_v6 = vadd.f32 %v2758_v37, %v5589_v3  ;;  %2647 = vmatmul.f32.gmra.mxu0 %v2179_v10  ;;  %v2182_v3 = vmax.f32 %v6825_v12, 0.0  ;;  %v6826_v10 = vld [vmem:[#allocation38_spill] sm:$0xff]  ;;  %v6830_v12 = vld [vmem:[#allocation271_spill] sm:$0xff] }
 0x48c   : > { %1985 = vmatmul.f32.gmra.mxu2 %v6822_v39  ;;  %2438 = vmatmul.f32.gmra.mxu3 %v2178_v17  ;;  %v2181_v40 = vmax.f32 %v6826_v10, 0.0 }
 0x48d   : > { %v2928_v35 = vadd.f32 %v2759_v6, %v6823_v58  ;;  %2805 = vmatmul.f32.gmra.mxu1 %v2129_v48  ;;  %v6827_v6 = vld [vmem:[#allocation37_spill] sm:$0xff]  ;;  %v6828_v58 = vld [vmem:[#allocation23_spill] sm:$0xff] }
 0x48f   : > { %2992 = vst [vmem:[%s5648_s17 + $0x58] sm:$0xff] %v2928_v35  ;;  %v1938_v11 = vpop.f32.mrf.mxu2  ;;  %v2391_v18 = vpop.f32.mrf.mxu3 }
 0x490   : > { %v1939_v29 = vadd.f32 %v1938_v11, %v1730_v57  ;;  %v2392_v44 = vadd.f32 %v5452_v54, %v2391_v18  ;;  %v2603_v4 = vpop.f32.mrf.mxu0  ;;  %v1733_v57 = vadd.f32 %v6829_v45, %v5442_v53 }
 0x492   : > { %v2132_v37 = vmax.f32 %v1939_v29, 0.0  ;;  %v2761_v17 = vpop.f32.mrf.mxu1  ;;  %v5779_v39 = vadd.f32 %v2600_v26, %v2392_v44 }
 0x493   : > { %v2762_v48 = vadd.f32 %v2761_v17, %v5599_v61  ;;  %2650 = vmatmul.f32.gmra.mxu0 %v2182_v3  ;;  %v2185_v61 = vmax.f32 %v6830_v12, 0.0  ;;  %v6831_v3 = vld [vmem:[#allocation42_spill] sm:$0xff]  ;;  %v2187_v12 = vmax.f32 %v5189_v19, 0.0 }
 0x494   : > { %1988 = vmatmul.f32.gmra.mxu2 %v6827_v6  ;;  %2441 = vmatmul.f32.gmra.mxu3 %v2181_v40  ;;  %v2184_v10 = vmax.f32 %v6831_v3, 0.0 }
 0x495   : > { %v2929_v35 = vadd.f32 %v2762_v48, %v6828_v58  ;;  %2808 = vmatmul.f32.gmra.mxu1 %v2132_v37  ;;  %v6832_v48 = vld [vmem:[#allocation41_spill] sm:$0xff]  ;;  %v6833_v58 = vld [vmem:[#allocation26_spill] sm:$0xff] }
 0x497   : > { %2993 = vst [vmem:[%s5648_s17 + $0x60] sm:$0xff] %v2929_v35  ;;  %v1941_v11 = vpop.f32.mrf.mxu2  ;;  %v2394_v18 = vpop.f32.mrf.mxu3 }
 0x498   : > { %v1942_v29 = vadd.f32 %v1941_v11, %v1733_v57  ;;  %v2395_v26 = vadd.f32 %v5452_v54, %v2394_v18  ;;  %v2606_v44 = vpop.f32.mrf.mxu0  ;;  %v6834_v54 = vld [vmem:[#allocation260_spill] sm:$0xff] }
 0x499   : > { %v1736_v45 = vadd.f32 %v6834_v54, %v5442_v53 }
 0x49a   : > { %v2135_v17 = vmax.f32 %v1942_v29, 0.0  ;;  %v2764_v40 = vpop.f32.mrf.mxu1  ;;  %v5790_v6 = vadd.f32 %v2603_v4, %v2395_v26  ;;  %v5801_v4 = vld [vmem:[%s6119_s7] ss:$0 sm:$0xff]  ;;  %v2188_v26 = vmax.f32 %v5193_v8, 0.0 }
 0x49b   : > { %v2765_v37 = vadd.f32 %v2764_v40, %v5611_v2  ;;  %2653 = vmatmul.f32.gmra.mxu0 %v2185_v61  ;;  %v6835_v40 = vld [vmem:[#allocation46_spill] sm:$0xff] }
 0x49c   : > { %1991 = vmatmul.f32.gmra.mxu2 %v6832_v48  ;;  %2444 = vmatmul.f32.gmra.mxu3 %v2184_v10 }
 0x49d   : > { %v2930_v35 = vadd.f32 %v2765_v37, %v6833_v58  ;;  %2811 = vmatmul.f32.gmra.mxu1 %v2135_v17  ;;  %v6836_v37 = vld [vmem:[#allocation29_spill] sm:$0xff]  ;;  %v6837_v58 = vld [vmem:[#allocation263_spill] sm:$0xff] }
 0x49f   : > { %2994 = vst [vmem:[%s5648_s17 + $0x68] sm:$0xff] %v2930_v35  ;;  %v1944_v57 = vpop.f32.mrf.mxu2  ;;  %v2397_v11 = vpop.f32.mrf.mxu3  ;;  %v1739_v35 = vadd.f32 %v6837_v58, %v5442_v53  ;;  %v2193_v58 = vmax.f32 %v5222_v59, 0.0 }
 0x4a0   : > { %v1945_v18 = vadd.f32 %v1944_v57, %v1736_v45  ;;  %v2398_v2 = vadd.f32 %v5801_v4, %v2397_v11  ;;  %v2609_v29 = vpop.f32.mrf.mxu0  ;;  %v2190_v57 = vmax.f32 %v5204_v14, 0.0 }
 0x4a2   : > { %v2138_v61 = vmax.f32 %v1945_v18, 0.0  ;;  %v2767_v3 = vpop.f32.mrf.mxu1  ;;  %v5806_v10 = vadd.f32 %v2606_v44, %v2398_v2 }
 0x4a3   : > { %v2768_v17 = vadd.f32 %v2767_v3, %v5623_v60  ;;  %2656 = vmatmul.f32.gmra.mxu0 %v2188_v26  ;;  %v2191_v60 = vmax.f32 %v5208_v51, 0.0 }
 0x4a4   : > { %1994 = vmatmul.f32.gmra.mxu2 %v6835_v40  ;;  %2447 = vmatmul.f32.gmra.mxu3 %v2187_v12  ;;  %v6838_v12 = vld [vmem:[#allocation51_spill] sm:$0xff] }
 0x4a5   : > { %v2931_v48 = vadd.f32 %v2768_v17, %v6836_v37  ;;  %2814 = vmatmul.f32.gmra.mxu1 %v2138_v61  ;;  %v6839_v61 = vld [vmem:[#allocation32_spill] sm:$0xff]  ;;  %v6840_v17 = vld [vmem:[#allocation266_spill] sm:$0xff] }
 0x4a6   : > { %v1742_v40 = vadd.f32 %v6840_v17, %v5442_v53 }
 0x4a7   : > { %2995 = vst [vmem:[%s5648_s17 + $0x70] sm:$0xff] %v2931_v48  ;;  %v1947_v8 = vpop.f32.mrf.mxu2  ;;  %v2400_v54 = vpop.f32.mrf.mxu3 }
 0x4a8   : > { %v1948_v19 = vadd.f32 %v1947_v8, %v1739_v35  ;;  %v2401_v44 = vadd.f32 %v5801_v4, %v2400_v54  ;;  %v2612_v45 = vpop.f32.mrf.mxu0 }
 0x4aa   : > { %v2141_v11 = vmax.f32 %v1948_v19, 0.0  ;;  %v2770_v18 = vpop.f32.mrf.mxu1  ;;  %v5817_v2 = vadd.f32 %v2609_v29, %v2401_v44  ;;  %v6841_v44 = vld [vmem:[#allocation56_spill] sm:$0xff] }
 0x4ab   : > { %v2771_v26 = vadd.f32 %v2770_v18, %v5633_v13  ;;  %2659 = vmatmul.f32.gmra.mxu0 %v2191_v60  ;;  %v2194_v13 = vmax.f32 %v5226_v33, 0.0  ;;  %v6842_v60 = vld [vmem:[#allocation36_spill] sm:$0xff] }
 0x4ac   : > { %1997 = vmatmul.f32.gmra.mxu2 %v6838_v12  ;;  %2450 = vmatmul.f32.gmra.mxu3 %v2190_v57 }
 0x4ad   : > { %v2932_v3 = vadd.f32 %v2771_v26, %v6839_v61  ;;  %2817 = vmatmul.f32.gmra.mxu1 %v2141_v11  ;;  %v6843_v11 = vld [vmem:[#allocation269_spill] sm:$0xff]  ;;  %v2196_v61 = vmax.f32 %v5237_v15, 0.0 }
 0x4ae   : > { %v1745_v18 = vadd.f32 %v6843_v11, %v5442_v53 }
 0x4af   : > { %2996 = vst [vmem:[%s5648_s17 + $0x78] sm:$0xff] %v2932_v3  ;;  %v1950_v51 = vpop.f32.mrf.mxu2  ;;  %v2403_v37 = vpop.f32.mrf.mxu3 }
 0x4b0   : > { %v1951_v14 = vadd.f32 %v1950_v51, %v1742_v40  ;;  %v2404_v29 = vadd.f32 %v5801_v4, %v2403_v37  ;;  %v2615_v48 = vpop.f32.mrf.mxu0  ;;  %v6844_v37 = vld [vmem:[#allocation61_spill] sm:$0xff] }
 0x4b2   : > { %v2144_v35 = vmax.f32 %v1951_v14, 0.0  ;;  %v2773_v8 = vpop.f32.mrf.mxu1  ;;  %v5828_v54 = vadd.f32 %v2612_v45, %v2404_v29  ;;  %v6845_v14 = vld [vmem:[#allocation40_spill] sm:$0xff] }
 0x4b3   : > { %v2774_v19 = vadd.f32 %v2773_v8, %v5641_v38  ;;  %2662 = vmatmul.f32.gmra.mxu0 %v2194_v13  ;;  %v2197_v38 = vmax.f32 %v5241_v5, 0.0  ;;  %v6846_v13 = vld [vmem:[#allocation272_spill] sm:$0xff] }
 0x4b4   : > { %2000 = vmatmul.f32.gmra.mxu2 %v6841_v44  ;;  %2453 = vmatmul.f32.gmra.mxu3 %v2193_v58  ;;  %v1748_v58 = vadd.f32 %v6846_v13, %v5442_v53  ;;  %v6851_v13 = vld [vmem:[#allocation49_spill] sm:$0xff] }
 0x4b5   : > { %v2933_v57 = vadd.f32 %v2774_v19, %v6842_v60  ;;  %2820 = vmatmul.f32.gmra.mxu1 %v2144_v35  ;;  %v2199_v19 = vmax.f32 %v5252_v30, 0.0 }
 0x4b7   : > { %2997 = vst [vmem:[%s5648_s17 + $0x80] sm:$0xff] %v2933_v57  ;;  %v1953_v33 = vpop.f32.mrf.mxu2  ;;  %v2406_v26 = vpop.f32.mrf.mxu3 }
 0x4b8   : > { %v1954_v59 = vadd.f32 %v1953_v33, %v1745_v18  ;;  %v2407_v45 = vadd.f32 %v5801_v4, %v2406_v26  ;;  %v2618_v12 = vpop.f32.mrf.mxu0  ;;  %v6847_v18 = vld [vmem:[#allocation66_spill] sm:$0xff]  ;;  %v6848_v33 = vld [vmem:[#allocation44_spill] sm:$0xff] }
 0x4ba   : > { %v2147_v3 = vmax.f32 %v1954_v59, 0.0  ;;  %v2776_v17 = vpop.f32.mrf.mxu1  ;;  %v5839_v40 = vadd.f32 %v2615_v48, %v2407_v45  ;;  %v6849_v59 = vld [vmem:[#allocation47_spill] sm:$0xff] }
 0x4bb   : > { %v2777_v51 = vadd.f32 %v2776_v17, %v5658_v21  ;;  %2665 = vmatmul.f32.gmra.mxu0 %v2197_v38  ;;  %v2200_v21 = vmax.f32 %v5256_v47, 0.0  ;;  %v1751_v45 = vadd.f32 %v6849_v59, %v5442_v53 }
 0x4bc   : > { %2003 = vmatmul.f32.gmra.mxu2 %v6844_v37  ;;  %2456 = vmatmul.f32.gmra.mxu3 %v2196_v61  ;;  %v2203_v61 = vmax.f32 %v5271_v43, 0.0 }
 0x4bd   : > { %v2934_v29 = vadd.f32 %v2777_v51, %v6845_v14  ;;  %2823 = vmatmul.f32.gmra.mxu1 %v2147_v3 }
 0x4bf   : > { %2998 = vst [vmem:[%s5648_s17 + $0x88] sm:$0xff] %v2934_v29  ;;  %v1956_v5 = vpop.f32.mrf.mxu2  ;;  %v2409_v35 = vpop.f32.mrf.mxu3  ;;  %v6850_v29 = vld [vmem:[#allocation71_spill] sm:$0xff] }
 0x4c0   : > { %v1957_v15 = vadd.f32 %v1956_v5, %v1748_v58  ;;  %v2410_v48 = vadd.f32 %v5801_v4, %v2409_v35  ;;  %v2621_v8 = vpop.f32.mrf.mxu0  ;;  %v1754_v5 = vadd.f32 %v5210_v42, %v5442_v53  ;;  %v6852_v42 = vld [vmem:[#allocation76_spill] sm:$0xff] }
 0x4c2   : > { %v2150_v44 = vmax.f32 %v1957_v15, 0.0  ;;  %v2779_v60 = vpop.f32.mrf.mxu1  ;;  %v5850_v57 = vadd.f32 %v2618_v12, %v2410_v48  ;;  %v2206_v48 = vmax.f32 %v5289_v25, 0.0 }
 0x4c3   : > { %v2780_v11 = vadd.f32 %v2779_v60, %v5669_v22  ;;  %2668 = vmatmul.f32.gmra.mxu0 %v2200_v21  ;;  %v2202_v22 = vmax.f32 %v5267_v20, 0.0 }
 0x4c4   : > { %2006 = vmatmul.f32.gmra.mxu2 %v6847_v18  ;;  %2459 = vmatmul.f32.gmra.mxu3 %v2199_v19 }
 0x4c5   : > { %v2935_v26 = vadd.f32 %v2780_v11, %v6848_v33  ;;  %2826 = vmatmul.f32.gmra.mxu1 %v2150_v44  ;;  %v6853_v11 = vld [vmem:[#allocation54_spill] sm:$0xff]  ;;  %v1757_v33 = vadd.f32 %v5228_v34, %v5442_v53  ;;  %v6855_v34 = vld [vmem:[#allocation59_spill] sm:$0xff] }
 0x4c7   : > { %2999 = vst [vmem:[%s5648_s17 + $0x90] sm:$0xff] %v2935_v26  ;;  %v1959_v47 = vpop.f32.mrf.mxu2  ;;  %v2412_v38 = vpop.f32.mrf.mxu3 }
 0x4c8   : > { %v1960_v30 = vadd.f32 %v1959_v47, %v1751_v45  ;;  %v2413_v12 = vadd.f32 %v5801_v4, %v2412_v38  ;;  %v2624_v17 = vpop.f32.mrf.mxu0  ;;  %v2208_v45 = vmax.f32 %v5300_v55, 0.0 }
 0x4ca   : > { %v2153_v3 = vmax.f32 %v1960_v30, 0.0  ;;  %v2782_v51 = vpop.f32.mrf.mxu1  ;;  %v5861_v37 = vadd.f32 %v2621_v8, %v2413_v12 }
 0x4cb   : > { %v2783_v14 = vadd.f32 %v2782_v51, %v5680_v27  ;;  %2671 = vmatmul.f32.gmra.mxu0 %v2203_v61  ;;  %v2205_v27 = vmax.f32 %v5285_v63, 0.0  ;;  %v6854_v61 = vld [vmem:[#allocation81_spill] sm:$0xff] }
 0x4cc   : > { %2009 = vmatmul.f32.gmra.mxu2 %v6850_v29  ;;  %2462 = vmatmul.f32.gmra.mxu3 %v2202_v22  ;;  %v2211_v29 = vmax.f32 %v5315_v36, 0.0 }
 0x4cd   : > { %v2936_v58 = vadd.f32 %v2783_v14, %v6851_v13  ;;  %2829 = vmatmul.f32.gmra.mxu1 %v2153_v3  ;;  %v1760_v3 = vadd.f32 %v5243_v24, %v5442_v53  ;;  %v6856_v24 = vld [vmem:[#allocation86_spill] sm:$0xff] }
 0x4cf   : > { %3000 = vst [vmem:[%s5648_s17 + $0x98] sm:$0xff] %v2936_v58  ;;  %v1962_v43 = vpop.f32.mrf.mxu2  ;;  %v2415_v20 = vpop.f32.mrf.mxu3 }
 0x4d0   : > { %v1963_v35 = vadd.f32 %v1962_v43, %v1754_v5  ;;  %v2416_v15 = vadd.f32 %v5801_v4, %v2415_v20  ;;  %v2627_v60 = vpop.f32.mrf.mxu0  ;;  %v6857_v20 = vld [vmem:[#allocation64_spill] sm:$0xff] }
 0x4d2   : > { %v2156_v8 = vmax.f32 %v1963_v35, 0.0  ;;  %v2785_v21 = vpop.f32.mrf.mxu1  ;;  %v5872_v19 = vadd.f32 %v2624_v17, %v2416_v15  ;;  %v1763_v15 = vadd.f32 %v5258_v23, %v5442_v53  ;;  %v6858_v23 = vld [vmem:[#allocation91_spill] sm:$0xff] }
 0x4d3   : > { %v2786_v44 = vadd.f32 %v2785_v21, %v5691_v50  ;;  %2674 = vmatmul.f32.gmra.mxu0 %v2206_v48  ;;  %v2209_v50 = vmax.f32 %v5304_v0, 0.0  ;;  %v2214_v21 = vmax.f32 %v5330_v16, 0.0 }
 0x4d4   : > { %2012 = vmatmul.f32.gmra.mxu2 %v6852_v42  ;;  %2465 = vmatmul.f32.gmra.mxu3 %v2205_v27 }
 0x4d5   : > { %v2937_v18 = vadd.f32 %v2786_v44, %v6853_v11  ;;  %2832 = vmatmul.f32.gmra.mxu1 %v2156_v8 }
 0x4d7   : > { %3001 = vst [vmem:[%s5648_s17 + $0xa0] sm:$0xff] %v2937_v18  ;;  %v1965_v25 = vpop.f32.mrf.mxu2  ;;  %v2418_v63 = vpop.f32.mrf.mxu3  ;;  %v6859_v18 = vld [vmem:[#allocation69_spill] sm:$0xff] }
 0x4d8   : > { %v1966_v26 = vadd.f32 %v1965_v25, %v1757_v33  ;;  %v2419_v59 = vadd.f32 %v5801_v4, %v2418_v63  ;;  %v2630_v17 = vpop.f32.mrf.mxu0  ;;  %v1766_v25 = vadd.f32 %v5273_v31, %v5442_v53  ;;  %v2218_v63 = vmax.f32 %v5352_v52, 0.0  ;;  %v6862_v31 = vld [vmem:[#allocation127_spill] sm:$0xff] }
 0x4da   : > { %v2159_v47 = vmax.f32 %v1966_v26, 0.0  ;;  %v2788_v38 = vpop.f32.mrf.mxu1  ;;  %v5883_v30 = vadd.f32 %v2627_v60, %v2419_v59  ;;  %v2217_v26 = vmax.f32 %v5348_v49, 0.0 }
 0x4db   : > { %v2789_v12 = vadd.f32 %v2788_v38, %v5702_v62  ;;  %2677 = vmatmul.f32.gmra.mxu0 %v2209_v50  ;;  %v2212_v62 = vmax.f32 %v5319_v7, 0.0 }
 0x4dc   : > { %2015 = vmatmul.f32.gmra.mxu2 %v6854_v61  ;;  %2468 = vmatmul.f32.gmra.mxu3 %v2208_v45  ;;  %v6860_v45 = vld [vmem:[#allocation96_spill] sm:$0xff] }
 0x4dd   : > { %v2938_v22 = vadd.f32 %v2789_v12, %v6855_v34  ;;  %2835 = vmatmul.f32.gmra.mxu1 %v2159_v47  ;;  %v6861_v47 = vld [vmem:[#allocation74_spill] sm:$0xff]  ;;  %v1769_v12 = vadd.f32 %v6862_v31, %v5442_v53  ;;  %v6863_v34 = vld [vmem:[#allocation57_spill] sm:$0xff] }
 0x4de   : > { %v2221_v49 = vmax.f32 %v6863_v34, 0.0  ;;  %v6881_v34 = vld [vmem:[#allocation94_spill] sm:$0xff] }
 0x4df   : > { %3002 = vst [vmem:[%s5648_s17 + $0xa8] sm:$0xff] %v2938_v22  ;;  %v1968_v0 = vpop.f32.mrf.mxu2  ;;  %v2421_v55 = vpop.f32.mrf.mxu3  ;;  %v6864_v22 = vld [vmem:[#allocation50_spill] sm:$0xff] }
 0x4e0   : > { %v1969_v51 = vadd.f32 %v1968_v0, %v1760_v3  ;;  %v2422_v14 = vadd.f32 %v5801_v4, %v2421_v55  ;;  %v2633_v8 = vpop.f32.mrf.mxu0  ;;  %v2220_v3 = vmax.f32 %v6864_v22, 0.0  ;;  %v6865_v55 = vld [vmem:[#allocation101_spill] sm:$0xff]  ;;  %v6882_v22 = vld [vmem:[#allocation43_spill] sm:$0xff] }
 0x4e2   : > { %v2162_v13 = vmax.f32 %v1969_v51, 0.0  ;;  %v2791_v58 = vpop.f32.mrf.mxu1  ;;  %v5894_v5 = vadd.f32 %v2630_v17, %v2422_v14  ;;  %v6866_v51 = vld [vmem:[#allocation79_spill] sm:$0xff] }
 0x4e3   : > { %v2792_v43 = vadd.f32 %v2791_v58, %v5713_v9  ;;  %2680 = vmatmul.f32.gmra.mxu0 %v2212_v62  ;;  %v2215_v9 = vmax.f32 %v5334_v28, 0.0  ;;  %v6867_v62 = vld [vmem:[#allocation39_spill] sm:$0xff] }
 0x4e4   : > { %2018 = vmatmul.f32.gmra.mxu2 %v6856_v24  ;;  %2471 = vmatmul.f32.gmra.mxu3 %v2211_v29  ;;  %v1772_v29 = vadd.f32 %v6867_v62, %v5442_v53 }
 0x4e5   : > { %v2939_v35 = vadd.f32 %v2792_v43, %v6857_v20  ;;  %2838 = vmatmul.f32.gmra.mxu1 %v2162_v13  ;;  %v6868_v43 = vld [vmem:[#allocation62_spill] sm:$0xff]  ;;  %v6869_v20 = vld [vmem:[#allocation55_spill] sm:$0xff] }
 0x4e6   : > { %v2224_v24 = vmax.f32 %v6868_v43, 0.0 }
 0x4e7   : > { %3003 = vst [vmem:[%s5648_s17 + $0xb0] sm:$0xff] %v2939_v35  ;;  %v1971_v7 = vpop.f32.mrf.mxu2  ;;  %v2424_v48 = vpop.f32.mrf.mxu3  ;;  %v2223_v35 = vmax.f32 %v6869_v20, 0.0 }
 0x4e8   : > { %v1972_v36 = vadd.f32 %v1971_v7, %v1763_v15  ;;  %v2425_v27 = vadd.f32 %v5801_v4, %v2424_v48  ;;  %v6870_v48 = vld [vmem:[#allocation106_spill] sm:$0xff] }
 0x4ea   : > { %v2165_v44 = vmax.f32 %v1972_v36, 0.0  ;;  %v2794_v60 = vpop.f32.mrf.mxu1  ;;  %v5905_v42 = vadd.f32 %v2633_v8, %v2425_v27  ;;  %v6871_v36 = vld [vmem:[#allocation84_spill] sm:$0xff]  ;;  %v6872_v8 = vld [vmem:[#allocation45_spill] sm:$0xff] }
 0x4eb   : > { %v2795_v11 = vadd.f32 %v2794_v60, %v5724_v46  ;;  %2683 = vmatmul.f32.gmra.mxu0 %v2215_v9  ;;  %v1775_v9 = vadd.f32 %v6872_v8, %v5442_v53  ;;  %v6873_v60 = vld [vmem:[#allocation67_spill] sm:$0xff] }
 0x4ec   : > { %2021 = vmatmul.f32.gmra.mxu2 %v6858_v23  ;;  %2474 = vmatmul.f32.gmra.mxu3 %v2214_v21  ;;  %v6874_v23 = vld [vmem:[#allocation60_spill] sm:$0xff] }
 0x4ed   : > { %v2940_v33 = vadd.f32 %v2795_v11, %v6859_v18  ;;  %2841 = vmatmul.f32.gmra.mxu1 %v2165_v44  ;;  %v2227_v11 = vmax.f32 %v6873_v60, 0.0  ;;  %v2226_v18 = vmax.f32 %v6874_v23, 0.0  ;;  %v6892_v60 = vld [vmem:[#allocation53_spill] sm:$0xff] }
 0x4ef   : > { %3004 = vst [vmem:[%s5648_s17 + $0xb8] sm:$0xff] %v2940_v33  ;;  %v1974_v28 = vpop.f32.mrf.mxu2 }
 0x4f0   : > { %v1975_v16 = vadd.f32 %v1974_v28, %v1766_v25  ;;  %v6875_v28 = vld [vmem:[#allocation111_spill] sm:$0xff] }
 0x4f2   : > { %v2168_v59 = vmax.f32 %v1975_v16, 0.0  ;;  %v2797_v46 = vpop.f32.mrf.mxu1  ;;  %v6876_v16 = vld [vmem:[#allocation89_spill] sm:$0xff] }
 0x4f3   : > { %v2798_v50 = vadd.f32 %v2797_v46, %v5735_v41  ;;  %2686 = vmatmul.f32.gmra.mxu0 %v2218_v63 }
 0x4f4   : > { %2024 = vmatmul.f32.gmra.mxu2 %v6860_v45  ;;  %2477 = vmatmul.f32.gmra.mxu3 %v2217_v26  ;;  %v6877_v26 = vld [vmem:[#allocation52_spill] sm:$0xff] }
 0x4f5   : > { %v2941_v38 = vadd.f32 %v2798_v50, %v6861_v47  ;;  %2844 = vmatmul.f32.gmra.mxu1 %v2168_v59  ;;  %v1778_v59 = vadd.f32 %v6877_v26, %v5442_v53  ;;  %v6878_v45 = vld [vmem:[#allocation72_spill] sm:$0xff] }
 0x4f6   : > { %v2230_v47 = vmax.f32 %v6878_v45, 0.0 }
 0x4f7   : > { %3005 = vst [vmem:[%s5648_s17 + $0xc0] sm:$0xff] %v2941_v38  ;;  %v1977_v61 = vpop.f32.mrf.mxu2  ;;  %v6879_v38 = vld [vmem:[#allocation65_spill] sm:$0xff] }
 0x4f8   : > { %v1978_v52 = vadd.f32 %v1977_v61, %v1769_v12  ;;  %v2229_v31 = vmax.f32 %v6879_v38, 0.0 }
 0x4fa   : > { %v2171_v17 = vmax.f32 %v1978_v52, 0.0  ;;  %v2800_v41 = vpop.f32.mrf.mxu1  ;;  %v6880_v52 = vld [vmem:[#allocation115_spill] sm:$0xff] }
 0x4fb   : > { %v2801_v0 = vadd.f32 %v2800_v41, %v5746_v32  ;;  %2689 = vmatmul.f32.gmra.mxu0 %v2221_v49 }
 0x4fc   : > { %2027 = vmatmul.f32.gmra.mxu2 %v6865_v55  ;;  %2480 = vmatmul.f32.gmra.mxu3 %v2220_v3  ;;  %v1781_v3 = vadd.f32 %v6882_v22, %v5442_v53  ;;  %v6897_v22 = vld [vmem:[#allocation164_spill] sm:$0xff] }
 0x4fd   : > { %v2942_v14 = vadd.f32 %v2801_v0, %v6866_v51  ;;  %2847 = vmatmul.f32.gmra.mxu1 %v2171_v17  ;;  %v6883_v0 = vld [vmem:[#allocation77_spill] sm:$0xff]  ;;  %v6884_v51 = vld [vmem:[#allocation70_spill] sm:$0xff] }
 0x4fe   : > { %v2233_v55 = vmax.f32 %v6883_v0, 0.0 }
 0x4ff   : > { %3006 = vst [vmem:[%s5648_s17 + $0xc8] sm:$0xff] %v2942_v14  ;;  %v1980_v13 = vpop.f32.mrf.mxu2  ;;  %v2232_v14 = vmax.f32 %v6884_v51, 0.0 }
 0x500   : > { %v1981_v58 = vadd.f32 %v1980_v13, %v1772_v29  ;;  %v6885_v13 = vld [vmem:[#allocation119_spill] sm:$0xff] }
 0x502   : > { %v2174_v15 = vmax.f32 %v1981_v58, 0.0  ;;  %v2803_v32 = vpop.f32.mrf.mxu1  ;;  %v6886_v58 = vld [vmem:[#allocation99_spill] sm:$0xff] }
 0x503   : > { %v2804_v7 = vadd.f32 %v2803_v32, %v5757_v56  ;;  %2692 = vmatmul.f32.gmra.mxu0 %v2224_v24  ;;  %v6887_v24 = vld [vmem:[#allocation48_spill] sm:$0xff]  ;;  %v6888_v32 = vld [vmem:[#allocation82_spill] sm:$0xff] }
 0x504   : > { %2030 = vmatmul.f32.gmra.mxu2 %v6870_v48  ;;  %2483 = vmatmul.f32.gmra.mxu3 %v2223_v35  ;;  %v1784_v20 = vadd.f32 %v6887_v24, %v5442_v53  ;;  %v6889_v48 = vld [vmem:[#allocation75_spill] sm:$0xff] }
 0x505   : > { %v2943_v27 = vadd.f32 %v2804_v7, %v6871_v36  ;;  %2850 = vmatmul.f32.gmra.mxu1 %v2174_v15  ;;  %v2236_v7 = vmax.f32 %v6888_v32, 0.0  ;;  %v2235_v36 = vmax.f32 %v6889_v48, 0.0  ;;  %v6902_v48 = vld [vmem:[#allocation80_spill] sm:$0xff] }
 0x507   : > { %3007 = vst [vmem:[%s5648_s17 + $0xd0] sm:$0xff] %v2943_v27  ;;  %v1983_v21 = vpop.f32.mrf.mxu2 }
 0x508   : > { %v1984_v44 = vadd.f32 %v1983_v21, %v1775_v9  ;;  %v6890_v9 = vld [vmem:[#allocation123_spill] sm:$0xff]  ;;  %v6891_v21 = vld [vmem:[#allocation104_spill] sm:$0xff] }
 0x50a   : > { %v2177_v33 = vmax.f32 %v1984_v44, 0.0  ;;  %v2806_v56 = vpop.f32.mrf.mxu1 }
 0x50b   : > { %v2807_v25 = vadd.f32 %v2806_v56, %v5768_v1  ;;  %2695 = vmatmul.f32.gmra.mxu0 %v2227_v11  ;;  %v1787_v11 = vadd.f32 %v6892_v60, %v5442_v53  ;;  %v6903_v60 = vld [vmem:[#allocation177_spill] sm:$0xff] }
 0x50c   : > { %2033 = vmatmul.f32.gmra.mxu2 %v6875_v28  ;;  %2486 = vmatmul.f32.gmra.mxu3 %v2226_v18 }
 0x50d   : > { %v2944_v63 = vadd.f32 %v2807_v25, %v6876_v16  ;;  %2853 = vmatmul.f32.gmra.mxu1 %v2177_v33  ;;  %v6894_v16 = vld [vmem:[#allocation58_spill] sm:$0xff] }
 0x50f   : > { %3008 = vst [vmem:[%s5648_s17 + $0xd8] sm:$0xff] %v2944_v63  ;;  %v1986_v46 = vpop.f32.mrf.mxu2  ;;  %v1790_v63 = vadd.f32 %v6894_v16, %v5442_v53 }
 0x510   : > { %v1987_v50 = vadd.f32 %v1986_v46, %v1778_v59 }
 0x512   : > { %v2180_v12 = vmax.f32 %v1987_v50, 0.0  ;;  %v2809_v1 = vpop.f32.mrf.mxu1 }
 0x513   : > { %v2810_v61 = vadd.f32 %v2809_v1, %v5779_v39  ;;  %2698 = vmatmul.f32.gmra.mxu0 %v2230_v47  ;;  %v6895_v47 = vld [vmem:[#allocation159_spill] sm:$0xff] }
 0x514   : > { %2036 = vmatmul.f32.gmra.mxu2 %v6880_v52  ;;  %2489 = vmatmul.f32.gmra.mxu3 %v2229_v31  ;;  %v6896_v31 = vld [vmem:[#allocation63_spill] sm:$0xff] }
 0x515   : > { %v2945_v49 = vadd.f32 %v2810_v61, %v6881_v34  ;;  %2856 = vmatmul.f32.gmra.mxu1 %v2180_v12 }
 0x517   : > { %3009 = vst [vmem:[%s5648_s17 + $0xe0] sm:$0xff] %v2945_v49  ;;  %v1989_v17 = vpop.f32.mrf.mxu2  ;;  %v5980_v49 = vpop.f32.mrf.mxu3 }
 0x518   : > { %v1990_v41 = vadd.f32 %v1989_v17, %v1781_v3 }
 0x51a   : > { %v2183_v62 = vmax.f32 %v1990_v41, 0.0  ;;  %v2812_v39 = vpop.f32.mrf.mxu1 }
 0x51b   : > { %v2813_v29 = vadd.f32 %v2812_v39, %v5790_v6  ;;  %2701 = vmatmul.f32.gmra.mxu0 %v2233_v55  ;;  %v5986_v55 = vpop.f32.mrf.mxu0 }
 0x51c   : > { %2039 = vmatmul.f32.gmra.mxu2 %v6885_v13  ;;  %2492 = vmatmul.f32.gmra.mxu3 %v2232_v14 }
 0x51d   : > { %v2946_v43 = vadd.f32 %v2813_v29, %v6886_v58  ;;  %2859 = vmatmul.f32.gmra.mxu1 %v2183_v62  ;;  %v6900_v29 = vld [vmem:[#allocation73_spill] sm:$0xff] }
 0x51e   : > { %v1799_v13 = vadd.f32 %v6900_v29, %v5442_v53 }
 0x51f   : > { %3010 = vst [vmem:[%s5648_s17 + $0xe8] sm:$0xff] %v2946_v43  ;;  %v1992_v35 = vpop.f32.mrf.mxu2  ;;  %v5992_v58 = vpop.f32.mrf.mxu3 }
 0x520   : > { %v1993_v15 = vadd.f32 %v1992_v35, %v1784_v20 }
 0x522   : > { %v2186_v27 = vmax.f32 %v1993_v15, 0.0  ;;  %v2815_v6 = vpop.f32.mrf.mxu1 }
 0x523   : > { %v2816_v8 = vadd.f32 %v2815_v6, %v5806_v10  ;;  %2704 = vmatmul.f32.gmra.mxu0 %v2236_v7  ;;  %v6893_v10 = vld [vmem:[#allocation109_spill] sm:$0xff]  ;;  %v5996_v32 = vpop.f32.mrf.mxu0  ;;  %v6901_v7 = vld [vmem:[#allocation172_spill] sm:$0xff] }
 0x524   : > { %2042 = vmatmul.f32.gmra.mxu2 %v6890_v9  ;;  %2495 = vmatmul.f32.gmra.mxu3 %v2235_v36  ;;  %v1802_v36 = vadd.f32 %v6902_v48, %v5442_v53 }
 0x525   : > { %v2947_v44 = vadd.f32 %v2816_v8, %v6891_v21  ;;  %2862 = vmatmul.f32.gmra.mxu1 %v2186_v27 }
 0x527   : > { %3011 = vst [vmem:[%s5648_s17 + $0xf0] sm:$0xff] %v2947_v44  ;;  %v1995_v23 = vpop.f32.mrf.mxu2  ;;  %v2433_v6 = vpop.f32.mrf.mxu3 }
 0x528   : > { %v1996_v18 = vadd.f32 %v1995_v23, %v1787_v11  ;;  %v6904_v11 = vld [vmem:[#allocation87_spill] sm:$0xff] }
 0x529   : > { %v1805_v23 = vadd.f32 %v6904_v11, %v5442_v53 }
 0x52a   : > { %v2189_v33 = vmax.f32 %v1996_v18, 0.0  ;;  %v2818_v56 = vpop.f32.mrf.mxu1 }
 0x52b   : > { %v2819_v25 = vadd.f32 %v2818_v56, %v5817_v2  ;;  %v1793_v2 = vadd.f32 %v6896_v31, %v5442_v53  ;;  %v2642_v18 = vpop.f32.mrf.mxu0 }
 0x52d   : > { %v2948_v28 = vadd.f32 %v2819_v25, %v6893_v10  ;;  %2865 = vmatmul.f32.gmra.mxu1 %v2189_v33 }
 0x52f   : > { %3012 = vst [vmem:[%s5648_s17 + $0xf8] sm:$0xff] %v2948_v28  ;;  %v1998_v26 = vpop.f32.mrf.mxu2  ;;  %v6007_v25 = vpop.f32.mrf.mxu3 }
 0x530   : > { %v1999_v59 = vadd.f32 %v1998_v26, %v1790_v63  ;;  %v6905_v63 = vld [vmem:[#allocation182_spill] sm:$0xff] }
 0x532   : > { %v2192_v46 = vmax.f32 %v1999_v59, 0.0  ;;  %v2821_v50 = vpop.f32.mrf.mxu1 }
 0x533   : > { %v2822_v45 = vadd.f32 %v2821_v50, %v5828_v54  ;;  %v6898_v54 = vld [vmem:[#allocation68_spill] sm:$0xff]  ;;  %v2645_v50 = vpop.f32.mrf.mxu0 }
 0x534   : > { %v1796_v17 = vadd.f32 %v6898_v54, %v5442_v53 }
 0x535   : > { %v2949_v38 = vadd.f32 %v6895_v47, %v2822_v45  ;;  %2868 = vmatmul.f32.gmra.mxu1 %v2192_v46 }
 0x537   : > { %3013 = vst [vmem:[%s5648_s17 + $0x100] sm:$0xff] %v2949_v38  ;;  %v2001_v12 = vpop.f32.mrf.mxu2 }
 0x538   : > { %v2002_v1 = vadd.f32 %v2001_v12, %v1793_v2  ;;  %v2439_v2 = vpop.f32.mrf.mxu3  ;;  %v6907_v12 = vld [vmem:[#allocation187_spill] sm:$0xff] }
 0x53a   : > { %v2195_v61 = vmax.f32 %v2002_v1, 0.0  ;;  %v2824_v52 = vpop.f32.mrf.mxu1 }
 0x53b   : > { %v2825_v34 = vadd.f32 %v2824_v52, %v5839_v40  ;;  %v6899_v40 = vld [vmem:[#allocation167_spill] sm:$0xff] }
 0x53d   : > { %v2950_v3 = vadd.f32 %v6897_v22, %v2825_v34  ;;  %2871 = vmatmul.f32.gmra.mxu1 %v2195_v61  ;;  %v2648_v22 = vpop.f32.mrf.mxu0 }
 0x53f   : > { %3014 = vst [vmem:[%s5648_s17 + $0x108] sm:$0xff] %v2950_v3  ;;  %v2004_v41 = vpop.f32.mrf.mxu2 }
 0x540   : > { %v2005_v0 = vadd.f32 %v2004_v41, %v1796_v17  ;;  %v2428_v41 = vadd.f32 %v5801_v4, %v5980_v49  ;;  %v2431_v49 = vadd.f32 %v5801_v4, %v5992_v58 }
 0x542   : > { %v2198_v51 = vmax.f32 %v2005_v0, 0.0  ;;  %v2827_v14 = vpop.f32.mrf.mxu1  ;;  %v2637_v29 = vadd.f32 %v5986_v55, %v2428_v41  ;;  %v2640_v55 = vadd.f32 %v5996_v32, %v2431_v49 }
 0x543   : > { %v2828_v62 = vadd.f32 %v2827_v14, %v5850_v57 }
 0x545   : > { %v2951_v39 = vadd.f32 %v6899_v40, %v2828_v62  ;;  %2874 = vmatmul.f32.gmra.mxu1 %v2198_v51  ;;  %v6910_v51 = vld [vmem:[#allocation92_spill] sm:$0xff]  ;;  %v2442_v62 = vpop.f32.mrf.mxu3 }
 0x546   : > { %v1814_v14 = vadd.f32 %v6910_v51, %v5442_v53  ;;  %v2443_v51 = vadd.f32 %v5801_v4, %v2442_v62 }
 0x547   : > { %3015 = vst [vmem:[%s5648_s17 + $0x110] sm:$0xff] %v2951_v39  ;;  %v2007_v43 = vpop.f32.mrf.mxu2 }
 0x548   : > { %v2008_v24 = vadd.f32 %v2007_v43, %v1799_v13 }
 0x54a   : > { %v2201_v20 = vmax.f32 %v2008_v24, 0.0  ;;  %v2830_v35 = vpop.f32.mrf.mxu1 }
 0x54b   : > { %v2831_v15 = vadd.f32 %v2830_v35, %v5861_v37 }
 0x54d   : > { %v2952_v57 = vadd.f32 %v6901_v7, %v2831_v15  ;;  %2877 = vmatmul.f32.gmra.mxu1 %v2201_v20  ;;  %v6911_v20 = vld [vmem:[#allocation196_spill] sm:$0xff]  ;;  %v6912_v15 = vld [vmem:[#allocation83_spill] sm:$0xff]  ;;  %v2445_v48 = vpop.f32.mrf.mxu3 }
 0x54e   : > { %v1817_v7 = vadd.f32 %v6912_v15, %v5442_v53  ;;  %v2446_v15 = vadd.f32 %v5801_v4, %v2445_v48 }
 0x54f   : > { %3016 = vst [vmem:[%s5648_s17 + $0x118] sm:$0xff] %v2952_v57  ;;  %v2010_v27 = vpop.f32.mrf.mxu2 }
 0x550   : > { %v2011_v8 = vadd.f32 %v2010_v27, %v1802_v36 }
 0x552   : > { %v2204_v9 = vmax.f32 %v2011_v8, 0.0  ;;  %v2833_v21 = vpop.f32.mrf.mxu1 }
 0x553   : > { %v2834_v44 = vadd.f32 %v2833_v21, %v5872_v19  ;;  %v6906_v19 = vld [vmem:[#allocation78_spill] sm:$0xff]  ;;  %v2434_v21 = vadd.f32 %v5801_v4, %v2433_v6  ;;  %v6915_v6 = vld [vmem:[#allocation204_spill] sm:$0xff] }
 0x554   : > { %v1808_v59 = vadd.f32 %v6906_v19, %v5442_v53  ;;  %v6916_v19 = vld [vmem:[#allocation97_spill] sm:$0xff] }
 0x555   : > { %v2953_v37 = vadd.f32 %v6903_v60, %v2834_v44  ;;  %2880 = vmatmul.f32.gmra.mxu1 %v2204_v9  ;;  %v6913_v44 = vld [vmem:[#allocation200_spill] sm:$0xff]  ;;  %v6914_v60 = vld [vmem:[#allocation90_spill] sm:$0xff] }
 0x557   : > { %3017 = vst [vmem:[%s5648_s17 + $0x120] sm:$0xff] %v2953_v37  ;;  %v2013_v33 = vpop.f32.mrf.mxu2  ;;  %v1820_v37 = vadd.f32 %v6914_v60, %v5442_v53  ;;  %v6923_v60 = vld [vmem:[#allocation220_spill] sm:$0xff] }
 0x558   : > { %v2014_v56 = vadd.f32 %v2013_v33, %v1805_v23 }
 0x55a   : > { %v2207_v10 = vmax.f32 %v2014_v56, 0.0  ;;  %v2836_v28 = vpop.f32.mrf.mxu1  ;;  %v2643_v56 = vadd.f32 %v2642_v18, %v2434_v21 }
 0x55b   : > { %v2837_v16 = vadd.f32 %v2836_v28, %v5883_v30  ;;  %v6908_v30 = vld [vmem:[#allocation85_spill] sm:$0xff] }
 0x55c   : > { %v1811_v61 = vadd.f32 %v6908_v30, %v5442_v53  ;;  %v2440_v30 = vadd.f32 %v5801_v4, %v2439_v2  ;;  %v6920_v2 = vld [vmem:[#allocation95_spill] sm:$0xff] }
 0x55d   : > { %v2954_v26 = vadd.f32 %v6905_v63, %v2837_v16  ;;  %2883 = vmatmul.f32.gmra.mxu1 %v2207_v10  ;;  %v2448_v10 = vpop.f32.mrf.mxu3  ;;  %v2437_v63 = vadd.f32 %v5801_v4, %v6007_v25 }
 0x55f   : > { %3018 = vst [vmem:[%s5648_s17 + $0x128] sm:$0xff] %v2954_v26  ;;  %v2016_v46 = vpop.f32.mrf.mxu2 }
 0x560   : > { %v2017_v45 = vadd.f32 %v2016_v46, %v1808_v59  ;;  %v1823_v59 = vadd.f32 %v6916_v19, %v5442_v53 }
 0x562   : > { %v2210_v47 = vmax.f32 %v2017_v45, 0.0  ;;  %v2839_v38 = vpop.f32.mrf.mxu1 }
 0x563   : > { %v2840_v31 = vadd.f32 %v2839_v38, %v5894_v5  ;;  %v6909_v5 = vld [vmem:[#allocation192_spill] sm:$0xff]  ;;  %v2646_v38 = vadd.f32 %v2645_v50, %v2437_v63 }
 0x565   : > { %v2955_v1 = vadd.f32 %v6907_v12, %v2840_v31  ;;  %2886 = vmatmul.f32.gmra.mxu1 %v2210_v47 }
 0x567   : > { %3019 = vst [vmem:[%s5648_s17 + $0x130] sm:$0xff] %v2955_v1  ;;  %v2019_v52 = vpop.f32.mrf.mxu2  ;;  %v2451_v1 = vpop.f32.mrf.mxu3 }
 0x568   : > { %v2020_v34 = vadd.f32 %v2019_v52, %v1811_v61  ;;  %v6917_v61 = vld [vmem:[#allocation208_spill] sm:$0xff] }
 0x569   : > { %v6918_v52 = vld [vmem:[#allocation88_spill] sm:$0xff] }
 0x56a   : > { %v2213_v3 = vmax.f32 %v2020_v34, 0.0  ;;  %v2842_v54 = vpop.f32.mrf.mxu1  ;;  %v1826_v34 = vadd.f32 %v6918_v52, %v5442_v53  ;;  %v6927_v52 = vld [vmem:[#allocation231_spill] sm:$0xff] }
 0x56b   : > { %v2843_v17 = vadd.f32 %v2842_v54, %v5905_v42  ;;  %v2651_v42 = vpop.f32.mrf.mxu0 }
 0x56d   : > { %v2956_v0 = vadd.f32 %v6909_v5, %v2843_v17  ;;  %2889 = vmatmul.f32.gmra.mxu1 %v2213_v3  ;;  %v2649_v17 = vadd.f32 %v2648_v22, %v2440_v30 }
 0x56f   : > { %3020 = vst [vmem:[%s5648_s17 + $0x138] sm:$0xff] %v2956_v0  ;;  %v2022_v40 = vpop.f32.mrf.mxu2 }
 0x570   : > { %v2023_v39 = vadd.f32 %v2022_v40, %v1814_v14  ;;  %v6919_v14 = vld [vmem:[#allocation212_spill] sm:$0xff] }
 0x572   : > { %v2216_v13 = vmax.f32 %v2023_v39, 0.0  ;;  %v2845_v43 = vpop.f32.mrf.mxu1  ;;  %v1829_v39 = vadd.f32 %v6920_v2, %v5442_v53 }
 0x573   : > { %v2846_v24 = vadd.f32 %v2845_v43, %v2637_v29  ;;  %v2654_v11 = vpop.f32.mrf.mxu0  ;;  %v2454_v29 = vpop.f32.mrf.mxu3 }
 0x575   : > { %v2957_v35 = vadd.f32 %v6911_v20, %v2846_v24  ;;  %2892 = vmatmul.f32.gmra.mxu1 %v2216_v13  ;;  %v2652_v24 = vadd.f32 %v2651_v42, %v2443_v51 }
 0x577   : > { %3021 = vst [vmem:[%s5648_s17 + $0x140] sm:$0xff] %v2957_v35  ;;  %v2025_v57 = vpop.f32.mrf.mxu2 }
 0x578   : > { %v2026_v36 = vadd.f32 %v2025_v57, %v1817_v7  ;;  %v6921_v7 = vld [vmem:[#allocation216_spill] sm:$0xff]  ;;  %v6922_v57 = vld [vmem:[#allocation102_spill] sm:$0xff] }
 0x57a   : > { %v2219_v27 = vmax.f32 %v2026_v36, 0.0  ;;  %v2848_v8 = vpop.f32.mrf.mxu1  ;;  %v1832_v36 = vadd.f32 %v6922_v57, %v5442_v53 }
 0x57b   : > { %v2849_v9 = vadd.f32 %v2848_v8, %v2640_v55  ;;  %v2657_v45 = vpop.f32.mrf.mxu0 }
 0x57d   : > { %v2958_v58 = vadd.f32 %v6913_v44, %v2849_v9  ;;  %2895 = vmatmul.f32.gmra.mxu1 %v2219_v27  ;;  %v2457_v27 = vpop.f32.mrf.mxu3  ;;  %v2655_v9 = vadd.f32 %v2654_v11, %v2446_v15 }
 0x57f   : > { %3022 = vst [vmem:[%s5648_s17 + $0x148] sm:$0xff] %v2958_v58  ;;  %v2028_v23 = vpop.f32.mrf.mxu2  ;;  %v2449_v58 = vadd.f32 %v5801_v4, %v2448_v10  ;;  %v6925_v10 = vld [vmem:[#allocation224_spill] sm:$0xff] }
 0x580   : > { %v2029_v33 = vadd.f32 %v2028_v23, %v1820_v37  ;;  %v6924_v37 = vld [vmem:[#allocation93_spill] sm:$0xff] }
 0x581   : > { %v1835_v23 = vadd.f32 %v6924_v37, %v5442_v53  ;;  %v3204_v37 = vld [vmem:[%s6119_s7] ss:$0 sm:$0xff] }
 0x582   : > { %v2222_v28 = vmax.f32 %v2029_v33, 0.0  ;;  %v2851_v32 = vpop.f32.mrf.mxu1 }
 0x583   : > { %v2852_v16 = vadd.f32 %v2851_v32, %v2643_v56  ;;  %v2660_v41 = vpop.f32.mrf.mxu0  ;;  %v2658_v32 = vadd.f32 %v2657_v45, %v2449_v58  ;;  %v6926_v45 = vld [vmem:[#allocation228_spill] sm:$0xff] }
 0x585   : > { %v2959_v26 = vadd.f32 %v6915_v6, %v2852_v16  ;;  %2898 = vmatmul.f32.gmra.mxu1 %v2222_v28  ;;  %v2460_v16 = vpop.f32.mrf.mxu3 }
 0x587   : > { %3023 = vst [vmem:[%s5648_s17 + $0x150] sm:$0xff] %v2959_v26  ;;  %v2031_v46 = vpop.f32.mrf.mxu2  ;;  %v2452_v26 = vadd.f32 %v5801_v4, %v2451_v1 }
 0x588   : > { %v2032_v47 = vadd.f32 %v2031_v46, %v1823_v59 }
 0x589   : > { %v2661_v46 = vadd.f32 %v2660_v41, %v2452_v26 }
 0x58a   : > { %v2225_v18 = vmax.f32 %v2032_v47, 0.0  ;;  %v2854_v31 = vpop.f32.mrf.mxu1 }
 0x58b   : > { %v2855_v12 = vadd.f32 %v2854_v31, %v2646_v38  ;;  %v2663_v35 = vpop.f32.mrf.mxu0 }
 0x58d   : > { %v2960_v25 = vadd.f32 %v6917_v61, %v2855_v12  ;;  %2901 = vmatmul.f32.gmra.mxu1 %v2225_v18  ;;  %v2463_v38 = vpop.f32.mrf.mxu3  ;;  %v2455_v18 = vadd.f32 %v5801_v4, %v2454_v29 }
 0x58e   : > { %v2464_v29 = vadd.f32 %v5801_v4, %v2463_v38 }
 0x58f   : > { %3024 = vst [vmem:[%s5648_s17 + $0x158] sm:$0xff] %v2960_v25  ;;  %v2034_v3 = vpop.f32.mrf.mxu2  ;;  %v2664_v12 = vadd.f32 %v2663_v35, %v2455_v18  ;;  %v2458_v25 = vadd.f32 %v5801_v4, %v2457_v27 }
 0x590   : > { %v2035_v54 = vadd.f32 %v2034_v3, %v1826_v34 }
 0x592   : > { %v2228_v5 = vmax.f32 %v2035_v54, 0.0  ;;  %v2857_v50 = vpop.f32.mrf.mxu1 }
 0x593   : > { %v2858_v0 = vadd.f32 %v2857_v50, %v2649_v17  ;;  %v2666_v33 = vpop.f32.mrf.mxu0  ;;  %v2461_v50 = vadd.f32 %v5801_v4, %v2460_v16 }
 0x594   : > { %v2667_v54 = vadd.f32 %v2666_v33, %v2458_v25  ;;  %v6932_v33 = vld [vmem:[#allocation246_spill] sm:$0xff] }
 0x595   : > { %v2961_v40 = vadd.f32 %v6919_v14, %v2858_v0  ;;  %2904 = vmatmul.f32.gmra.mxu1 %v2228_v5  ;;  %v2466_v3 = vpop.f32.mrf.mxu3  ;;  %v6928_v0 = vld [vmem:[#allocation234_spill] sm:$0xff] }
 0x596   : > { %v2467_v15 = vadd.f32 %v5801_v4, %v2466_v3 }
 0x597   : > { %3025 = vst [vmem:[%s5648_s17 + $0x160] sm:$0xff] %v2961_v40  ;;  %v2037_v13 = vpop.f32.mrf.mxu2 }
 0x598   : > { %v2038_v43 = vadd.f32 %v2037_v13, %v1829_v39  ;;  %v6929_v13 = vld [vmem:[#allocation237_spill] sm:$0xff] }
 0x59a   : > { %v2231_v49 = vmax.f32 %v2038_v43, 0.0  ;;  %v2860_v22 = vpop.f32.mrf.mxu1 }
 0x59b   : > { %v2861_v20 = vadd.f32 %v2860_v22, %v2652_v24  ;;  %v2669_v59 = vpop.f32.mrf.mxu0 }
 0x59c   : > { %v2670_v40 = vadd.f32 %v2669_v59, %v2461_v50 }
 0x59d   : > { %v2962_v62 = vadd.f32 %v6921_v7, %v2861_v20  ;;  %2907 = vmatmul.f32.gmra.mxu1 %v2231_v49  ;;  %v2469_v14 = vpop.f32.mrf.mxu3  ;;  %v6930_v7 = vld [vmem:[#allocation240_spill] sm:$0xff] }
 0x59f   : > { %3026 = vst [vmem:[%s5648_s17 + $0x168] sm:$0xff] %v2962_v62  ;;  %v2040_v55 = vpop.f32.mrf.mxu2 }
 0x5a0   : > { %v2041_v8 = vadd.f32 %v2040_v55, %v1832_v36 }
 0x5a2   : > { %v2234_v21 = vmax.f32 %v2041_v8, 0.0  ;;  %v2863_v42 = vpop.f32.mrf.mxu1 }
 0x5a3   : > { %v2864_v44 = vadd.f32 %v2863_v42, %v2655_v9  ;;  %v2672_v30 = vpop.f32.mrf.mxu0  ;;  %v2470_v9 = vadd.f32 %v5801_v4, %v2469_v14 }
 0x5a4   : > { %v2673_v49 = vadd.f32 %v2672_v30, %v2464_v29 }
 0x5a5   : > { %v2963_v48 = vadd.f32 %v6923_v60, %v2864_v44  ;;  %2910 = vmatmul.f32.gmra.mxu1 %v2234_v21  ;;  %v2472_v22 = vpop.f32.mrf.mxu3  ;;  %v6931_v21 = vld [vmem:[#allocation243_spill] sm:$0xff] }
 0x5a7   : > { %3027 = vst [vmem:[%s5648_s17 + $0x170] sm:$0xff] %v2963_v48  ;;  %v2043_v56 = vpop.f32.mrf.mxu2 }
 0x5a8   : > { %v2044_v28 = vadd.f32 %v2043_v56, %v1835_v23  ;;  %v2473_v23 = vadd.f32 %v3204_v37, %v2472_v22 }
 0x5aa   : > { %v2237_v11 = vmax.f32 %v2044_v28, 0.0  ;;  %v2866_v63 = vpop.f32.mrf.mxu1 }
 0x5ab   : > { %v2867_v6 = vadd.f32 %v2866_v63, %v2658_v32  ;;  %v2675_v5 = vpop.f32.mrf.mxu0 }
 0x5ac   : > { %v2676_v36 = vadd.f32 %v2675_v5, %v2467_v15  ;;  %v6936_v5 = vld [vmem:[#allocation258_spill] sm:$0xff] }
 0x5ad   : > { %v2964_v19 = vadd.f32 %v6925_v10, %v2867_v6  ;;  %2913 = vmatmul.f32.gmra.mxu1 %v2237_v11  ;;  %v2475_v8 = vpop.f32.mrf.mxu3  ;;  %v6933_v6 = vld [vmem:[#allocation249_spill] sm:$0xff] }
 0x5ae   : > { %v2476_v63 = vadd.f32 %v3204_v37, %v2475_v8 }
 0x5af   : > { %3028 = vst [vmem:[%s5648_s17 + $0x178] sm:$0xff] %v2964_v19 }
 0x5b2   : > { %v2869_v53 = vpop.f32.mrf.mxu1 }
 0x5b3   : > { %v2870_v47 = vadd.f32 %v2869_v53, %v2661_v46  ;;  %v2678_v24 = vpop.f32.mrf.mxu0 }
 0x5b4   : > { %v2679_v44 = vadd.f32 %v2678_v24, %v2470_v9 }
 0x5b5   : > { %v2965_v31 = vadd.f32 %v6926_v45, %v2870_v47  ;;  %v2478_v28 = vpop.f32.mrf.mxu3  ;;  %v6934_v47 = vld [vmem:[#allocation252_spill] sm:$0xff] }
 0x5b6   : > { %v2479_v53 = vadd.f32 %v3204_v37, %v2478_v28 }
 0x5b7   : > { %3029 = vst [vmem:[%s5648_s17 + $0x180] sm:$0xff] %v2965_v31 }
 0x5ba   : > { %v2872_v61 = vpop.f32.mrf.mxu1 }
 0x5bb   : > { %v2873_v1 = vadd.f32 %v2872_v61, %v2664_v12  ;;  %v2681_v57 = vpop.f32.mrf.mxu0 }
 0x5bc   : > { %v2682_v32 = vadd.f32 %v2681_v57, %v2473_v23 }
 0x5bd   : > { %v2966_v34 = vadd.f32 %v6927_v52, %v2873_v1  ;;  %v2481_v10 = vpop.f32.mrf.mxu3  ;;  %v6935_v1 = vld [vmem:[#allocation255_spill] sm:$0xff] }
 0x5be   : > { %v2482_v61 = vadd.f32 %v3204_v37, %v2481_v10 }
 0x5bf   : > { %3030 = vst [vmem:[%s5648_s17 + $0x188] sm:$0xff] %v2966_v34 }
 0x5c2   : > { %v2875_v17 = vpop.f32.mrf.mxu1 }
 0x5c3   : > { %v2876_v41 = vadd.f32 %v2875_v17, %v2667_v54  ;;  %v2684_v58 = vpop.f32.mrf.mxu0 }
 0x5c4   : > { %v2685_v19 = vadd.f32 %v2684_v58, %v2476_v63 }
 0x5c5   : > { %v2967_v51 = vadd.f32 %v6928_v0, %v2876_v41  ;;  %v2484_v31 = vpop.f32.mrf.mxu3 }
 0x5c6   : > { %v2485_v41 = vadd.f32 %v3204_v37, %v2484_v31 }
 0x5c7   : > { %3031 = vst [vmem:[%s5648_s17 + $0x190] sm:$0xff] %v2967_v51 }
 0x5ca   : > { %v2878_v2 = vpop.f32.mrf.mxu1 }
 0x5cb   : > { %v2879_v39 = vadd.f32 %v2878_v2, %v2670_v40  ;;  %v2687_v11 = vpop.f32.mrf.mxu0 }
 0x5cc   : > { %v2688_v45 = vadd.f32 %v2687_v11, %v2479_v53 }
 0x5cd   : > { %v2968_v43 = vadd.f32 %v6929_v13, %v2879_v39  ;;  %v2487_v17 = vpop.f32.mrf.mxu3  ;;  %v6937_v39 = vld [vmem:[#allocation261_spill] sm:$0xff] }
 0x5ce   : > { %v2488_v2 = vadd.f32 %v3204_v37, %v2487_v17 }
 0x5cf   : > { %3032 = vst [vmem:[%s5648_s17 + $0x198] sm:$0xff] %v2968_v43 }
 0x5d2   : > { %v2881_v20 = vpop.f32.mrf.mxu1 }
 0x5d3   : > { %v2882_v35 = vadd.f32 %v2881_v20, %v2673_v49  ;;  %v2690_v18 = vpop.f32.mrf.mxu0 }
 0x5d4   : > { %v2691_v34 = vadd.f32 %v2690_v18, %v2482_v61 }
 0x5d5   : > { %v2969_v62 = vadd.f32 %v6930_v7, %v2882_v35  ;;  %v2490_v13 = vpop.f32.mrf.mxu3  ;;  %v6938_v35 = vld [vmem:[#allocation264_spill] sm:$0xff] }
 0x5d6   : > { %v2491_v20 = vadd.f32 %v3204_v37, %v2490_v13 }
 0x5d7   : > { %3033 = vst [vmem:[%s5648_s17 + $0x1a0] sm:$0xff] %v2969_v62 }
 0x5da   : > { %v2884_v55 = vpop.f32.mrf.mxu1 }
 0x5db   : > { %v2885_v27 = vadd.f32 %v2884_v55, %v2676_v36  ;;  %v2693_v52 = vpop.f32.mrf.mxu0 }
 0x5dc   : > { %v2694_v0 = vadd.f32 %v2693_v52, %v2485_v41 }
 0x5dd   : > { %v2970_v42 = vadd.f32 %v6931_v21, %v2885_v27  ;;  %v2493_v7 = vpop.f32.mrf.mxu3  ;;  %v6939_v27 = vld [vmem:[#allocation267_spill] sm:$0xff] }
 0x5de   : > { %v2494_v55 = vadd.f32 %v3204_v37, %v2493_v7 }
 0x5df   : > { %3034 = vst [vmem:[%s5648_s17 + $0x1a8] sm:$0xff] %v2970_v42 }
 0x5e2   : > { %v2887_v60 = vpop.f32.mrf.mxu1 }
 0x5e3   : > { %v2888_v48 = vadd.f32 %v2887_v60, %v2679_v44  ;;  %v2696_v51 = vpop.f32.mrf.mxu0 }
 0x5e4   : > { %v2697_v43 = vadd.f32 %v2696_v51, %v2488_v2 }
 0x5e5   : > { %v2971_v56 = vadd.f32 %v6932_v33, %v2888_v48  ;;  %v2496_v42 = vpop.f32.mrf.mxu3  ;;  %v6940_v48 = vld [vmem:[#allocation270_spill] sm:$0xff] }
 0x5e6   : > { %v2497_v60 = vadd.f32 %v3204_v37, %v2496_v42 }
 0x5e7   : > { %3035 = vst [vmem:[%s5648_s17 + $0x1b0] sm:$0xff] %v2971_v56 }
 0x5ea   : > { %v2890_v4 = vpop.f32.mrf.mxu1 }
 0x5eb   : > { %v2891_v16 = vadd.f32 %v2890_v4, %v2682_v32  ;;  %v2699_v22 = vpop.f32.mrf.mxu0  ;;  %v6941_v4 = vld [vmem:[#allocation35_spill] sm:$0xff] }
 0x5ec   : > { %v2700_v62 = vadd.f32 %v2699_v22, %v2491_v20 }
 0x5ed   : > { %v2972_v26 = vadd.f32 %v6933_v6, %v2891_v16 }
 0x5ef   : > { %3036 = vst [vmem:[%s5648_s17 + $0x1b8] sm:$0xff] %v2972_v26 }
 0x5f2   : > { %v2893_v59 = vpop.f32.mrf.mxu1 }
 0x5f3   : > { %v2894_v46 = vadd.f32 %v2893_v59, %v2685_v19  ;;  %v2702_v9 = vpop.f32.mrf.mxu0 }
 0x5f4   : > { %v2703_v21 = vadd.f32 %v2702_v9, %v2494_v55 }
 0x5f5   : > { %v2973_v38 = vadd.f32 %v6934_v47, %v2894_v46 }
 0x5f7   : > { %3037 = vst [vmem:[%s5648_s17 + $0x1c0] sm:$0xff] %v2973_v38 }
 0x5fa   : > { %v2896_v12 = vpop.f32.mrf.mxu1 }
 0x5fb   : > { %v2897_v30 = vadd.f32 %v2896_v12, %v2688_v45  ;;  %v2705_v33 = vpop.f32.mrf.mxu0 }
 0x5fc   : > { %v2706_v56 = vadd.f32 %v2705_v33, %v2497_v60 }
 0x5fd   : > { %v2974_v25 = vadd.f32 %v6935_v1, %v2897_v30 }
 0x5ff   : > { %3038 = vst [vmem:[%s5648_s17 + $0x1c8] sm:$0xff] %v2974_v25 }
 0x602   : > { %v2899_v3 = vpop.f32.mrf.mxu1 }
 0x603   : > { %v2900_v54 = vadd.f32 %v2899_v3, %v2691_v34 }
 0x605   : > { %v2975_v50 = vadd.f32 %v6936_v5, %v2900_v54 }
 0x607   : > { %3039 = vst [vmem:[%s5648_s17 + $0x1d0] sm:$0xff] %v2975_v50 }
 0x60a   : > { %v2902_v14 = vpop.f32.mrf.mxu1 }
 0x60b   : > { %v2903_v40 = vadd.f32 %v2902_v14, %v2694_v0 }
 0x60d   : > { %v2976_v29 = vadd.f32 %v6937_v39, %v2903_v40 }
 0x60f   : > { %3040 = vst [vmem:[%s5648_s17 + $0x1d8] sm:$0xff] %v2976_v29 }
 0x612   : > { %v2905_v24 = vpop.f32.mrf.mxu1 }
 0x613   : > { %v2906_v49 = vadd.f32 %v2905_v24, %v2697_v43 }
 0x615   : > { %v2977_v15 = vadd.f32 %v6938_v35, %v2906_v49 }
 0x617   : > { %3041 = vst [vmem:[%s5648_s17 + $0x1e0] sm:$0xff] %v2977_v15 }
 0x61a   : > { %v2908_v57 = vpop.f32.mrf.mxu1 }
 0x61b   : > { %v2909_v36 = vadd.f32 %v2908_v57, %v2700_v62 }
 0x61d   : > { %v2978_v8 = vadd.f32 %v6939_v27, %v2909_v36 }
 0x61f   : > { %3042 = vst [vmem:[%s5648_s17 + $0x1e8] sm:$0xff] %v2978_v8 }
 0x622   : > { %v2911_v44 = vpop.f32.mrf.mxu1 }
 0x623   : > { %v2912_v58 = vadd.f32 %v2911_v44, %v2703_v21 }
 0x625   : > { %v2979_v23 = vadd.f32 %v6940_v48, %v2912_v58 }
 0x627   : > { %3043 = vst [vmem:[%s5648_s17 + $0x1f0] sm:$0xff] %v2979_v23 }
 0x62a   : > { %v2914_v28 = vpop.f32.mrf.mxu1 }
 0x62b   : > { %v2915_v32 = vadd.f32 %v2914_v28, %v2706_v56 }
 0x62d   : > { %v2980_v16 = vadd.f32 %v6941_v4, %v2915_v32 }
 0x62f   : > { %3044 = vst [vmem:[%s5648_s17 + $0x1f8] sm:$0xff] %v2980_v16 }
 0x630 PF: > { %s18_s27 = sadd.s32 1, %s3211_s27  }
 0x631   : > { %p15_p4 = scmp.ge.s32.totalorder %s18_s27, 6  }
 0x633   :  { %17 = sbr.rel (!%p15_p4) target bundleno = 1 (0x1), region = 85 }

</bundles_post_ra>
